<compile_context>
chip_gen: v7x
topology: tpu7x:2x2x1
jax: 0.10.0
libtpu: 0.0.40
codegen_flags: <defaults>
</compile_context>

<pallas_src>
import functools

import jax
import jax.numpy as jnp
from jax.experimental import pallas as pl
from jax.experimental.pallas import tpu as pltpu


def _round_up(x, m):
    return ((x + m - 1) // m) * m


# -----------------------------------------------------------------------------
# Pallas kernel: fused VAE forward for one batch tile
# -----------------------------------------------------------------------------
def _vae_fwd_kernel(
    x_ref, eps_ref,        # (TM, 1600) producer dtype, (TM, L)
    w1_ref, b1_ref,        # encoder linear1: 1600 -> 512      (bf16 W, f32 b)
    wms_ref, bms_ref,      # fused encoder linear2|linear3: 512 -> 2L
    wd1_ref, bd1_ref,      # decoder linear1: L -> 512
    wd2_ref, bd2_ref,      # decoder linear2: 512 -> 1600
    recon_ref,             # (TM, 1600) bf16
    lat_ref,               # (TM, 4L)  f32:  [ z | mu | sigma | kl_terms ]
    *, L,
):
    # cast to MXU-native bf16 inside the kernel (no wrapper-side cast pass)
    x = x_ref[...].astype(jnp.bfloat16)
    eps = eps_ref[...].astype(jnp.float32)

    # ---- encoder -------------------------------------------------------------
    h = jnp.dot(x, w1_ref[...], preferred_element_type=jnp.float32) + b1_ref[...]
    h = jnp.maximum(h, 0.0)                                         # (TM, 512) f32

    # fused mu / log_sigma projection: one N=2L matmul instead of two N=L ones
    ms = jnp.dot(h.astype(jnp.bfloat16), wms_ref[...],
                 preferred_element_type=jnp.float32) + bms_ref[...]  # (TM, 2L)
    mu = ms[:, :L]
    log_sigma = ms[:, L:]
    sigma = jnp.exp(log_sigma)

    z = mu + sigma * eps                                            # reparameterize

    # per-element KL terms; reduced in the wrapper over the valid (unpadded) rows
    kl_terms = sigma * sigma + mu * mu - log_sigma - 0.5

    # ---- decoder -------------------------------------------------------------
    hd = jnp.dot(z.astype(jnp.bfloat16), wd1_ref[...],
                 preferred_element_type=jnp.float32) + bd1_ref[...]
    hd = jnp.maximum(hd, 0.0)                                       # (TM, 512)

    logits = jnp.dot(hd.astype(jnp.bfloat16), wd2_ref[...],
                     preferred_element_type=jnp.float32) + bd2_ref[...]
    recon_ref[...] = jax.nn.sigmoid(logits).astype(recon_ref.dtype)  # bf16 writeback

    # lane-dense latent slab (4L == 128 for L == 32)
    lat_ref[...] = jnp.concatenate([z, mu, sigma, kl_terms], axis=-1)


# -----------------------------------------------------------------------------
# Parameter packing for the kernel: bf16 weights, fused mu/log_sigma projection
# -----------------------------------------------------------------------------
def prepare_kernel_params(params):
    wms = jnp.concatenate([params["w2"], params["w3"]], axis=1).astype(jnp.bfloat16)
    bms = jnp.concatenate([params["b2"], params["b3"]], axis=1)      # f32 (1, 2L)
    return dict(
        w1=params["w1"].astype(jnp.bfloat16), b1=params["b1"],
        wms=wms, bms=bms,
        wd1=params["wd1"].astype(jnp.bfloat16), bd1=params["bd1"],
        wd2=params["wd2"].astype(jnp.bfloat16), bd2=params["bd2"],
    )


# -----------------------------------------------------------------------------
# Wrapper
# -----------------------------------------------------------------------------
def vae_forward(x_nchw, eps, params, *, block_b=512):
    """x_nchw: (B, C, H, W) with C*H*W == 1600.  Returns (recon, z, mu, sigma, kl)."""
    B = x_nchw.shape[0]
    x = x_nchw.reshape(B, -1)           # torch.flatten(start_dim=1); dtype unchanged
    F_in = x.shape[1]
    assert F_in == 1600, "encoder expects 1600 flattened features"
    L = params["w2"].shape[1]

    kp = prepare_kernel_params(params)

    # ---- batch tiling ---------------------------------------------------------
    B8 = _round_up(B, 8)                # sublane granularity
    TM = min(block_b, B8)
    # v7x megacore: make the "parallel" batch axis span >= 2 grid tiles whenever
    # there is enough work to split across both TensorCores.
    if TM == B8 and B8 >= 16:
        TM = _round_up(pl.cdiv(B8, 2), 8)
    num_tiles = pl.cdiv(B8, TM)

    # Pad only the (rare, <=7 row) sublane-ragged tail.  The TM-ragged last grid
    # tile is handled by Pallas' masked edge blocks (rows are independent), so no
    # full batch-tile padding pass is materialized.
    eps_in = eps
    if B8 != B:
        pad = B8 - B
        x = jnp.pad(x, ((0, pad), (0, 0)))
        eps_in = jnp.pad(eps, ((0, pad), (0, 0)))

    # activations: tiled along the batch axis
    def batch_spec(feat):
        return pl.BlockSpec((TM, feat), lambda i: (i, 0))

    # weights / biases: full array, constant index_map -> resident in VMEM
    def resident_spec(arr):
        nd = arr.ndim
        return pl.BlockSpec(arr.shape, lambda i, _n=nd: (0,) * _n)

    in_specs = [
        batch_spec(F_in),                    # x
        batch_spec(L),                       # eps
        resident_spec(kp["w1"]), resident_spec(kp["b1"]),
        resident_spec(kp["wms"]), resident_spec(kp["bms"]),
        resident_spec(kp["wd1"]), resident_spec(kp["bd1"]),
        resident_spec(kp["wd2"]), resident_spec(kp["bd2"]),
    ]

    out_shapes = (
        jax.ShapeDtypeStruct((B8, F_in), jnp.bfloat16),    # reconstruction (bf16 writeback)
        jax.ShapeDtypeStruct((B8, 4 * L), jnp.float32),    # z | mu | sigma | kl_terms
    )
    out_specs = (batch_spec(F_in), batch_spec(4 * L))

    # advisory cost estimate for the XLA scheduler
    flops = 2 * B8 * (F_in * 512 + 512 * 2 * L + L * 512 + 512 * F_in)
    transcendentals = B8 * (L + F_in)
    weight_bytes = sum(int(v.size) * v.dtype.itemsize for v in kp.values())
    bytes_accessed = (
        int(x.size) * x.dtype.itemsize
        + int(eps_in.size) * eps_in.dtype.itemsize
        + weight_bytes
        + B8 * F_in * 2            # bf16 recon
        + B8 * 4 * L * 4           # f32 latent slab
    )

    kernel = functools.partial(_vae_fwd_kernel, L=L)

    recon_pad, lat_pad = pl.pallas_call(
        kernel,
        out_shape=out_shapes,
        grid=(num_tiles,),
        in_specs=in_specs,
        out_specs=out_specs,
        compiler_params=pltpu.CompilerParams(
            dimension_semantics=("parallel",),
            vmem_limit_bytes=48 << 20,       # fits v7x's 64 MiB physical VMEM
        ),
        cost_estimate=pl.CostEstimate(
            flops=flops,
            transcendentals=transcendentals,
            bytes_accessed=bytes_accessed,
        ),
    )(
        x, eps_in,
        kp["w1"], kp["b1"],
        kp["wms"], kp["bms"],
        kp["wd1"], kp["bd1"],
        kp["wd2"], kp["bd2"],
    )

    recon = recon_pad[:B]                    # bf16
    z = lat_pad[:B, :L]
    mu = lat_pad[:B, L:2 * L]
    sigma = lat_pad[:B, 2 * L:3 * L]
    kl = jnp.sum(lat_pad[:B, 3 * L:])        # padded rows excluded from the sum
    return recon, z, mu, sigma, kl


# -----------------------------------------------------------------------------
# Deterministic parameter init (PyTorch nn.Linear default: U(-1/sqrt(fan_in), .))
# -----------------------------------------------------------------------------
def init_params(key, latent_dims):
    def linear(key, fan_in, fan_out):
        kw, kb = jax.random.split(key)
        bound = 1.0 / jnp.sqrt(fan_in)
        # stored as (in, out) so the kernel computes x @ W + b (== torch x @ W.T + b)
        w = jax.random.uniform(kw, (fan_in, fan_out), jnp.float32, -bound, bound)
        b = jax.random.uniform(kb, (1, fan_out), jnp.float32, -bound, bound)
        return w, b

    keys = jax.random.split(key, 5)
    w1, b1 = linear(keys[0], 1600, 512)
    w2, b2 = linear(keys[1], 512, latent_dims)
    w3, b3 = linear(keys[2], 512, latent_dims)
    wd1, bd1 = linear(keys[3], latent_dims, 512)
    wd2, bd2 = linear(keys[4], 512, 1600)
    return dict(w1=w1, b1=b1, w2=w2, b2=b2, w3=w3, b3=b3,
                wd1=wd1, bd1=bd1, wd2=wd2, bd2=bd2)


# -----------------------------------------------------------------------------
# Reference (pure JAX, same bf16 weight / activation casts as the kernel)
# -----------------------------------------------------------------------------
def vae_forward_ref(x_nchw, eps, params):
    B = x_nchw.shape[0]
    L = params["w2"].shape[1]
    kp = prepare_kernel_params(params)
    x = x_nchw.reshape(B, -1).astype(jnp.bfloat16)

    h = jnp.dot(x, kp["w1"], preferred_element_type=jnp.float32) + kp["b1"]
    h = jnp.maximum(h, 0.0)
    ms = jnp.dot(h.astype(jnp.bfloat16), kp["wms"],
                 preferred_element_type=jnp.float32) + kp["bms"]
    mu = ms[:, :L]
    log_sigma = ms[:, L:]
    sigma = jnp.exp(log_sigma)
    z = mu + sigma * eps.astype(jnp.float32)
    kl = jnp.sum(sigma ** 2 + mu ** 2 - log_sigma - 0.5)

    hd = jnp.dot(z.astype(jnp.bfloat16), kp["wd1"],
                 preferred_element_type=jnp.float32) + kp["bd1"]
    hd = jnp.maximum(hd, 0.0)
    recon = jax.nn.sigmoid(jnp.dot(hd.astype(jnp.bfloat16), kp["wd2"],
                                   preferred_element_type=jnp.float32) + kp["bd2"])
    return recon, z, mu, sigma, kl


if __name__ == "__main__":
    latent_dims = 32
    B = 2

    key = jax.random.PRNGKey(0)
    k_param, k_x, k_eps = jax.random.split(key, 3)

    params = init_params(k_param, latent_dims)
    # input image: NCHW, 1*40*40 = 1600 features after flatten
    x = jax.random.uniform(k_x, (B, 1, 40, 40), jnp.float32)
    # the torch module samples eps internally (self.N.sample); here eps is explicit
    eps = jax.random.normal(k_eps, (B, latent_dims), jnp.float32)

    recon, z, mu, sigma, kl = vae_forward(x, eps, params)
    jax.block_until_ready((recon, z, mu, sigma, kl))

    # sanity check against a pure-JAX reference using the same bf16 weights
    r_recon, r_z, r_mu, r_sigma, r_kl = vae_forward_ref(x, eps, params)
    assert recon.shape == (B, 1600) and z.shape == (B, latent_dims)
    assert jnp.allclose(recon.astype(jnp.float32), r_recon, atol=2e-2, rtol=2e-2)
    assert jnp.allclose(z, r_z, atol=2e-2, rtol=2e-2)
    assert jnp.allclose(mu, r_mu, atol=2e-2, rtol=2e-2)
    assert jnp.allclose(sigma, r_sigma, atol=2e-2, rtol=2e-2)
    assert jnp.allclose(kl, r_kl, atol=1e-1, rtol=1e-2)

    print("KERNEL_OK")
</pallas_src>

<mosaic_0001>
module attributes {stable_mosaic.version = 11 : i64} {
  func.func @_vae_fwd_kernel(%arg0: i32, %arg1: memref<8x1600xf32, #tpu.memory_space<vmem>>, %arg2: memref<8x32xf32, #tpu.memory_space<vmem>>, %arg3: memref<1600x512xbf16, #tpu.memory_space<vmem>>, %arg4: memref<1x512xf32, #tpu.memory_space<vmem>>, %arg5: memref<512x64xbf16, #tpu.memory_space<vmem>>, %arg6: memref<1x64xf32, #tpu.memory_space<vmem>>, %arg7: memref<32x512xbf16, #tpu.memory_space<vmem>>, %arg8: memref<1x512xf32, #tpu.memory_space<vmem>>, %arg9: memref<512x1600xbf16, #tpu.memory_space<vmem>>, %arg10: memref<1x1600xf32, #tpu.memory_space<vmem>>, %arg11: memref<8x1600xbf16, #tpu.memory_space<vmem>>, %arg12: memref<8x128xf32, #tpu.memory_space<vmem>>) attributes {dimension_semantics = [#tpu.dimension_semantics<parallel>], iteration_bounds = array<i64: 1>, scalar_prefetch = 0 : i64, scratch_operands = 0 : i64, tpu.core_type = #tpu.core_type<tc>, window_params = [{transform_indices = @transform_0, window_bounds = array<i64: 8, 1600>}, {transform_indices = @transform_1, window_bounds = array<i64: 8, 32>}, {pipeline_mode = #tpu.pipeline_mode<synchronous>, transform_indices = @transform_2, window_bounds = array<i64: 1600, 512>}, {pipeline_mode = #tpu.pipeline_mode<synchronous>, transform_indices = @transform_3, window_bounds = array<i64: 1, 512>}, {pipeline_mode = #tpu.pipeline_mode<synchronous>, transform_indices = @transform_4, window_bounds = array<i64: 512, 64>}, {pipeline_mode = #tpu.pipeline_mode<synchronous>, transform_indices = @transform_5, window_bounds = array<i64: 1, 64>}, {pipeline_mode = #tpu.pipeline_mode<synchronous>, transform_indices = @transform_6, window_bounds = array<i64: 32, 512>}, {pipeline_mode = #tpu.pipeline_mode<synchronous>, transform_indices = @transform_7, window_bounds = array<i64: 1, 512>}, {pipeline_mode = #tpu.pipeline_mode<synchronous>, transform_indices = @transform_8, window_bounds = array<i64: 512, 1600>}, {pipeline_mode = #tpu.pipeline_mode<synchronous>, transform_indices = @transform_9, window_bounds = array<i64: 1, 1600>}, {transform_indices = @transform_10, window_bounds = array<i64: 8, 1600>}, {transform_indices = @transform_11, window_bounds = array<i64: 8, 128>}]} {
    %c0 = arith.constant 0 : index
    %c0_0 = arith.constant 0 : index
    %0 = vector.load %arg1[%c0, %c0_0] : memref<8x1600xf32, #tpu.memory_space<vmem>>, vector<8x1600xf32>
    %1 = arith.truncf %0 : vector<8x1600xf32> to vector<8x1600xbf16>
    %c0_1 = arith.constant 0 : index
    %c0_2 = arith.constant 0 : index
    %2 = vector.load %arg2[%c0_1, %c0_2] : memref<8x32xf32, #tpu.memory_space<vmem>>, vector<8x32xf32>
    %c0_3 = arith.constant 0 : index
    %c0_4 = arith.constant 0 : index
    %3 = vector.load %arg3[%c0_3, %c0_4] : memref<1600x512xbf16, #tpu.memory_space<vmem>>, vector<1600x512xbf16>
    %cst = arith.constant dense<0.000000e+00> : vector<8x512xf32>
    %4 = tpu.matmul %1, %3, %cst {dimension_numbers = #tpu.dot_dimension_numbers<[1], [0], [0], [1], [0, 0, 1, 1], [], []>} : vector<8x1600xbf16>, vector<1600x512xbf16>, vector<8x512xf32> -> vector<8x512xf32>
    %c0_5 = arith.constant 0 : index
    %c0_6 = arith.constant 0 : index
    %5 = vector.load %arg4[%c0_5, %c0_6] : memref<1x512xf32, #tpu.memory_space<vmem>>, vector<1x512xf32>
    %6 = vector.broadcast %5 : vector<1x512xf32> to vector<8x512xf32>
    %7 = arith.addf %4, %6 : vector<8x512xf32>
    %cst_7 = arith.constant 0.000000e+00 : f32
    %8 = vector.broadcast %cst_7 : f32 to vector<8x512xf32>
    %9 = arith.maximumf %7, %8 : vector<8x512xf32>
    %10 = arith.truncf %9 : vector<8x512xf32> to vector<8x512xbf16>
    %c0_8 = arith.constant 0 : index
    %c0_9 = arith.constant 0 : index
    %11 = vector.load %arg5[%c0_8, %c0_9] : memref<512x64xbf16, #tpu.memory_space<vmem>>, vector<512x64xbf16>
    %cst_10 = arith.constant dense<0.000000e+00> : vector<8x64xf32>
    %12 = tpu.matmul %10, %11, %cst_10 {dimension_numbers = #tpu.dot_dimension_numbers<[1], [0], [0], [1], [0, 0, 1, 1], [], []>} : vector<8x512xbf16>, vector<512x64xbf16>, vector<8x64xf32> -> vector<8x64xf32>
    %c0_11 = arith.constant 0 : index
    %c0_12 = arith.constant 0 : index
    %13 = vector.load %arg6[%c0_11, %c0_12] : memref<1x64xf32, #tpu.memory_space<vmem>>, vector<1x64xf32>
    %14 = vector.broadcast %13 : vector<1x64xf32> to vector<8x64xf32>
    %15 = arith.addf %12, %14 : vector<8x64xf32>
    %16 = vector.extract_strided_slice %15 {offsets = [0, 0], sizes = [8, 32], strides = [1, 1]} : vector<8x64xf32> to vector<8x32xf32>
    %17 = vector.extract_strided_slice %15 {offsets = [0, 32], sizes = [8, 32], strides = [1, 1]} : vector<8x64xf32> to vector<8x32xf32>
    %18 = math.exp %17 : vector<8x32xf32>
    %19 = arith.mulf %18, %2 : vector<8x32xf32>
    %20 = arith.addf %16, %19 : vector<8x32xf32>
    %21 = arith.mulf %18, %18 : vector<8x32xf32>
    %22 = arith.mulf %16, %16 : vector<8x32xf32>
    %23 = arith.addf %21, %22 : vector<8x32xf32>
    %24 = arith.subf %23, %17 : vector<8x32xf32>
    %cst_13 = arith.constant 5.000000e-01 : f32
    %25 = vector.broadcast %cst_13 : f32 to vector<8x32xf32>
    %26 = arith.subf %24, %25 : vector<8x32xf32>
    %27 = arith.truncf %20 : vector<8x32xf32> to vector<8x32xbf16>
    %c0_14 = arith.constant 0 : index
    %c0_15 = arith.constant 0 : index
    %28 = vector.load %arg7[%c0_14, %c0_15] : memref<32x512xbf16, #tpu.memory_space<vmem>>, vector<32x512xbf16>
    %cst_16 = arith.constant dense<0.000000e+00> : vector<8x512xf32>
    %29 = tpu.matmul %27, %28, %cst_16 {dimension_numbers = #tpu.dot_dimension_numbers<[1], [0], [0], [1], [0, 0, 1, 1], [], []>} : vector<8x32xbf16>, vector<32x512xbf16>, vector<8x512xf32> -> vector<8x512xf32>
    %c0_17 = arith.constant 0 : index
    %c0_18 = arith.constant 0 : index
    %30 = vector.load %arg8[%c0_17, %c0_18] : memref<1x512xf32, #tpu.memory_space<vmem>>, vector<1x512xf32>
    %31 = vector.broadcast %30 : vector<1x512xf32> to vector<8x512xf32>
    %32 = arith.addf %29, %31 : vector<8x512xf32>
    %cst_19 = arith.constant 0.000000e+00 : f32
    %33 = vector.broadcast %cst_19 : f32 to vector<8x512xf32>
    %34 = arith.maximumf %32, %33 : vector<8x512xf32>
    %35 = arith.truncf %34 : vector<8x512xf32> to vector<8x512xbf16>
    %c0_20 = arith.constant 0 : index
    %c0_21 = arith.constant 0 : index
    %36 = vector.load %arg9[%c0_20, %c0_21] : memref<512x1600xbf16, #tpu.memory_space<vmem>>, vector<512x1600xbf16>
    %cst_22 = arith.constant dense<0.000000e+00> : vector<8x1600xf32>
    %37 = tpu.matmul %35, %36, %cst_22 {dimension_numbers = #tpu.dot_dimension_numbers<[1], [0], [0], [1], [0, 0, 1, 1], [], []>} : vector<8x512xbf16>, vector<512x1600xbf16>, vector<8x1600xf32> -> vector<8x1600xf32>
    %c0_23 = arith.constant 0 : index
    %c0_24 = arith.constant 0 : index
    %38 = vector.load %arg10[%c0_23, %c0_24] : memref<1x1600xf32, #tpu.memory_space<vmem>>, vector<1x1600xf32>
    %39 = vector.broadcast %38 : vector<1x1600xf32> to vector<8x1600xf32>
    %40 = arith.addf %37, %39 : vector<8x1600xf32>
    %41 = arith.negf %40 : vector<8x1600xf32>
    %42 = math.exp %41 : vector<8x1600xf32>
    %cst_25 = arith.constant 1.000000e+00 : f32
    %43 = vector.broadcast %cst_25 : f32 to vector<8x1600xf32>
    %44 = arith.addf %43, %42 : vector<8x1600xf32>
    %45 = arith.divf %43, %44 : vector<8x1600xf32>
    %46 = arith.truncf %45 : vector<8x1600xf32> to vector<8x1600xbf16>
    %c0_26 = arith.constant 0 : index
    %c0_27 = arith.constant 0 : index
    %47 = vector.load %arg11[%c0_26, %c0_27] : memref<8x1600xbf16, #tpu.memory_space<vmem>>, vector<8x1600xbf16>
    tpu.vector_store %arg11[%c0_26, %c0_27], %46 {strides = array<i32>} : memref<8x1600xbf16, #tpu.memory_space<vmem>>, vector<8x1600xbf16>,
    %48 = tpu.concatenate %20, %16, %18, %26 in 1 : vector<8x32xf32>, vector<8x32xf32>, vector<8x32xf32>, vector<8x32xf32> -> vector<8x128xf32>
    %c0_28 = arith.constant 0 : index
    %c0_29 = arith.constant 0 : index
    %49 = vector.load %arg12[%c0_28, %c0_29] : memref<8x128xf32, #tpu.memory_space<vmem>>, vector<8x128xf32>
    tpu.vector_store %arg12[%c0_28, %c0_29], %48 {strides = array<i32>} : memref<8x128xf32, #tpu.memory_space<vmem>>, vector<8x128xf32>,
    return
  }
  func.func @transform_0(%arg0: i32) -> (i32, i32) {
    %c0_i32 = arith.constant 0 : i32
    %c0_i32_0 = arith.constant 0 : i32
    return %arg0, %c0_i32 : i32, i32
  }
  func.func @transform_1(%arg0: i32) -> (i32, i32) {
    %c0_i32 = arith.constant 0 : i32
    %c0_i32_0 = arith.constant 0 : i32
    return %arg0, %c0_i32 : i32, i32
  }
  func.func @transform_2(%arg0: i32) -> (i32, i32) {
    %c0_i32 = arith.constant 0 : i32
    %c0_i32_0 = arith.constant 0 : i32
    %c0_i32_1 = arith.constant 0 : i32
    return %c0_i32, %c0_i32_0 : i32, i32
  }
  func.func @transform_3(%arg0: i32) -> (i32, i32) {
    %c0_i32 = arith.constant 0 : i32
    %c0_i32_0 = arith.constant 0 : i32
    %c0_i32_1 = arith.constant 0 : i32
    return %c0_i32, %c0_i32_0 : i32, i32
  }
  func.func @transform_4(%arg0: i32) -> (i32, i32) {
    %c0_i32 = arith.constant 0 : i32
    %c0_i32_0 = arith.constant 0 : i32
    %c0_i32_1 = arith.constant 0 : i32
    return %c0_i32, %c0_i32_0 : i32, i32
  }
  func.func @transform_5(%arg0: i32) -> (i32, i32) {
    %c0_i32 = arith.constant 0 : i32
    %c0_i32_0 = arith.constant 0 : i32
    %c0_i32_1 = arith.constant 0 : i32
    return %c0_i32, %c0_i32_0 : i32, i32
  }
  func.func @transform_6(%arg0: i32) -> (i32, i32) {
    %c0_i32 = arith.constant 0 : i32
    %c0_i32_0 = arith.constant 0 : i32
    %c0_i32_1 = arith.constant 0 : i32
    return %c0_i32, %c0_i32_0 : i32, i32
  }
  func.func @transform_7(%arg0: i32) -> (i32, i32) {
    %c0_i32 = arith.constant 0 : i32
    %c0_i32_0 = arith.constant 0 : i32
    %c0_i32_1 = arith.constant 0 : i32
    return %c0_i32, %c0_i32_0 : i32, i32
  }
  func.func @transform_8(%arg0: i32) -> (i32, i32) {
    %c0_i32 = arith.constant 0 : i32
    %c0_i32_0 = arith.constant 0 : i32
    %c0_i32_1 = arith.constant 0 : i32
    return %c0_i32, %c0_i32_0 : i32, i32
  }
  func.func @transform_9(%arg0: i32) -> (i32, i32) {
    %c0_i32 = arith.constant 0 : i32
    %c0_i32_0 = arith.constant 0 : i32
    %c0_i32_1 = arith.constant 0 : i32
    return %c0_i32, %c0_i32_0 : i32, i32
  }
  func.func @transform_10(%arg0: i32) -> (i32, i32) {
    %c0_i32 = arith.constant 0 : i32
    %c0_i32_0 = arith.constant 0 : i32
    return %arg0, %c0_i32 : i32, i32
  }
  func.func @transform_11(%arg0: i32) -> (i32, i32) {
    %c0_i32 = arith.constant 0 : i32
    %c0_i32_0 = arith.constant 0 : i32
    return %arg0, %c0_i32 : i32, i32
  }
}

</mosaic_0001>

<bundles_post_ra>
// kernel: tpu_custom_call.1
= control target key start
LH: loop header
LB: loop body
LE: loop exit
PB: predicated region body
PF: predicated region fallthrough
CT: control target
= control target key end

     0   :  { %17 = vsyncpa [#allocation3], 0  ;;  %vm2489_vm0 = vcmask 523264   ;;  %s12236_s0 = inlined_call_operand.vmem [shape: f32[8,1600], index: 0, kind: input, shape index: {}]   ;;  %s12237_s1 = inlined_call_operand.vmem [shape: f32[8,32], index: 1, kind: input, shape index: {}]   ;;  %s12238_s2 = inlined_call_operand.vmem [shape: bf16[1600,512], index: 2, kind: input, shape index: {}]   ;;  %s12239_s3 = inlined_call_operand.vmem [shape: f32[1,512], index: 3, kind: input, shape index: {}]   ;;  %s12240_s4 = inlined_call_operand.vmem [shape: bf16[512,64], index: 4, kind: input, shape index: {}]   ;;  %s12241_s5 = inlined_call_operand.vmem [shape: f32[1,64], index: 5, kind: input, shape index: {}]   ;;  %s12242_s6 = inlined_call_operand.vmem [shape: bf16[32,512], index: 6, kind: input, shape index: {}]   ;;  %s12243_s7 = inlined_call_operand.vmem [shape: f32[1,512], index: 7, kind: input, shape index: {}]   ;;  %s12244_s8 = inlined_call_operand.vmem [shape: bf16[512,1600], index: 8, kind: input, shape index: {}]   ;;  %s12245_s9 = inlined_call_operand.vmem [shape: f32[1,1600], index: 9, kind: input, shape index: {}]   ;;  %s12246_s10 = inlined_call_operand.hbm [shape: bf16[8,1600], index: 10, kind: output, shape index: {0}]   ;;  %s12247_s11 = inlined_call_operand.hbm [shape: f32[8,128], index: 11, kind: output, shape index: {1}]  }
   0x1   :  { %v8060_v0 = vld [vmem:[%s12238_s2 + $0x4] ss:$16 sps:$4 sm:$0xff]   ;;  %v8062_v1 = vld [vmem:[%s12238_s2 + $0xc] ss:$16 sps:$4 sm:$0xff]   ;;  %v8064_v2 = vld [vmem:[%s12238_s2] ss:$16 sps:$4 sm:$0xff]  }
   0x2   :  { %2493 = vmatprep.subr.bf16.mxu0 %v8060_v0  ;;  %v8065_v3 = vld [vmem:[%s12238_s2 + $0x8] ss:$16 sps:$4 sm:$0xff]   ;;  %2780 = vmatprep.subr.bf16.mxu1 %v8062_v1  ;;  %v8066_v4 = vld [vmem:[%s12238_s2 + $0x24] ss:$16 sps:$4 sm:$0xff]   ;;  %v8068_v5 = vld [vmem:[%s12238_s2 + $0x2c] ss:$16 sps:$4 sm:$0xff]  }
   0x3   :  { %2494 = vmatpush1.bf16.msra.mxu0 %v8064_v2  ;;  %2781 = vmatpush1.bf16.msra.mxu1 %v8065_v3  ;;  %v8070_v6 = vld [vmem:[%s12238_s2 + $0x20] ss:$16 sps:$4 sm:$0xff]   ;;  %v8071_v7 = vld [vmem:[%s12238_s2 + $0x28] ss:$16 sps:$4 sm:$0xff]   ;;  %v8072_v8 = vld [vmem:[%s12238_s2 + $0x44] ss:$16 sps:$4 sm:$0xff]  }
   0x4   :  { %2495 = vmatprep.subr.bf16.mxu0 %v8066_v4  ;;  %2782 = vmatprep.subr.bf16.mxu1 %v8068_v5  ;;  %v8074_v9 = vld [vmem:[%s12238_s2 + $0x4c] ss:$16 sps:$4 sm:$0xff]   ;;  %v8076_v10 = vld [vmem:[%s12238_s2 + $0x40] ss:$16 sps:$4 sm:$0xff]   ;;  %v8077_v11 = vld [vmem:[%s12238_s2 + $0x48] ss:$16 sps:$4 sm:$0xff]  }
   0x5   :  { %v8078_v12 = vld [vmem:[%s12238_s2 + $0x64] ss:$16 sps:$4 sm:$0xff]   ;;  %v8080_v13 = vld [vmem:[%s12238_s2 + $0x6c] ss:$16 sps:$4 sm:$0xff]   ;;  %v8082_v14 = vld [vmem:[%s12238_s2 + $0x60] ss:$16 sps:$4 sm:$0xff]  }
   0x6   :  { %v8083_v15 = vld [vmem:[%s12238_s2 + $0x68] ss:$16 sps:$4 sm:$0xff]   ;;  %v8084_v16 = vld [vmem:[%s12238_s2 + $0x84] ss:$16 sps:$4 sm:$0xff]   ;;  %v8086_v17 = vld [vmem:[%s12238_s2 + $0x8c] ss:$16 sps:$4 sm:$0xff]  }
   0x7   :  { %2496 = vmatpush1.bf16.msra.mxu0 %v8070_v6  ;;  %2783 = vmatpush1.bf16.msra.mxu1 %v8071_v7  ;;  %v8088_v18 = vld [vmem:[%s12238_s2 + $0x80] ss:$16 sps:$4 sm:$0xff]   ;;  %v8089_v19 = vld [vmem:[%s12238_s2 + $0x88] ss:$16 sps:$4 sm:$0xff]   ;;  %v8090_v20 = vld [vmem:[%s12238_s2 + $0xa4] ss:$16 sps:$4 sm:$0xff]  }
   0x8   :  { %2497 = vmatprep.subr.bf16.mxu0 %v8072_v8  ;;  %2784 = vmatprep.subr.bf16.mxu1 %v8074_v9  ;;  %v8092_v21 = vld [vmem:[%s12238_s2 + $0xac] ss:$16 sps:$4 sm:$0xff]   ;;  %v8094_v22 = vld [vmem:[%s12238_s2 + $0xa0] ss:$16 sps:$4 sm:$0xff]   ;;  %v8095_v23 = vld [vmem:[%s12238_s2 + $0xa8] ss:$16 sps:$4 sm:$0xff]  }
   0x9   :  { %v8096_v24 = vld [vmem:[%s12238_s2 + $0xc4] ss:$16 sps:$4 sm:$0xff]   ;;  %v8098_v25 = vld [vmem:[%s12238_s2 + $0xcc] ss:$16 sps:$4 sm:$0xff]   ;;  %v8100_v26 = vld [vmem:[%s12238_s2 + $0xc0] ss:$16 sps:$4 sm:$0xff]  }
   0xa   :  { %v8101_v27 = vld [vmem:[%s12238_s2 + $0xc8] ss:$16 sps:$4 sm:$0xff]   ;;  %v8102_v28 = vld [vmem:[%s12238_s2 + $0xe4] ss:$16 sps:$4 sm:$0xff]   ;;  %v8104_v29 = vld [vmem:[%s12238_s2 + $0xec] ss:$16 sps:$4 sm:$0xff]  }
   0xb   :  { %2498 = vmatpush1.bf16.msra.mxu0 %v8076_v10  ;;  %2785 = vmatpush1.bf16.msra.mxu1 %v8077_v11  ;;  %v8106_v30 = vld [vmem:[%s12238_s2 + $0xe0] ss:$16 sps:$4 sm:$0xff]   ;;  %v8107_v31 = vld [vmem:[%s12238_s2 + $0xe8] ss:$16 sps:$4 sm:$0xff]   ;;  %v8108_v32 = vld [vmem:[%s12238_s2 + $0x104] ss:$16 sps:$4 sm:$0xff]  }
   0xc   :  { %2499 = vmatprep.subr.bf16.mxu0 %v8078_v12  ;;  %2786 = vmatprep.subr.bf16.mxu1 %v8080_v13  ;;  %v8110_v33 = vld [vmem:[%s12238_s2 + $0x10c] ss:$16 sps:$4 sm:$0xff]   ;;  %v8112_v34 = vld [vmem:[%s12238_s2 + $0x100] ss:$16 sps:$4 sm:$0xff]   ;;  %v8113_v35 = vld [vmem:[%s12238_s2 + $0x108] ss:$16 sps:$4 sm:$0xff]  }
   0xd   :  { %v8114_v36 = vld [vmem:[%s12238_s2 + $0x124] ss:$16 sps:$4 sm:$0xff]   ;;  %v8116_v37 = vld [vmem:[%s12238_s2 + $0x12c] ss:$16 sps:$4 sm:$0xff]   ;;  %v8118_v38 = vld [vmem:[%s12238_s2 + $0x120] ss:$16 sps:$4 sm:$0xff]  }
   0xe   :  { %v8119_v39 = vld [vmem:[%s12238_s2 + $0x128] ss:$16 sps:$4 sm:$0xff]   ;;  %v8120_v40 = vld [vmem:[%s12238_s2 + $0x144] ss:$16 sps:$4 sm:$0xff]   ;;  %v8122_v41 = vld [vmem:[%s12238_s2 + $0x14c] ss:$16 sps:$4 sm:$0xff]  }
   0xf   :  { %2500 = vmatpush1.bf16.msra.mxu0 %v8082_v14  ;;  %2787 = vmatpush1.bf16.msra.mxu1 %v8083_v15  ;;  %v8124_v42 = vld [vmem:[%s12238_s2 + $0x140] ss:$16 sps:$4 sm:$0xff]   ;;  %v8125_v43 = vld [vmem:[%s12238_s2 + $0x148] ss:$16 sps:$4 sm:$0xff]   ;;  %v8126_v44 = vld [vmem:[%s12238_s2 + $0x164] ss:$16 sps:$4 sm:$0xff]  }
  0x10   :  { %2501 = vmatprep.subr.bf16.mxu0 %v8084_v16  ;;  %2788 = vmatprep.subr.bf16.mxu1 %v8086_v17  ;;  %v8128_v45 = vld [vmem:[%s12238_s2 + $0x16c] ss:$16 sps:$4 sm:$0xff]   ;;  %v8130_v47 = vld [vmem:[%s12238_s2 + $0x160] ss:$16 sps:$4 sm:$0xff]   ;;  %v8131_v49 = vld [vmem:[%s12238_s2 + $0x168] ss:$16 sps:$4 sm:$0xff]  }
  0x11   :  { %v41_v46 = vld [vmem:[%s12236_s0 + $0x8] sm:$0xff]  ;;  %v8132_v50 = vld [vmem:[%s12238_s2 + $0x184] ss:$16 sps:$4 sm:$0xff]   ;;  %v8136_v52 = vld [vmem:[%s12238_s2 + $0x180] ss:$16 sps:$4 sm:$0xff]  }
  0x12   :  { %v54_v48 = vpack.c.bf16 %v41_v46, %v41_v46  ;;  %v8134_v51 = vld [vmem:[%s12238_s2 + $0x18c] ss:$16 sps:$4 sm:$0xff]   ;;  %v8137_v53 = vld [vmem:[%s12238_s2 + $0x188] ss:$16 sps:$4 sm:$0xff]   ;;  %v8138_v54 = vld [vmem:[%s12238_s2 + $0x1a4] ss:$16 sps:$4 sm:$0xff]  }
  0x13   :  { %2502 = vmatpush1.bf16.msra.mxu0 %v8088_v18  ;;  %2789 = vmatpush1.bf16.msra.mxu1 %v8089_v19  ;;  %v8140_v55 = vld [vmem:[%s12238_s2 + $0x1ac] ss:$16 sps:$4 sm:$0xff]   ;;  %v8142_v56 = vld [vmem:[%s12238_s2 + $0x1a0] ss:$16 sps:$4 sm:$0xff]   ;;  %v8143_v57 = vld [vmem:[%s12238_s2 + $0x1a8] ss:$16 sps:$4 sm:$0xff]  }
  0x14   :  { %2503 = vmatprep.subr.bf16.mxu0 %v8090_v20  ;;  %2790 = vmatprep.subr.bf16.mxu1 %v8092_v21  ;;  %v8144_v58 = vld [vmem:[%s12238_s2 + $0x1c4] ss:$16 sps:$4 sm:$0xff]   ;;  %v8146_v59 = vld [vmem:[%s12238_s2 + $0x1cc] ss:$16 sps:$4 sm:$0xff]   ;;  %v8148_v60 = vld [vmem:[%s12238_s2 + $0x1c0] ss:$16 sps:$4 sm:$0xff]  }
  0x15   :  { %2525 = vmatprep.mubr.bf16.mxu0 %v54_v48  ;;  %2812 = vmatprep.mubr.bf16.mxu1 %v54_v48  ;;  %v8149_v61 = vld [vmem:[%s12238_s2 + $0x1c8] ss:$16 sps:$4 sm:$0xff]   ;;  %v8150_v62 = vld [vmem:[%s12238_s2 + $0x1e4] ss:$16 sps:$4 sm:$0xff]   ;;  %v8152_v63 = vld [vmem:[%s12238_s2 + $0x1ec] ss:$16 sps:$4 sm:$0xff]  }
  0x16   :  { %v8154_v0 = vld [vmem:[%s12238_s2 + $0x1e0] ss:$16 sps:$4 sm:$0xff]   ;;  %v8155_v1 = vld [vmem:[%s12238_s2 + $0x1e8] ss:$16 sps:$4 sm:$0xff]   ;;  %v8158_v3 = vld [vmem:[%s12238_s2 + $0x204] ss:$16 sps:$4 sm:$0xff]  }
  0x17   :  { %2504 = vmatpush1.bf16.msra.mxu0 %v8094_v22  ;;  %2791 = vmatpush1.bf16.msra.mxu1 %v8095_v23  ;;  %v40_v2 = vld [vmem:[%s12236_s0] sm:$0xff]  ;;  %v8161_v4 = vld [vmem:[%s12238_s2 + $0x20c] ss:$16 sps:$4 sm:$0xff]   ;;  %v8159_v7 = vld [vmem:[%s12238_s2 + $0x208] ss:$16 sps:$4 sm:$0xff]  }
  0x18   :  { %2505 = vmatprep.subr.bf16.mxu0 %v8096_v24  ;;  %2792 = vmatprep.subr.bf16.mxu1 %v8098_v25  ;;  %v53_v5 = vpack.c.bf16 %v40_v2, %v40_v2  ;;  %v8156_v6 = vld [vmem:[%s12238_s2 + $0x200] ss:$16 sps:$4 sm:$0xff]   ;;  %v8164_v8 = vld [vmem:[%s12238_s2 + $0x224] ss:$16 sps:$4 sm:$0xff]   ;;  %v8167_v9 = vld [vmem:[%s12238_s2 + $0x22c] ss:$16 sps:$4 sm:$0xff]  }
  0x19   :  { %v8162_v10 = vld [vmem:[%s12238_s2 + $0x220] ss:$16 sps:$4 sm:$0xff]   ;;  %v8165_v11 = vld [vmem:[%s12238_s2 + $0x228] ss:$16 sps:$4 sm:$0xff]   ;;  %v8170_v12 = vld [vmem:[%s12238_s2 + $0x244] ss:$16 sps:$4 sm:$0xff]  }
  0x1a   :  { %v8173_v13 = vld [vmem:[%s12238_s2 + $0x24c] ss:$16 sps:$4 sm:$0xff]   ;;  %v8168_v14 = vld [vmem:[%s12238_s2 + $0x240] ss:$16 sps:$4 sm:$0xff]   ;;  %v8171_v15 = vld [vmem:[%s12238_s2 + $0x248] ss:$16 sps:$4 sm:$0xff]  }
  0x1b   :  { %2506 = vmatpush1.bf16.msra.mxu0 %v8100_v26  ;;  %2793 = vmatpush1.bf16.msra.mxu1 %v8101_v27  ;;  %v8176_v16 = vld [vmem:[%s12238_s2 + $0x264] ss:$16 sps:$4 sm:$0xff]   ;;  %v8179_v17 = vld [vmem:[%s12238_s2 + $0x26c] ss:$16 sps:$4 sm:$0xff]   ;;  %v8174_v18 = vld [vmem:[%s12238_s2 + $0x260] ss:$16 sps:$4 sm:$0xff]  }
  0x1c   :  { %2507 = vmatprep.subr.bf16.mxu0 %v8102_v28  ;;  %2794 = vmatprep.subr.bf16.mxu1 %v8104_v29  ;;  %v8177_v19 = vld [vmem:[%s12238_s2 + $0x268] ss:$16 sps:$4 sm:$0xff]   ;;  %v8182_v20 = vld [vmem:[%s12238_s2 + $0x284] ss:$16 sps:$4 sm:$0xff]   ;;  %v8185_v21 = vld [vmem:[%s12238_s2 + $0x28c] ss:$16 sps:$4 sm:$0xff]  }
  0x1d   :  { %v8180_v22 = vld [vmem:[%s12238_s2 + $0x280] ss:$16 sps:$4 sm:$0xff]   ;;  %v8183_v23 = vld [vmem:[%s12238_s2 + $0x288] ss:$16 sps:$4 sm:$0xff]   ;;  %v8188_v24 = vld [vmem:[%s12238_s2 + $0x2a4] ss:$16 sps:$4 sm:$0xff]  }
  0x1e   :  { %v8191_v25 = vld [vmem:[%s12238_s2 + $0x2ac] ss:$16 sps:$4 sm:$0xff]   ;;  %v8186_v26 = vld [vmem:[%s12238_s2 + $0x2a0] ss:$16 sps:$4 sm:$0xff]   ;;  %v8189_v27 = vld [vmem:[%s12238_s2 + $0x2a8] ss:$16 sps:$4 sm:$0xff]  }
  0x1f   :  { %2508 = vmatpush1.bf16.msra.mxu0 %v8106_v30  ;;  %2795 = vmatpush1.bf16.msra.mxu1 %v8107_v31  ;;  %v8194_v28 = vld [vmem:[%s12238_s2 + $0x2c4] ss:$16 sps:$4 sm:$0xff]   ;;  %v8197_v29 = vld [vmem:[%s12238_s2 + $0x2cc] ss:$16 sps:$4 sm:$0xff]   ;;  %v8192_v31 = vld [vmem:[%s12238_s2 + $0x2c0] ss:$16 sps:$4 sm:$0xff]  }
  0x20   :  { %2509 = vmatprep.subr.bf16.mxu0 %v8108_v32  ;;  %2796 = vmatprep.subr.bf16.mxu1 %v8110_v33  ;;  %v43_v30 = vld [vmem:[%s12236_s0 + $0x18] sm:$0xff]  ;;  %v8218_v46 = vld [vmem:[%s12238_s2 + $0x344] ss:$16 sps:$4 sm:$0xff]   ;;  %v8216_v48 = vld [vmem:[%s12238_s2 + $0x340] ss:$16 sps:$4 sm:$0xff]  }
  0x21   :  { %v56_v32 = vpack.c.bf16 %v43_v30, %v43_v30  ;;  %v8195_v33 = vld [vmem:[%s12238_s2 + $0x2c8] ss:$16 sps:$4 sm:$0xff]   ;;  %v8248_v2 = vld [vmem:[%s12238_s2 + $0x3e4] ss:$16 sps:$4 sm:$0xff]  }
  0x22   :  { %v8284_v30 = vld [vmem:[%s12238_s2 + $0x4a4] ss:$16 sps:$4 sm:$0xff]  }
  0x23   :  { %2510 = vmatpush1.bf16.msra.mxu0 %v8112_v34  ;;  %2797 = vmatpush1.bf16.msra.mxu1 %v8113_v35  ;;  %v8200_v34 = vld [vmem:[%s12238_s2 + $0x2e4] ss:$16 sps:$4 sm:$0xff]   ;;  %v8203_v35 = vld [vmem:[%s12238_s2 + $0x2ec] ss:$16 sps:$4 sm:$0xff]  }
  0x24   :  { %2511 = vmatprep.subr.bf16.mxu0 %v8114_v36  ;;  %2798 = vmatprep.subr.bf16.mxu1 %v8116_v37  ;;  %v8198_v36 = vld [vmem:[%s12238_s2 + $0x2e0] ss:$16 sps:$4 sm:$0xff]   ;;  %v8201_v37 = vld [vmem:[%s12238_s2 + $0x2e8] ss:$16 sps:$4 sm:$0xff]  }
  0x27   :  { %2512 = vmatpush1.bf16.msra.mxu0 %v8118_v38  ;;  %2799 = vmatpush1.bf16.msra.mxu1 %v8119_v39  ;;  %v8206_v38 = vld [vmem:[%s12238_s2 + $0x304] ss:$16 sps:$4 sm:$0xff]   ;;  %v8209_v39 = vld [vmem:[%s12238_s2 + $0x30c] ss:$16 sps:$4 sm:$0xff]  }
  0x28   :  { %2513 = vmatprep.subr.bf16.mxu0 %v8120_v40  ;;  %2800 = vmatprep.subr.bf16.mxu1 %v8122_v41  ;;  %v8204_v40 = vld [vmem:[%s12238_s2 + $0x300] ss:$16 sps:$4 sm:$0xff]   ;;  %v8207_v41 = vld [vmem:[%s12238_s2 + $0x308] ss:$16 sps:$4 sm:$0xff]  }
  0x2b   :  { %2514 = vmatpush1.bf16.msra.mxu0 %v8124_v42  ;;  %2801 = vmatpush1.bf16.msra.mxu1 %v8125_v43  ;;  %v8212_v42 = vld [vmem:[%s12238_s2 + $0x324] ss:$16 sps:$4 sm:$0xff]   ;;  %v8215_v43 = vld [vmem:[%s12238_s2 + $0x32c] ss:$16 sps:$4 sm:$0xff]  }
  0x2c   :  { %2515 = vmatprep.subr.bf16.mxu0 %v8126_v44  ;;  %2802 = vmatprep.subr.bf16.mxu1 %v8128_v45  ;;  %v8210_v44 = vld [vmem:[%s12238_s2 + $0x320] ss:$16 sps:$4 sm:$0xff]   ;;  %v8213_v45 = vld [vmem:[%s12238_s2 + $0x328] ss:$16 sps:$4 sm:$0xff]  }
  0x2f   :  { %2516 = vmatpush1.bf16.msra.mxu0 %v8130_v47  ;;  %2803 = vmatpush1.bf16.msra.mxu1 %v8131_v49  ;;  %v8221_v47 = vld [vmem:[%s12238_s2 + $0x34c] ss:$16 sps:$4 sm:$0xff]   ;;  %v8219_v49 = vld [vmem:[%s12238_s2 + $0x348] ss:$16 sps:$4 sm:$0xff]  }
  0x30   :  { %2517 = vmatprep.subr.bf16.mxu0 %v8132_v50  ;;  %2804 = vmatprep.subr.bf16.mxu1 %v8134_v51  ;;  %v8224_v50 = vld [vmem:[%s12238_s2 + $0x364] ss:$16 sps:$4 sm:$0xff]   ;;  %v8227_v51 = vld [vmem:[%s12238_s2 + $0x36c] ss:$16 sps:$4 sm:$0xff]  }
  0x33   :  { %2518 = vmatpush1.bf16.msra.mxu0 %v8136_v52  ;;  %2805 = vmatpush1.bf16.msra.mxu1 %v8137_v53  ;;  %v8222_v52 = vld [vmem:[%s12238_s2 + $0x360] ss:$16 sps:$4 sm:$0xff]   ;;  %v8225_v53 = vld [vmem:[%s12238_s2 + $0x368] ss:$16 sps:$4 sm:$0xff]  }
  0x34   :  { %2519 = vmatprep.subr.bf16.mxu0 %v8138_v54  ;;  %2806 = vmatprep.subr.bf16.mxu1 %v8140_v55  ;;  %v8230_v54 = vld [vmem:[%s12238_s2 + $0x384] ss:$16 sps:$4 sm:$0xff]   ;;  %v8233_v55 = vld [vmem:[%s12238_s2 + $0x38c] ss:$16 sps:$4 sm:$0xff]  }
  0x37   :  { %2520 = vmatpush1.bf16.msra.mxu0 %v8142_v56  ;;  %2807 = vmatpush1.bf16.msra.mxu1 %v8143_v57  ;;  %v8228_v56 = vld [vmem:[%s12238_s2 + $0x380] ss:$16 sps:$4 sm:$0xff]   ;;  %v8231_v57 = vld [vmem:[%s12238_s2 + $0x388] ss:$16 sps:$4 sm:$0xff]  }
  0x38   :  { %2521 = vmatprep.subr.bf16.mxu0 %v8144_v58  ;;  %2808 = vmatprep.subr.bf16.mxu1 %v8146_v59  ;;  %v8236_v58 = vld [vmem:[%s12238_s2 + $0x3a4] ss:$16 sps:$4 sm:$0xff]   ;;  %v8239_v59 = vld [vmem:[%s12238_s2 + $0x3ac] ss:$16 sps:$4 sm:$0xff]  }
  0x3b   :  { %2522 = vmatpush1.bf16.msra.mxu0 %v8148_v60  ;;  %2809 = vmatpush1.bf16.msra.mxu1 %v8149_v61  ;;  %v8234_v60 = vld [vmem:[%s12238_s2 + $0x3a0] ss:$16 sps:$4 sm:$0xff]   ;;  %v8237_v61 = vld [vmem:[%s12238_s2 + $0x3a8] ss:$16 sps:$4 sm:$0xff]  }
  0x3c   :  { %2523 = vmatprep.subr.bf16.mxu0 %v8150_v62  ;;  %2810 = vmatprep.subr.bf16.mxu1 %v8152_v63  ;;  %v8242_v62 = vld [vmem:[%s12238_s2 + $0x3c4] ss:$16 sps:$4 sm:$0xff]   ;;  %v8245_v63 = vld [vmem:[%s12238_s2 + $0x3cc] ss:$16 sps:$4 sm:$0xff]  }
  0x3f   :  { %2524 = vmatpush1.bf16.msra.mxu0 %v8154_v0  ;;  %2811 = vmatpush1.bf16.msra.mxu1 %v8155_v1  ;;  %v8240_v0 = vld [vmem:[%s12238_s2 + $0x3c0] ss:$16 sps:$4 sm:$0xff]   ;;  %v8243_v1 = vld [vmem:[%s12238_s2 + $0x3c8] ss:$16 sps:$4 sm:$0xff]  }
  0x40   :  { %2534 = vmatprep.subr.bf16.mxu0 %v8158_v3  ;;  %2821 = vmatprep.subr.bf16.mxu1 %v8161_v4  ;;  %v8251_v3 = vld [vmem:[%s12238_s2 + $0x3ec] ss:$16 sps:$4 sm:$0xff]   ;;  %v8246_v4 = vld [vmem:[%s12238_s2 + $0x3e0] ss:$16 sps:$4 sm:$0xff]  }
  0x42   :  { %2526 = vmatmul.mubr.bf16.vlgmr.msra.gmra.mrb[0].mxu0 %v53_v5  ;;  %2813 = vmatmul.mubr.bf16.vlgmr.msra.gmra.mrb[0].mxu1 %v53_v5  ;;  %v8249_v5 = vld [vmem:[%s12238_s2 + $0x3e8] ss:$16 sps:$4 sm:$0xff]  }
  0x43   :  { %2535 = vmatpush1.bf16.msra.mxu0 %v8156_v6  ;;  %2822 = vmatpush1.bf16.msra.mxu1 %v8159_v7  ;;  %v8254_v6 = vld [vmem:[%s12238_s2 + $0x404] ss:$16 sps:$4 sm:$0xff]  }
  0x44   :  { %2536 = vmatprep.subr.bf16.mxu0 %v8164_v8  ;;  %2823 = vmatprep.subr.bf16.mxu1 %v8167_v9  ;;  %v42_v7 = vld [vmem:[%s12236_s0 + $0x10] sm:$0xff]  ;;  %v8257_v8 = vld [vmem:[%s12238_s2 + $0x40c] ss:$16 sps:$4 sm:$0xff]  }
  0x45   :  { %2566 = vmatprep.mubr.bf16.mxu0 %v56_v32  ;;  %2853 = vmatprep.mubr.bf16.mxu1 %v56_v32  ;;  %v8252_v9 = vld [vmem:[%s12238_s2 + $0x400] ss:$16 sps:$4 sm:$0xff]  }
  0x46   :  { %v8282_v32 = vld [vmem:[%s12238_s2 + $0x4a0] ss:$16 sps:$4 sm:$0xff]  }
  0x47   :  { %2537 = vmatpush1.bf16.msra.mxu0 %v8162_v10  ;;  %2824 = vmatpush1.bf16.msra.mxu1 %v8165_v11  ;;  %v8255_v10 = vld [vmem:[%s12238_s2 + $0x408] ss:$16 sps:$4 sm:$0xff]   ;;  %v55_v11 = vpack.c.bf16 %v42_v7, %v42_v7  ;;  %v8347_v7 = vld [vmem:[%s12238_s2 + $0x5ec] ss:$16 sps:$4 sm:$0xff]  }
  0x48   :  { %2538 = vmatprep.subr.bf16.mxu0 %v8170_v12  ;;  %2825 = vmatprep.subr.bf16.mxu1 %v8173_v13  ;;  %v8260_v12 = vld [vmem:[%s12238_s2 + $0x424] ss:$16 sps:$4 sm:$0xff]   ;;  %v8263_v13 = vld [vmem:[%s12238_s2 + $0x42c] ss:$16 sps:$4 sm:$0xff]  }
  0x4b   :  { %2539 = vmatpush1.bf16.msra.mxu0 %v8168_v14  ;;  %2826 = vmatpush1.bf16.msra.mxu1 %v8171_v15  ;;  %v45_v14 = vld [vmem:[%s12236_s0 + $0x28] sm:$0xff] }
  0x4c   :  { %2540 = vmatprep.subr.bf16.mxu0 %v8176_v16  ;;  %2827 = vmatprep.subr.bf16.mxu1 %v8179_v17  ;;  %v58_v15 = vpack.c.bf16 %v45_v14, %v45_v14  ;;  %v8258_v16 = vld [vmem:[%s12238_s2 + $0x420] ss:$16 sps:$4 sm:$0xff]   ;;  %v8261_v17 = vld [vmem:[%s12238_s2 + $0x428] ss:$16 sps:$4 sm:$0xff]  }
  0x4d   :  { %v8351_v14 = vld [vmem:[%s12238_s2 + $0x608] ss:$16 sps:$4 sm:$0xff]  }
  0x4f   :  { %2541 = vmatpush1.bf16.msra.mxu0 %v8174_v18  ;;  %2828 = vmatpush1.bf16.msra.mxu1 %v8177_v19  ;;  %v8266_v18 = vld [vmem:[%s12238_s2 + $0x444] ss:$16 sps:$4 sm:$0xff]   ;;  %v8269_v19 = vld [vmem:[%s12238_s2 + $0x44c] ss:$16 sps:$4 sm:$0xff]  }
  0x50   :  { %2542 = vmatprep.subr.bf16.mxu0 %v8182_v20  ;;  %2829 = vmatprep.subr.bf16.mxu1 %v8185_v21  ;;  %v8264_v20 = vld [vmem:[%s12238_s2 + $0x440] ss:$16 sps:$4 sm:$0xff]   ;;  %v8267_v21 = vld [vmem:[%s12238_s2 + $0x448] ss:$16 sps:$4 sm:$0xff]  }
  0x53   :  { %2543 = vmatpush1.bf16.msra.mxu0 %v8180_v22  ;;  %2830 = vmatpush1.bf16.msra.mxu1 %v8183_v23  ;;  %v8272_v22 = vld [vmem:[%s12238_s2 + $0x464] ss:$16 sps:$4 sm:$0xff]   ;;  %v8275_v23 = vld [vmem:[%s12238_s2 + $0x46c] ss:$16 sps:$4 sm:$0xff]  }
  0x54   :  { %2544 = vmatprep.subr.bf16.mxu0 %v8188_v24  ;;  %2831 = vmatprep.subr.bf16.mxu1 %v8191_v25  ;;  %v8270_v24 = vld [vmem:[%s12238_s2 + $0x460] ss:$16 sps:$4 sm:$0xff]   ;;  %v8273_v25 = vld [vmem:[%s12238_s2 + $0x468] ss:$16 sps:$4 sm:$0xff]  }
  0x57   :  { %2545 = vmatpush1.bf16.msra.mxu0 %v8186_v26  ;;  %2832 = vmatpush1.bf16.msra.mxu1 %v8189_v27  ;;  %v8278_v26 = vld [vmem:[%s12238_s2 + $0x484] ss:$16 sps:$4 sm:$0xff]   ;;  %v8281_v27 = vld [vmem:[%s12238_s2 + $0x48c] ss:$16 sps:$4 sm:$0xff]  }
  0x58   :  { %2546 = vmatprep.subr.bf16.mxu0 %v8194_v28  ;;  %2833 = vmatprep.subr.bf16.mxu1 %v8197_v29  ;;  %v8276_v28 = vld [vmem:[%s12238_s2 + $0x480] ss:$16 sps:$4 sm:$0xff]   ;;  %v8279_v29 = vld [vmem:[%s12238_s2 + $0x488] ss:$16 sps:$4 sm:$0xff]  }
  0x5b   :  { %2547 = vmatpush1.bf16.msra.mxu0 %v8192_v31  ;;  %2834 = vmatpush1.bf16.msra.mxu1 %v8195_v33  ;;  %v8287_v31 = vld [vmem:[%s12238_s2 + $0x4ac] ss:$16 sps:$4 sm:$0xff]   ;;  %v8285_v33 = vld [vmem:[%s12238_s2 + $0x4a8] ss:$16 sps:$4 sm:$0xff]  }
  0x5c   :  { %2548 = vmatprep.subr.bf16.mxu0 %v8200_v34  ;;  %2835 = vmatprep.subr.bf16.mxu1 %v8203_v35  ;;  %v8290_v34 = vld [vmem:[%s12238_s2 + $0x4c4] ss:$16 sps:$4 sm:$0xff]   ;;  %v8293_v35 = vld [vmem:[%s12238_s2 + $0x4cc] ss:$16 sps:$4 sm:$0xff]  }
  0x5f   :  { %2549 = vmatpush1.bf16.msra.mxu0 %v8198_v36  ;;  %2836 = vmatpush1.bf16.msra.mxu1 %v8201_v37  ;;  %v8288_v36 = vld [vmem:[%s12238_s2 + $0x4c0] ss:$16 sps:$4 sm:$0xff]   ;;  %v8291_v37 = vld [vmem:[%s12238_s2 + $0x4c8] ss:$16 sps:$4 sm:$0xff]  }
  0x60   :  { %2550 = vmatprep.subr.bf16.mxu0 %v8206_v38  ;;  %2837 = vmatprep.subr.bf16.mxu1 %v8209_v39  ;;  %v8296_v38 = vld [vmem:[%s12238_s2 + $0x4e4] ss:$16 sps:$4 sm:$0xff]   ;;  %v8299_v39 = vld [vmem:[%s12238_s2 + $0x4ec] ss:$16 sps:$4 sm:$0xff]  }
  0x63   :  { %2551 = vmatpush1.bf16.msra.mxu0 %v8204_v40  ;;  %2838 = vmatpush1.bf16.msra.mxu1 %v8207_v41  ;;  %v8294_v40 = vld [vmem:[%s12238_s2 + $0x4e0] ss:$16 sps:$4 sm:$0xff]   ;;  %v8297_v41 = vld [vmem:[%s12238_s2 + $0x4e8] ss:$16 sps:$4 sm:$0xff]  }
  0x64   :  { %2552 = vmatprep.subr.bf16.mxu0 %v8212_v42  ;;  %2839 = vmatprep.subr.bf16.mxu1 %v8215_v43  ;;  %v8302_v42 = vld [vmem:[%s12238_s2 + $0x504] ss:$16 sps:$4 sm:$0xff]   ;;  %v8305_v43 = vld [vmem:[%s12238_s2 + $0x50c] ss:$16 sps:$4 sm:$0xff]  }
  0x67   :  { %2553 = vmatpush1.bf16.msra.mxu0 %v8210_v44  ;;  %2840 = vmatpush1.bf16.msra.mxu1 %v8213_v45  ;;  %v8300_v44 = vld [vmem:[%s12238_s2 + $0x500] ss:$16 sps:$4 sm:$0xff]   ;;  %v8303_v45 = vld [vmem:[%s12238_s2 + $0x508] ss:$16 sps:$4 sm:$0xff]  }
  0x68   :  { %2554 = vmatprep.subr.bf16.mxu0 %v8218_v46  ;;  %2841 = vmatprep.subr.bf16.mxu1 %v8221_v47  ;;  %v8308_v46 = vld [vmem:[%s12238_s2 + $0x524] ss:$16 sps:$4 sm:$0xff]   ;;  %v8311_v47 = vld [vmem:[%s12238_s2 + $0x52c] ss:$16 sps:$4 sm:$0xff]  }
  0x6b   :  { %2555 = vmatpush1.bf16.msra.mxu0 %v8216_v48  ;;  %2842 = vmatpush1.bf16.msra.mxu1 %v8219_v49  ;;  %v8306_v48 = vld [vmem:[%s12238_s2 + $0x520] ss:$16 sps:$4 sm:$0xff]   ;;  %v8309_v49 = vld [vmem:[%s12238_s2 + $0x528] ss:$16 sps:$4 sm:$0xff]  }
  0x6c   :  { %2556 = vmatprep.subr.bf16.mxu0 %v8224_v50  ;;  %2843 = vmatprep.subr.bf16.mxu1 %v8227_v51  ;;  %v8314_v50 = vld [vmem:[%s12238_s2 + $0x544] ss:$16 sps:$4 sm:$0xff]   ;;  %v8317_v51 = vld [vmem:[%s12238_s2 + $0x54c] ss:$16 sps:$4 sm:$0xff]  }
  0x6f   :  { %2557 = vmatpush1.bf16.msra.mxu0 %v8222_v52  ;;  %2844 = vmatpush1.bf16.msra.mxu1 %v8225_v53  ;;  %v8312_v52 = vld [vmem:[%s12238_s2 + $0x540] ss:$16 sps:$4 sm:$0xff]   ;;  %v8315_v53 = vld [vmem:[%s12238_s2 + $0x548] ss:$16 sps:$4 sm:$0xff]  }
  0x70   :  { %2558 = vmatprep.subr.bf16.mxu0 %v8230_v54  ;;  %2845 = vmatprep.subr.bf16.mxu1 %v8233_v55  ;;  %v8320_v54 = vld [vmem:[%s12238_s2 + $0x564] ss:$16 sps:$4 sm:$0xff]   ;;  %v8323_v55 = vld [vmem:[%s12238_s2 + $0x56c] ss:$16 sps:$4 sm:$0xff]  }
  0x73   :  { %2559 = vmatpush1.bf16.msra.mxu0 %v8228_v56  ;;  %2846 = vmatpush1.bf16.msra.mxu1 %v8231_v57  ;;  %v8318_v56 = vld [vmem:[%s12238_s2 + $0x560] ss:$16 sps:$4 sm:$0xff]   ;;  %v8321_v57 = vld [vmem:[%s12238_s2 + $0x568] ss:$16 sps:$4 sm:$0xff]  }
  0x74   :  { %2560 = vmatprep.subr.bf16.mxu0 %v8236_v58  ;;  %2847 = vmatprep.subr.bf16.mxu1 %v8239_v59  ;;  %v8326_v58 = vld [vmem:[%s12238_s2 + $0x584] ss:$16 sps:$4 sm:$0xff]   ;;  %v8329_v59 = vld [vmem:[%s12238_s2 + $0x58c] ss:$16 sps:$4 sm:$0xff]  }
  0x77   :  { %2561 = vmatpush1.bf16.msra.mxu0 %v8234_v60  ;;  %2848 = vmatpush1.bf16.msra.mxu1 %v8237_v61  ;;  %v8324_v60 = vld [vmem:[%s12238_s2 + $0x580] ss:$16 sps:$4 sm:$0xff]   ;;  %v8327_v61 = vld [vmem:[%s12238_s2 + $0x588] ss:$16 sps:$4 sm:$0xff]  }
  0x78   :  { %2562 = vmatprep.subr.bf16.mxu0 %v8242_v62  ;;  %2849 = vmatprep.subr.bf16.mxu1 %v8245_v63  ;;  %v8332_v62 = vld [vmem:[%s12238_s2 + $0x5a4] ss:$16 sps:$4 sm:$0xff]   ;;  %v8335_v63 = vld [vmem:[%s12238_s2 + $0x5ac] ss:$16 sps:$4 sm:$0xff]  }
  0x7b   :  { %2563 = vmatpush1.bf16.msra.mxu0 %v8240_v0  ;;  %2850 = vmatpush1.bf16.msra.mxu1 %v8243_v1  ;;  %v8330_v0 = vld [vmem:[%s12238_s2 + $0x5a0] ss:$16 sps:$4 sm:$0xff]   ;;  %v8333_v1 = vld [vmem:[%s12238_s2 + $0x5a8] ss:$16 sps:$4 sm:$0xff]  }
  0x7c   :  { %2564 = vmatprep.subr.bf16.mxu0 %v8248_v2  ;;  %2851 = vmatprep.subr.bf16.mxu1 %v8251_v3  ;;  %v8338_v2 = vld [vmem:[%s12238_s2 + $0x5c4] ss:$16 sps:$4 sm:$0xff]   ;;  %v8341_v3 = vld [vmem:[%s12238_s2 + $0x5cc] ss:$16 sps:$4 sm:$0xff]  }
  0x7f   :  { %2565 = vmatpush1.bf16.msra.mxu0 %v8246_v4  ;;  %2852 = vmatpush1.bf16.msra.mxu1 %v8249_v5  ;;  %v8336_v4 = vld [vmem:[%s12238_s2 + $0x5c0] ss:$16 sps:$4 sm:$0xff]   ;;  %v8339_v5 = vld [vmem:[%s12238_s2 + $0x5c8] ss:$16 sps:$4 sm:$0xff]  }
  0x80   :  { %2575 = vmatprep.subr.bf16.mxu0 %v8254_v6  ;;  %2862 = vmatprep.subr.bf16.mxu1 %v8257_v8  ;;  %v8344_v6 = vld [vmem:[%s12238_s2 + $0x5e4] ss:$16 sps:$4 sm:$0xff]   ;;  %v8342_v8 = vld [vmem:[%s12238_s2 + $0x5e0] ss:$16 sps:$4 sm:$0xff]  }
  0x82   :  { %2567 = vmatmul.mubr.bf16.vlgmr.msra.gmra.mrb[0].mxu0 %v55_v11  ;;  %2854 = vmatmul.mubr.bf16.vlgmr.msra.gmra.mrb[0].mxu1 %v55_v11  ;;  %v44_v11 = vld [vmem:[%s12236_s0 + $0x20] sm:$0xff] }
  0x83   :  { %2576 = vmatpush1.bf16.msra.mxu0 %v8252_v9  ;;  %2863 = vmatpush1.bf16.msra.mxu1 %v8255_v10  ;;  %v8345_v9 = vld [vmem:[%s12238_s2 + $0x5e8] ss:$16 sps:$4 sm:$0xff]   ;;  %v8350_v10 = vld [vmem:[%s12238_s2 + $0x604] ss:$16 sps:$4 sm:$0xff]  }
  0x84   :  { %2577 = vmatprep.subr.bf16.mxu0 %v8260_v12  ;;  %2864 = vmatprep.subr.bf16.mxu1 %v8263_v13  ;;  %v8353_v12 = vld [vmem:[%s12238_s2 + $0x60c] ss:$16 sps:$4 sm:$0xff]   ;;  %v8348_v13 = vld [vmem:[%s12238_s2 + $0x600] ss:$16 sps:$4 sm:$0xff]  }
  0x85   :  { %2607 = vmatprep.mubr.bf16.mxu0 %v58_v15  ;;  %2894 = vmatprep.mubr.bf16.mxu1 %v58_v15  ;;  %v57_v15 = vpack.c.bf16 %v44_v11, %v44_v11  ;;  %v8443_v11 = vld [vmem:[%s12238_s2 + $0x7ec] ss:$16 sps:$4 sm:$0xff]  }
  0x87   :  { %2578 = vmatpush1.bf16.msra.mxu0 %v8258_v16  ;;  %2865 = vmatpush1.bf16.msra.mxu1 %v8261_v17  ;;  %v47_v16 = vld [vmem:[%s12236_s0 + $0x38] sm:$0xff]  ;;  %v8356_v17 = vld [vmem:[%s12238_s2 + $0x624] ss:$16 sps:$4 sm:$0xff]  }
  0x88   :  { %2579 = vmatprep.subr.bf16.mxu0 %v8266_v18  ;;  %2866 = vmatprep.subr.bf16.mxu1 %v8269_v19  ;;  %v8359_v18 = vld [vmem:[%s12238_s2 + $0x62c] ss:$16 sps:$4 sm:$0xff]   ;;  %v60_v19 = vpack.c.bf16 %v47_v16, %v47_v16 }
  0x89   :  { %v8449_v16 = vld [vmem:[%s12238_s2 + $0x80c] ss:$16 sps:$4 sm:$0xff]  }
  0x8b   :  { %2580 = vmatpush1.bf16.msra.mxu0 %v8264_v20  ;;  %2867 = vmatpush1.bf16.msra.mxu1 %v8267_v21  ;;  %v8354_v20 = vld [vmem:[%s12238_s2 + $0x620] ss:$16 sps:$4 sm:$0xff]   ;;  %v8357_v21 = vld [vmem:[%s12238_s2 + $0x628] ss:$16 sps:$4 sm:$0xff]  }
  0x8c   :  { %2581 = vmatprep.subr.bf16.mxu0 %v8272_v22  ;;  %2868 = vmatprep.subr.bf16.mxu1 %v8275_v23  ;;  %v8362_v22 = vld [vmem:[%s12238_s2 + $0x644] ss:$16 sps:$4 sm:$0xff]   ;;  %v8365_v23 = vld [vmem:[%s12238_s2 + $0x64c] ss:$16 sps:$4 sm:$0xff]  }
  0x8f   :  { %2582 = vmatpush1.bf16.msra.mxu0 %v8270_v24  ;;  %2869 = vmatpush1.bf16.msra.mxu1 %v8273_v25  ;;  %v8360_v24 = vld [vmem:[%s12238_s2 + $0x640] ss:$16 sps:$4 sm:$0xff]   ;;  %v8363_v25 = vld [vmem:[%s12238_s2 + $0x648] ss:$16 sps:$4 sm:$0xff]  }
  0x90   :  { %2583 = vmatprep.subr.bf16.mxu0 %v8278_v26  ;;  %2870 = vmatprep.subr.bf16.mxu1 %v8281_v27  ;;  %v8368_v26 = vld [vmem:[%s12238_s2 + $0x664] ss:$16 sps:$4 sm:$0xff]   ;;  %v8371_v27 = vld [vmem:[%s12238_s2 + $0x66c] ss:$16 sps:$4 sm:$0xff]  }
  0x93   :  { %2584 = vmatpush1.bf16.msra.mxu0 %v8276_v28  ;;  %2871 = vmatpush1.bf16.msra.mxu1 %v8279_v29  ;;  %v8366_v28 = vld [vmem:[%s12238_s2 + $0x660] ss:$16 sps:$4 sm:$0xff]   ;;  %v8369_v29 = vld [vmem:[%s12238_s2 + $0x668] ss:$16 sps:$4 sm:$0xff]  }
  0x94   :  { %2585 = vmatprep.subr.bf16.mxu0 %v8284_v30  ;;  %2872 = vmatprep.subr.bf16.mxu1 %v8287_v31  ;;  %v8374_v30 = vld [vmem:[%s12238_s2 + $0x684] ss:$16 sps:$4 sm:$0xff]   ;;  %v8377_v31 = vld [vmem:[%s12238_s2 + $0x68c] ss:$16 sps:$4 sm:$0xff]  }
  0x97   :  { %2586 = vmatpush1.bf16.msra.mxu0 %v8282_v32  ;;  %2873 = vmatpush1.bf16.msra.mxu1 %v8285_v33  ;;  %v8372_v32 = vld [vmem:[%s12238_s2 + $0x680] ss:$16 sps:$4 sm:$0xff]   ;;  %v8375_v33 = vld [vmem:[%s12238_s2 + $0x688] ss:$16 sps:$4 sm:$0xff]  }
  0x98   :  { %2587 = vmatprep.subr.bf16.mxu0 %v8290_v34  ;;  %2874 = vmatprep.subr.bf16.mxu1 %v8293_v35  ;;  %v8380_v34 = vld [vmem:[%s12238_s2 + $0x6a4] ss:$16 sps:$4 sm:$0xff]   ;;  %v8383_v35 = vld [vmem:[%s12238_s2 + $0x6ac] ss:$16 sps:$4 sm:$0xff]  }
  0x9b   :  { %2588 = vmatpush1.bf16.msra.mxu0 %v8288_v36  ;;  %2875 = vmatpush1.bf16.msra.mxu1 %v8291_v37  ;;  %v8378_v36 = vld [vmem:[%s12238_s2 + $0x6a0] ss:$16 sps:$4 sm:$0xff]   ;;  %v8381_v37 = vld [vmem:[%s12238_s2 + $0x6a8] ss:$16 sps:$4 sm:$0xff]  }
  0x9c   :  { %2589 = vmatprep.subr.bf16.mxu0 %v8296_v38  ;;  %2876 = vmatprep.subr.bf16.mxu1 %v8299_v39  ;;  %v8386_v38 = vld [vmem:[%s12238_s2 + $0x6c4] ss:$16 sps:$4 sm:$0xff]   ;;  %v8389_v39 = vld [vmem:[%s12238_s2 + $0x6cc] ss:$16 sps:$4 sm:$0xff]  }
  0x9f   :  { %2590 = vmatpush1.bf16.msra.mxu0 %v8294_v40  ;;  %2877 = vmatpush1.bf16.msra.mxu1 %v8297_v41  ;;  %v8384_v40 = vld [vmem:[%s12238_s2 + $0x6c0] ss:$16 sps:$4 sm:$0xff]   ;;  %v8387_v41 = vld [vmem:[%s12238_s2 + $0x6c8] ss:$16 sps:$4 sm:$0xff]  }
  0xa0   :  { %2591 = vmatprep.subr.bf16.mxu0 %v8302_v42  ;;  %2878 = vmatprep.subr.bf16.mxu1 %v8305_v43  ;;  %v8392_v42 = vld [vmem:[%s12238_s2 + $0x6e4] ss:$16 sps:$4 sm:$0xff]   ;;  %v8395_v43 = vld [vmem:[%s12238_s2 + $0x6ec] ss:$16 sps:$4 sm:$0xff]  }
  0xa3   :  { %2592 = vmatpush1.bf16.msra.mxu0 %v8300_v44  ;;  %2879 = vmatpush1.bf16.msra.mxu1 %v8303_v45  ;;  %v8390_v44 = vld [vmem:[%s12238_s2 + $0x6e0] ss:$16 sps:$4 sm:$0xff]   ;;  %v8393_v45 = vld [vmem:[%s12238_s2 + $0x6e8] ss:$16 sps:$4 sm:$0xff]  }
  0xa4   :  { %2593 = vmatprep.subr.bf16.mxu0 %v8308_v46  ;;  %2880 = vmatprep.subr.bf16.mxu1 %v8311_v47  ;;  %v8398_v46 = vld [vmem:[%s12238_s2 + $0x704] ss:$16 sps:$4 sm:$0xff]   ;;  %v8401_v47 = vld [vmem:[%s12238_s2 + $0x70c] ss:$16 sps:$4 sm:$0xff]  }
  0xa7   :  { %2594 = vmatpush1.bf16.msra.mxu0 %v8306_v48  ;;  %2881 = vmatpush1.bf16.msra.mxu1 %v8309_v49  ;;  %v8396_v48 = vld [vmem:[%s12238_s2 + $0x700] ss:$16 sps:$4 sm:$0xff]   ;;  %v8399_v49 = vld [vmem:[%s12238_s2 + $0x708] ss:$16 sps:$4 sm:$0xff]  }
  0xa8   :  { %2595 = vmatprep.subr.bf16.mxu0 %v8314_v50  ;;  %2882 = vmatprep.subr.bf16.mxu1 %v8317_v51  ;;  %v8404_v50 = vld [vmem:[%s12238_s2 + $0x724] ss:$16 sps:$4 sm:$0xff]   ;;  %v8407_v51 = vld [vmem:[%s12238_s2 + $0x72c] ss:$16 sps:$4 sm:$0xff]  }
  0xab   :  { %2596 = vmatpush1.bf16.msra.mxu0 %v8312_v52  ;;  %2883 = vmatpush1.bf16.msra.mxu1 %v8315_v53  ;;  %v8402_v52 = vld [vmem:[%s12238_s2 + $0x720] ss:$16 sps:$4 sm:$0xff]   ;;  %v8405_v53 = vld [vmem:[%s12238_s2 + $0x728] ss:$16 sps:$4 sm:$0xff]  }
  0xac   :  { %2597 = vmatprep.subr.bf16.mxu0 %v8320_v54  ;;  %2884 = vmatprep.subr.bf16.mxu1 %v8323_v55  ;;  %v8410_v54 = vld [vmem:[%s12238_s2 + $0x744] ss:$16 sps:$4 sm:$0xff]   ;;  %v8413_v55 = vld [vmem:[%s12238_s2 + $0x74c] ss:$16 sps:$4 sm:$0xff]  }
  0xaf   :  { %2598 = vmatpush1.bf16.msra.mxu0 %v8318_v56  ;;  %2885 = vmatpush1.bf16.msra.mxu1 %v8321_v57  ;;  %v8408_v56 = vld [vmem:[%s12238_s2 + $0x740] ss:$16 sps:$4 sm:$0xff]   ;;  %v8411_v57 = vld [vmem:[%s12238_s2 + $0x748] ss:$16 sps:$4 sm:$0xff]  }
  0xb0   :  { %2599 = vmatprep.subr.bf16.mxu0 %v8326_v58  ;;  %2886 = vmatprep.subr.bf16.mxu1 %v8329_v59  ;;  %v8416_v58 = vld [vmem:[%s12238_s2 + $0x764] ss:$16 sps:$4 sm:$0xff]   ;;  %v8419_v59 = vld [vmem:[%s12238_s2 + $0x76c] ss:$16 sps:$4 sm:$0xff]  }
  0xb3   :  { %2600 = vmatpush1.bf16.msra.mxu0 %v8324_v60  ;;  %2887 = vmatpush1.bf16.msra.mxu1 %v8327_v61  ;;  %v8414_v60 = vld [vmem:[%s12238_s2 + $0x760] ss:$16 sps:$4 sm:$0xff]   ;;  %v8417_v61 = vld [vmem:[%s12238_s2 + $0x768] ss:$16 sps:$4 sm:$0xff]  }
  0xb4   :  { %2601 = vmatprep.subr.bf16.mxu0 %v8332_v62  ;;  %2888 = vmatprep.subr.bf16.mxu1 %v8335_v63  ;;  %v8422_v62 = vld [vmem:[%s12238_s2 + $0x784] ss:$16 sps:$4 sm:$0xff]   ;;  %v8425_v63 = vld [vmem:[%s12238_s2 + $0x78c] ss:$16 sps:$4 sm:$0xff]  }
  0xb7   :  { %2602 = vmatpush1.bf16.msra.mxu0 %v8330_v0  ;;  %2889 = vmatpush1.bf16.msra.mxu1 %v8333_v1  ;;  %v8420_v0 = vld [vmem:[%s12238_s2 + $0x780] ss:$16 sps:$4 sm:$0xff]   ;;  %v8423_v1 = vld [vmem:[%s12238_s2 + $0x788] ss:$16 sps:$4 sm:$0xff]  }
  0xb8   :  { %2603 = vmatprep.subr.bf16.mxu0 %v8338_v2  ;;  %2890 = vmatprep.subr.bf16.mxu1 %v8341_v3  ;;  %v8428_v2 = vld [vmem:[%s12238_s2 + $0x7a4] ss:$16 sps:$4 sm:$0xff]   ;;  %v8431_v3 = vld [vmem:[%s12238_s2 + $0x7ac] ss:$16 sps:$4 sm:$0xff]  }
  0xbb   :  { %2604 = vmatpush1.bf16.msra.mxu0 %v8336_v4  ;;  %2891 = vmatpush1.bf16.msra.mxu1 %v8339_v5  ;;  %v8426_v4 = vld [vmem:[%s12238_s2 + $0x7a0] ss:$16 sps:$4 sm:$0xff]   ;;  %v8429_v5 = vld [vmem:[%s12238_s2 + $0x7a8] ss:$16 sps:$4 sm:$0xff]  }
  0xbc   :  { %2605 = vmatprep.subr.bf16.mxu0 %v8344_v6  ;;  %2892 = vmatprep.subr.bf16.mxu1 %v8347_v7  ;;  %v8434_v6 = vld [vmem:[%s12238_s2 + $0x7c4] ss:$16 sps:$4 sm:$0xff]   ;;  %v8437_v7 = vld [vmem:[%s12238_s2 + $0x7cc] ss:$16 sps:$4 sm:$0xff]  }
  0xbf   :  { %2606 = vmatpush1.bf16.msra.mxu0 %v8342_v8  ;;  %2893 = vmatpush1.bf16.msra.mxu1 %v8345_v9  ;;  %v8432_v8 = vld [vmem:[%s12238_s2 + $0x7c0] ss:$16 sps:$4 sm:$0xff]   ;;  %v8435_v9 = vld [vmem:[%s12238_s2 + $0x7c8] ss:$16 sps:$4 sm:$0xff]  }
  0xc0   :  { %2616 = vmatprep.subr.bf16.mxu0 %v8350_v10  ;;  %2903 = vmatprep.subr.bf16.mxu1 %v8353_v12  ;;  %v8440_v10 = vld [vmem:[%s12238_s2 + $0x7e4] ss:$16 sps:$4 sm:$0xff]   ;;  %v8438_v12 = vld [vmem:[%s12238_s2 + $0x7e0] ss:$16 sps:$4 sm:$0xff]  }
  0xc2   :  { %2608 = vmatmul.mubr.bf16.vlgmr.msra.gmra.mrb[0].mxu0 %v57_v15  ;;  %2895 = vmatmul.mubr.bf16.vlgmr.msra.gmra.mrb[0].mxu1 %v57_v15  ;;  %v8446_v15 = vld [vmem:[%s12238_s2 + $0x804] ss:$16 sps:$4 sm:$0xff]  }
  0xc3   :  { %2617 = vmatpush1.bf16.msra.mxu0 %v8348_v13  ;;  %2904 = vmatpush1.bf16.msra.mxu1 %v8351_v14  ;;  %v8441_v13 = vld [vmem:[%s12238_s2 + $0x7e8] ss:$16 sps:$4 sm:$0xff]   ;;  %v46_v14 = vld [vmem:[%s12236_s0 + $0x30] sm:$0xff] }
  0xc4   :  { %2618 = vmatprep.subr.bf16.mxu0 %v8356_v17  ;;  %2905 = vmatprep.subr.bf16.mxu1 %v8359_v18  ;;  %v59_v17 = vpack.c.bf16 %v46_v14, %v46_v14  ;;  %v49_v18 = vld [vmem:[%s12236_s0 + $0x48] sm:$0xff]  ;;  %v8536_v14 = vld [vmem:[%s12238_s2 + $0x9e4] ss:$16 sps:$4 sm:$0xff]  }
  0xc5   :  { %2648 = vmatprep.mubr.bf16.mxu0 %v60_v19  ;;  %2935 = vmatprep.mubr.bf16.mxu1 %v60_v19  ;;  %v8444_v19 = vld [vmem:[%s12238_s2 + $0x800] ss:$16 sps:$4 sm:$0xff]  }
  0xc7   :  { %2619 = vmatpush1.bf16.msra.mxu0 %v8354_v20  ;;  %2906 = vmatpush1.bf16.msra.mxu1 %v8357_v21  ;;  %v8447_v20 = vld [vmem:[%s12238_s2 + $0x808] ss:$16 sps:$4 sm:$0xff]   ;;  %v8452_v21 = vld [vmem:[%s12238_s2 + $0x824] ss:$16 sps:$4 sm:$0xff]  }
  0xc8   :  { %2620 = vmatprep.subr.bf16.mxu0 %v8362_v22  ;;  %2907 = vmatprep.subr.bf16.mxu1 %v8365_v23  ;;  %v8455_v22 = vld [vmem:[%s12238_s2 + $0x82c] ss:$16 sps:$4 sm:$0xff]   ;;  %v62_v23 = vpack.c.bf16 %v49_v18, %v49_v18  ;;  %v48_v18 = vld [vmem:[%s12236_s0 + $0x40] sm:$0xff] }
  0xcb   :  { %2621 = vmatpush1.bf16.msra.mxu0 %v8360_v24  ;;  %2908 = vmatpush1.bf16.msra.mxu1 %v8363_v25  ;;  %v8450_v24 = vld [vmem:[%s12238_s2 + $0x820] ss:$16 sps:$4 sm:$0xff]   ;;  %v8453_v25 = vld [vmem:[%s12238_s2 + $0x828] ss:$16 sps:$4 sm:$0xff]  }
  0xcc   :  { %2622 = vmatprep.subr.bf16.mxu0 %v8368_v26  ;;  %2909 = vmatprep.subr.bf16.mxu1 %v8371_v27  ;;  %v8458_v26 = vld [vmem:[%s12238_s2 + $0x844] ss:$16 sps:$4 sm:$0xff]   ;;  %v8461_v27 = vld [vmem:[%s12238_s2 + $0x84c] ss:$16 sps:$4 sm:$0xff]  }
  0xcf   :  { %2623 = vmatpush1.bf16.msra.mxu0 %v8366_v28  ;;  %2910 = vmatpush1.bf16.msra.mxu1 %v8369_v29  ;;  %v8456_v28 = vld [vmem:[%s12238_s2 + $0x840] ss:$16 sps:$4 sm:$0xff]   ;;  %v8459_v29 = vld [vmem:[%s12238_s2 + $0x848] ss:$16 sps:$4 sm:$0xff]  }
  0xd0   :  { %2624 = vmatprep.subr.bf16.mxu0 %v8374_v30  ;;  %2911 = vmatprep.subr.bf16.mxu1 %v8377_v31  ;;  %v8464_v30 = vld [vmem:[%s12238_s2 + $0x864] ss:$16 sps:$4 sm:$0xff]   ;;  %v8467_v31 = vld [vmem:[%s12238_s2 + $0x86c] ss:$16 sps:$4 sm:$0xff]  }
  0xd3   :  { %2625 = vmatpush1.bf16.msra.mxu0 %v8372_v32  ;;  %2912 = vmatpush1.bf16.msra.mxu1 %v8375_v33  ;;  %v8462_v32 = vld [vmem:[%s12238_s2 + $0x860] ss:$16 sps:$4 sm:$0xff]   ;;  %v8465_v33 = vld [vmem:[%s12238_s2 + $0x868] ss:$16 sps:$4 sm:$0xff]  }
  0xd4   :  { %2626 = vmatprep.subr.bf16.mxu0 %v8380_v34  ;;  %2913 = vmatprep.subr.bf16.mxu1 %v8383_v35  ;;  %v8470_v34 = vld [vmem:[%s12238_s2 + $0x884] ss:$16 sps:$4 sm:$0xff]   ;;  %v8473_v35 = vld [vmem:[%s12238_s2 + $0x88c] ss:$16 sps:$4 sm:$0xff]  }
  0xd7   :  { %2627 = vmatpush1.bf16.msra.mxu0 %v8378_v36  ;;  %2914 = vmatpush1.bf16.msra.mxu1 %v8381_v37  ;;  %v8468_v36 = vld [vmem:[%s12238_s2 + $0x880] ss:$16 sps:$4 sm:$0xff]   ;;  %v8471_v37 = vld [vmem:[%s12238_s2 + $0x888] ss:$16 sps:$4 sm:$0xff]  }
  0xd8   :  { %2628 = vmatprep.subr.bf16.mxu0 %v8386_v38  ;;  %2915 = vmatprep.subr.bf16.mxu1 %v8389_v39  ;;  %v8476_v38 = vld [vmem:[%s12238_s2 + $0x8a4] ss:$16 sps:$4 sm:$0xff]   ;;  %v8479_v39 = vld [vmem:[%s12238_s2 + $0x8ac] ss:$16 sps:$4 sm:$0xff]  }
  0xdb   :  { %2629 = vmatpush1.bf16.msra.mxu0 %v8384_v40  ;;  %2916 = vmatpush1.bf16.msra.mxu1 %v8387_v41  ;;  %v8474_v40 = vld [vmem:[%s12238_s2 + $0x8a0] ss:$16 sps:$4 sm:$0xff]   ;;  %v8477_v41 = vld [vmem:[%s12238_s2 + $0x8a8] ss:$16 sps:$4 sm:$0xff]  }
  0xdc   :  { %2630 = vmatprep.subr.bf16.mxu0 %v8392_v42  ;;  %2917 = vmatprep.subr.bf16.mxu1 %v8395_v43  ;;  %v8482_v42 = vld [vmem:[%s12238_s2 + $0x8c4] ss:$16 sps:$4 sm:$0xff]   ;;  %v8485_v43 = vld [vmem:[%s12238_s2 + $0x8cc] ss:$16 sps:$4 sm:$0xff]  }
  0xdf   :  { %2631 = vmatpush1.bf16.msra.mxu0 %v8390_v44  ;;  %2918 = vmatpush1.bf16.msra.mxu1 %v8393_v45  ;;  %v8480_v44 = vld [vmem:[%s12238_s2 + $0x8c0] ss:$16 sps:$4 sm:$0xff]   ;;  %v8483_v45 = vld [vmem:[%s12238_s2 + $0x8c8] ss:$16 sps:$4 sm:$0xff]  }
  0xe0   :  { %2632 = vmatprep.subr.bf16.mxu0 %v8398_v46  ;;  %2919 = vmatprep.subr.bf16.mxu1 %v8401_v47  ;;  %v8488_v46 = vld [vmem:[%s12238_s2 + $0x8e4] ss:$16 sps:$4 sm:$0xff]   ;;  %v8491_v47 = vld [vmem:[%s12238_s2 + $0x8ec] ss:$16 sps:$4 sm:$0xff]  }
  0xe3   :  { %2633 = vmatpush1.bf16.msra.mxu0 %v8396_v48  ;;  %2920 = vmatpush1.bf16.msra.mxu1 %v8399_v49  ;;  %v8486_v48 = vld [vmem:[%s12238_s2 + $0x8e0] ss:$16 sps:$4 sm:$0xff]   ;;  %v8489_v49 = vld [vmem:[%s12238_s2 + $0x8e8] ss:$16 sps:$4 sm:$0xff]  }
  0xe4   :  { %2634 = vmatprep.subr.bf16.mxu0 %v8404_v50  ;;  %2921 = vmatprep.subr.bf16.mxu1 %v8407_v51  ;;  %v8494_v50 = vld [vmem:[%s12238_s2 + $0x904] ss:$16 sps:$4 sm:$0xff]   ;;  %v8497_v51 = vld [vmem:[%s12238_s2 + $0x90c] ss:$16 sps:$4 sm:$0xff]  }
  0xe7   :  { %2635 = vmatpush1.bf16.msra.mxu0 %v8402_v52  ;;  %2922 = vmatpush1.bf16.msra.mxu1 %v8405_v53  ;;  %v8492_v52 = vld [vmem:[%s12238_s2 + $0x900] ss:$16 sps:$4 sm:$0xff]   ;;  %v8495_v53 = vld [vmem:[%s12238_s2 + $0x908] ss:$16 sps:$4 sm:$0xff]  }
  0xe8   :  { %2636 = vmatprep.subr.bf16.mxu0 %v8410_v54  ;;  %2923 = vmatprep.subr.bf16.mxu1 %v8413_v55  ;;  %v8500_v54 = vld [vmem:[%s12238_s2 + $0x924] ss:$16 sps:$4 sm:$0xff]   ;;  %v8503_v55 = vld [vmem:[%s12238_s2 + $0x92c] ss:$16 sps:$4 sm:$0xff]  }
  0xeb   :  { %2637 = vmatpush1.bf16.msra.mxu0 %v8408_v56  ;;  %2924 = vmatpush1.bf16.msra.mxu1 %v8411_v57  ;;  %v8498_v56 = vld [vmem:[%s12238_s2 + $0x920] ss:$16 sps:$4 sm:$0xff]   ;;  %v8501_v57 = vld [vmem:[%s12238_s2 + $0x928] ss:$16 sps:$4 sm:$0xff]  }
  0xec   :  { %2638 = vmatprep.subr.bf16.mxu0 %v8416_v58  ;;  %2925 = vmatprep.subr.bf16.mxu1 %v8419_v59  ;;  %v8506_v58 = vld [vmem:[%s12238_s2 + $0x944] ss:$16 sps:$4 sm:$0xff]   ;;  %v8509_v59 = vld [vmem:[%s12238_s2 + $0x94c] ss:$16 sps:$4 sm:$0xff]  }
  0xef   :  { %2639 = vmatpush1.bf16.msra.mxu0 %v8414_v60  ;;  %2926 = vmatpush1.bf16.msra.mxu1 %v8417_v61  ;;  %v8504_v60 = vld [vmem:[%s12238_s2 + $0x940] ss:$16 sps:$4 sm:$0xff]   ;;  %v8507_v61 = vld [vmem:[%s12238_s2 + $0x948] ss:$16 sps:$4 sm:$0xff]  }
  0xf0   :  { %2640 = vmatprep.subr.bf16.mxu0 %v8422_v62  ;;  %2927 = vmatprep.subr.bf16.mxu1 %v8425_v63  ;;  %v8512_v62 = vld [vmem:[%s12238_s2 + $0x964] ss:$16 sps:$4 sm:$0xff]   ;;  %v8515_v63 = vld [vmem:[%s12238_s2 + $0x96c] ss:$16 sps:$4 sm:$0xff]  }
  0xf3   :  { %2641 = vmatpush1.bf16.msra.mxu0 %v8420_v0  ;;  %2928 = vmatpush1.bf16.msra.mxu1 %v8423_v1  ;;  %v8510_v0 = vld [vmem:[%s12238_s2 + $0x960] ss:$16 sps:$4 sm:$0xff]   ;;  %v8513_v1 = vld [vmem:[%s12238_s2 + $0x968] ss:$16 sps:$4 sm:$0xff]  }
  0xf4   :  { %2642 = vmatprep.subr.bf16.mxu0 %v8428_v2  ;;  %2929 = vmatprep.subr.bf16.mxu1 %v8431_v3  ;;  %v8518_v2 = vld [vmem:[%s12238_s2 + $0x984] ss:$16 sps:$4 sm:$0xff]   ;;  %v8521_v3 = vld [vmem:[%s12238_s2 + $0x98c] ss:$16 sps:$4 sm:$0xff]  }
  0xf7   :  { %2643 = vmatpush1.bf16.msra.mxu0 %v8426_v4  ;;  %2930 = vmatpush1.bf16.msra.mxu1 %v8429_v5  ;;  %v8516_v4 = vld [vmem:[%s12238_s2 + $0x980] ss:$16 sps:$4 sm:$0xff]   ;;  %v8519_v5 = vld [vmem:[%s12238_s2 + $0x988] ss:$16 sps:$4 sm:$0xff]  }
  0xf8   :  { %2644 = vmatprep.subr.bf16.mxu0 %v8434_v6  ;;  %2931 = vmatprep.subr.bf16.mxu1 %v8437_v7  ;;  %v8524_v6 = vld [vmem:[%s12238_s2 + $0x9a4] ss:$16 sps:$4 sm:$0xff]   ;;  %v8527_v7 = vld [vmem:[%s12238_s2 + $0x9ac] ss:$16 sps:$4 sm:$0xff]  }
  0xfb   :  { %2645 = vmatpush1.bf16.msra.mxu0 %v8432_v8  ;;  %2932 = vmatpush1.bf16.msra.mxu1 %v8435_v9  ;;  %v8522_v8 = vld [vmem:[%s12238_s2 + $0x9a0] ss:$16 sps:$4 sm:$0xff]   ;;  %v8525_v9 = vld [vmem:[%s12238_s2 + $0x9a8] ss:$16 sps:$4 sm:$0xff]  }
  0xfc   :  { %2646 = vmatprep.subr.bf16.mxu0 %v8440_v10  ;;  %2933 = vmatprep.subr.bf16.mxu1 %v8443_v11  ;;  %v8530_v10 = vld [vmem:[%s12238_s2 + $0x9c4] ss:$16 sps:$4 sm:$0xff]   ;;  %v8533_v11 = vld [vmem:[%s12238_s2 + $0x9cc] ss:$16 sps:$4 sm:$0xff]  }
  0xff   :  { %2647 = vmatpush1.bf16.msra.mxu0 %v8438_v12  ;;  %2934 = vmatpush1.bf16.msra.mxu1 %v8441_v13  ;;  %v8528_v12 = vld [vmem:[%s12238_s2 + $0x9c0] ss:$16 sps:$4 sm:$0xff]   ;;  %v8531_v13 = vld [vmem:[%s12238_s2 + $0x9c8] ss:$16 sps:$4 sm:$0xff]  }
 0x100   :  { %2657 = vmatprep.subr.bf16.mxu0 %v8446_v15  ;;  %2944 = vmatprep.subr.bf16.mxu1 %v8449_v16  ;;  %v8539_v15 = vld [vmem:[%s12238_s2 + $0x9ec] ss:$16 sps:$4 sm:$0xff]   ;;  %v8534_v16 = vld [vmem:[%s12238_s2 + $0x9e0] ss:$16 sps:$4 sm:$0xff]  }
 0x102   :  { %2649 = vmatmul.mubr.bf16.vlgmr.msra.gmra.mrb[0].mxu0 %v59_v17  ;;  %2936 = vmatmul.mubr.bf16.vlgmr.msra.gmra.mrb[0].mxu1 %v59_v17  ;;  %v8537_v17 = vld [vmem:[%s12238_s2 + $0x9e8] ss:$16 sps:$4 sm:$0xff]  }
 0x103   :  { %2658 = vmatpush1.bf16.msra.mxu0 %v8444_v19  ;;  %2945 = vmatpush1.bf16.msra.mxu1 %v8447_v20  ;;  %v8542_v19 = vld [vmem:[%s12238_s2 + $0xa04] ss:$16 sps:$4 sm:$0xff]   ;;  %v8545_v20 = vld [vmem:[%s12238_s2 + $0xa0c] ss:$16 sps:$4 sm:$0xff]  }
 0x104   :  { %2659 = vmatprep.subr.bf16.mxu0 %v8452_v21  ;;  %2946 = vmatprep.subr.bf16.mxu1 %v8455_v22  ;;  %v51_v21 = vld [vmem:[%s12236_s0 + $0x58] sm:$0xff]  ;;  %v8540_v22 = vld [vmem:[%s12238_s2 + $0xa00] ss:$16 sps:$4 sm:$0xff]  }
 0x105   :  { %2689 = vmatprep.mubr.bf16.mxu0 %v62_v23  ;;  %2976 = vmatprep.mubr.bf16.mxu1 %v62_v23  ;;  %v8543_v23 = vld [vmem:[%s12238_s2 + $0xa08] ss:$16 sps:$4 sm:$0xff]  }
 0x107   :  { %2660 = vmatpush1.bf16.msra.mxu0 %v8450_v24  ;;  %2947 = vmatpush1.bf16.msra.mxu1 %v8453_v25  ;;  %v61_v24 = vpack.c.bf16 %v48_v18, %v48_v18  ;;  %v8548_v25 = vld [vmem:[%s12238_s2 + $0xa24] ss:$16 sps:$4 sm:$0xff]  }
 0x108   :  { %2661 = vmatprep.subr.bf16.mxu0 %v8458_v26  ;;  %2948 = vmatprep.subr.bf16.mxu1 %v8461_v27  ;;  %v8551_v26 = vld [vmem:[%s12238_s2 + $0xa2c] ss:$16 sps:$4 sm:$0xff]   ;;  %v8546_v27 = vld [vmem:[%s12238_s2 + $0xa20] ss:$16 sps:$4 sm:$0xff]   ;;  %v8632_v18 = vld [vmem:[%s12238_s2 + $0xbe4] ss:$16 sps:$4 sm:$0xff]  }
 0x10b   :  { %2662 = vmatpush1.bf16.msra.mxu0 %v8456_v28  ;;  %2949 = vmatpush1.bf16.msra.mxu1 %v8459_v29  ;;  %v8549_v28 = vld [vmem:[%s12238_s2 + $0xa28] ss:$16 sps:$4 sm:$0xff]   ;;  %v64_v29 = vpack.c.bf16 %v51_v21, %v51_v21 }
 0x10c   :  { %2663 = vmatprep.subr.bf16.mxu0 %v8464_v30  ;;  %2950 = vmatprep.subr.bf16.mxu1 %v8467_v31  ;;  %v8554_v30 = vld [vmem:[%s12238_s2 + $0xa44] ss:$16 sps:$4 sm:$0xff]   ;;  %v8557_v31 = vld [vmem:[%s12238_s2 + $0xa4c] ss:$16 sps:$4 sm:$0xff]   ;;  %v8633_v21 = vld [vmem:[%s12238_s2 + $0xbe8] ss:$16 sps:$4 sm:$0xff]  }
 0x10f   :  { %2664 = vmatpush1.bf16.msra.mxu0 %v8462_v32  ;;  %2951 = vmatpush1.bf16.msra.mxu1 %v8465_v33  ;;  %v8552_v32 = vld [vmem:[%s12238_s2 + $0xa40] ss:$16 sps:$4 sm:$0xff]   ;;  %v8555_v33 = vld [vmem:[%s12238_s2 + $0xa48] ss:$16 sps:$4 sm:$0xff]  }
 0x110   :  { %2665 = vmatprep.subr.bf16.mxu0 %v8470_v34  ;;  %2952 = vmatprep.subr.bf16.mxu1 %v8473_v35  ;;  %v8560_v34 = vld [vmem:[%s12238_s2 + $0xa64] ss:$16 sps:$4 sm:$0xff]   ;;  %v8563_v35 = vld [vmem:[%s12238_s2 + $0xa6c] ss:$16 sps:$4 sm:$0xff]  }
 0x113   :  { %2666 = vmatpush1.bf16.msra.mxu0 %v8468_v36  ;;  %2953 = vmatpush1.bf16.msra.mxu1 %v8471_v37  ;;  %v8558_v36 = vld [vmem:[%s12238_s2 + $0xa60] ss:$16 sps:$4 sm:$0xff]   ;;  %v8561_v37 = vld [vmem:[%s12238_s2 + $0xa68] ss:$16 sps:$4 sm:$0xff]  }
 0x114   :  { %2667 = vmatprep.subr.bf16.mxu0 %v8476_v38  ;;  %2954 = vmatprep.subr.bf16.mxu1 %v8479_v39  ;;  %v8566_v38 = vld [vmem:[%s12238_s2 + $0xa84] ss:$16 sps:$4 sm:$0xff]   ;;  %v8569_v39 = vld [vmem:[%s12238_s2 + $0xa8c] ss:$16 sps:$4 sm:$0xff]  }
 0x117   :  { %2668 = vmatpush1.bf16.msra.mxu0 %v8474_v40  ;;  %2955 = vmatpush1.bf16.msra.mxu1 %v8477_v41  ;;  %v8564_v40 = vld [vmem:[%s12238_s2 + $0xa80] ss:$16 sps:$4 sm:$0xff]   ;;  %v8567_v41 = vld [vmem:[%s12238_s2 + $0xa88] ss:$16 sps:$4 sm:$0xff]  }
 0x118   :  { %2669 = vmatprep.subr.bf16.mxu0 %v8482_v42  ;;  %2956 = vmatprep.subr.bf16.mxu1 %v8485_v43  ;;  %v8572_v42 = vld [vmem:[%s12238_s2 + $0xaa4] ss:$16 sps:$4 sm:$0xff]   ;;  %v8575_v43 = vld [vmem:[%s12238_s2 + $0xaac] ss:$16 sps:$4 sm:$0xff]  }
 0x11b   :  { %2670 = vmatpush1.bf16.msra.mxu0 %v8480_v44  ;;  %2957 = vmatpush1.bf16.msra.mxu1 %v8483_v45  ;;  %v8570_v44 = vld [vmem:[%s12238_s2 + $0xaa0] ss:$16 sps:$4 sm:$0xff]   ;;  %v8573_v45 = vld [vmem:[%s12238_s2 + $0xaa8] ss:$16 sps:$4 sm:$0xff]  }
 0x11c   :  { %2671 = vmatprep.subr.bf16.mxu0 %v8488_v46  ;;  %2958 = vmatprep.subr.bf16.mxu1 %v8491_v47  ;;  %v8578_v46 = vld [vmem:[%s12238_s2 + $0xac4] ss:$16 sps:$4 sm:$0xff]   ;;  %v8581_v47 = vld [vmem:[%s12238_s2 + $0xacc] ss:$16 sps:$4 sm:$0xff]  }
 0x11f   :  { %2672 = vmatpush1.bf16.msra.mxu0 %v8486_v48  ;;  %2959 = vmatpush1.bf16.msra.mxu1 %v8489_v49  ;;  %v8576_v48 = vld [vmem:[%s12238_s2 + $0xac0] ss:$16 sps:$4 sm:$0xff]   ;;  %v8579_v49 = vld [vmem:[%s12238_s2 + $0xac8] ss:$16 sps:$4 sm:$0xff]  }
 0x120   :  { %2673 = vmatprep.subr.bf16.mxu0 %v8494_v50  ;;  %2960 = vmatprep.subr.bf16.mxu1 %v8497_v51  ;;  %v8584_v50 = vld [vmem:[%s12238_s2 + $0xae4] ss:$16 sps:$4 sm:$0xff]   ;;  %v8587_v51 = vld [vmem:[%s12238_s2 + $0xaec] ss:$16 sps:$4 sm:$0xff]  }
 0x123   :  { %2674 = vmatpush1.bf16.msra.mxu0 %v8492_v52  ;;  %2961 = vmatpush1.bf16.msra.mxu1 %v8495_v53  ;;  %v8582_v52 = vld [vmem:[%s12238_s2 + $0xae0] ss:$16 sps:$4 sm:$0xff]   ;;  %v8585_v53 = vld [vmem:[%s12238_s2 + $0xae8] ss:$16 sps:$4 sm:$0xff]  }
 0x124   :  { %2675 = vmatprep.subr.bf16.mxu0 %v8500_v54  ;;  %2962 = vmatprep.subr.bf16.mxu1 %v8503_v55  ;;  %v8590_v54 = vld [vmem:[%s12238_s2 + $0xb04] ss:$16 sps:$4 sm:$0xff]   ;;  %v8593_v55 = vld [vmem:[%s12238_s2 + $0xb0c] ss:$16 sps:$4 sm:$0xff]  }
 0x127   :  { %2676 = vmatpush1.bf16.msra.mxu0 %v8498_v56  ;;  %2963 = vmatpush1.bf16.msra.mxu1 %v8501_v57  ;;  %v8588_v56 = vld [vmem:[%s12238_s2 + $0xb00] ss:$16 sps:$4 sm:$0xff]   ;;  %v8591_v57 = vld [vmem:[%s12238_s2 + $0xb08] ss:$16 sps:$4 sm:$0xff]  }
 0x128   :  { %2677 = vmatprep.subr.bf16.mxu0 %v8506_v58  ;;  %2964 = vmatprep.subr.bf16.mxu1 %v8509_v59  ;;  %v8596_v58 = vld [vmem:[%s12238_s2 + $0xb24] ss:$16 sps:$4 sm:$0xff]   ;;  %v8599_v59 = vld [vmem:[%s12238_s2 + $0xb2c] ss:$16 sps:$4 sm:$0xff]  }
 0x12b   :  { %2678 = vmatpush1.bf16.msra.mxu0 %v8504_v60  ;;  %2965 = vmatpush1.bf16.msra.mxu1 %v8507_v61  ;;  %v8594_v60 = vld [vmem:[%s12238_s2 + $0xb20] ss:$16 sps:$4 sm:$0xff]   ;;  %v8597_v61 = vld [vmem:[%s12238_s2 + $0xb28] ss:$16 sps:$4 sm:$0xff]  }
 0x12c   :  { %2679 = vmatprep.subr.bf16.mxu0 %v8512_v62  ;;  %2966 = vmatprep.subr.bf16.mxu1 %v8515_v63  ;;  %v8602_v62 = vld [vmem:[%s12238_s2 + $0xb44] ss:$16 sps:$4 sm:$0xff]   ;;  %v8605_v63 = vld [vmem:[%s12238_s2 + $0xb4c] ss:$16 sps:$4 sm:$0xff]  }
 0x12f   :  { %2680 = vmatpush1.bf16.msra.mxu0 %v8510_v0  ;;  %2967 = vmatpush1.bf16.msra.mxu1 %v8513_v1  ;;  %v8600_v0 = vld [vmem:[%s12238_s2 + $0xb40] ss:$16 sps:$4 sm:$0xff]   ;;  %v8603_v1 = vld [vmem:[%s12238_s2 + $0xb48] ss:$16 sps:$4 sm:$0xff]  }
 0x130   :  { %2681 = vmatprep.subr.bf16.mxu0 %v8518_v2  ;;  %2968 = vmatprep.subr.bf16.mxu1 %v8521_v3  ;;  %v8608_v2 = vld [vmem:[%s12238_s2 + $0xb64] ss:$16 sps:$4 sm:$0xff]   ;;  %v8611_v3 = vld [vmem:[%s12238_s2 + $0xb6c] ss:$16 sps:$4 sm:$0xff]  }
 0x133   :  { %2682 = vmatpush1.bf16.msra.mxu0 %v8516_v4  ;;  %2969 = vmatpush1.bf16.msra.mxu1 %v8519_v5  ;;  %v8606_v4 = vld [vmem:[%s12238_s2 + $0xb60] ss:$16 sps:$4 sm:$0xff]   ;;  %v8609_v5 = vld [vmem:[%s12238_s2 + $0xb68] ss:$16 sps:$4 sm:$0xff]  }
 0x134   :  { %2683 = vmatprep.subr.bf16.mxu0 %v8524_v6  ;;  %2970 = vmatprep.subr.bf16.mxu1 %v8527_v7  ;;  %v8614_v6 = vld [vmem:[%s12238_s2 + $0xb84] ss:$16 sps:$4 sm:$0xff]   ;;  %v8617_v7 = vld [vmem:[%s12238_s2 + $0xb8c] ss:$16 sps:$4 sm:$0xff]  }
 0x137   :  { %2684 = vmatpush1.bf16.msra.mxu0 %v8522_v8  ;;  %2971 = vmatpush1.bf16.msra.mxu1 %v8525_v9  ;;  %v8612_v8 = vld [vmem:[%s12238_s2 + $0xb80] ss:$16 sps:$4 sm:$0xff]   ;;  %v8615_v9 = vld [vmem:[%s12238_s2 + $0xb88] ss:$16 sps:$4 sm:$0xff]  }
 0x138   :  { %2685 = vmatprep.subr.bf16.mxu0 %v8530_v10  ;;  %2972 = vmatprep.subr.bf16.mxu1 %v8533_v11  ;;  %v8620_v10 = vld [vmem:[%s12238_s2 + $0xba4] ss:$16 sps:$4 sm:$0xff]   ;;  %v8623_v11 = vld [vmem:[%s12238_s2 + $0xbac] ss:$16 sps:$4 sm:$0xff]  }
 0x13b   :  { %2686 = vmatpush1.bf16.msra.mxu0 %v8528_v12  ;;  %2973 = vmatpush1.bf16.msra.mxu1 %v8531_v13  ;;  %v8618_v12 = vld [vmem:[%s12238_s2 + $0xba0] ss:$16 sps:$4 sm:$0xff]   ;;  %v8621_v13 = vld [vmem:[%s12238_s2 + $0xba8] ss:$16 sps:$4 sm:$0xff]  }
 0x13c   :  { %2687 = vmatprep.subr.bf16.mxu0 %v8536_v14  ;;  %2974 = vmatprep.subr.bf16.mxu1 %v8539_v15  ;;  %v8626_v14 = vld [vmem:[%s12238_s2 + $0xbc4] ss:$16 sps:$4 sm:$0xff]   ;;  %v8629_v15 = vld [vmem:[%s12238_s2 + $0xbcc] ss:$16 sps:$4 sm:$0xff]  }
 0x13f   :  { %2688 = vmatpush1.bf16.msra.mxu0 %v8534_v16  ;;  %2975 = vmatpush1.bf16.msra.mxu1 %v8537_v17  ;;  %v8624_v16 = vld [vmem:[%s12238_s2 + $0xbc0] ss:$16 sps:$4 sm:$0xff]   ;;  %v8627_v17 = vld [vmem:[%s12238_s2 + $0xbc8] ss:$16 sps:$4 sm:$0xff]  }
 0x140   :  { %2698 = vmatprep.subr.bf16.mxu0 %v8542_v19  ;;  %2985 = vmatprep.subr.bf16.mxu1 %v8545_v20  ;;  %v8635_v19 = vld [vmem:[%s12238_s2 + $0xbec] ss:$16 sps:$4 sm:$0xff]   ;;  %v8630_v20 = vld [vmem:[%s12238_s2 + $0xbe0] ss:$16 sps:$4 sm:$0xff]  }
 0x142   :  { %2690 = vmatmul.mubr.bf16.vlgmr.msra.gmra.mrb[0].mxu0 %v61_v24  ;;  %2977 = vmatmul.mubr.bf16.vlgmr.msra.gmra.mrb[0].mxu1 %v61_v24  ;;  %v8641_v24 = vld [vmem:[%s12238_s2 + $0xc0c] ss:$16 sps:$4 sm:$0xff]  }
 0x143   :  { %2699 = vmatpush1.bf16.msra.mxu0 %v8540_v22  ;;  %2986 = vmatpush1.bf16.msra.mxu1 %v8543_v23  ;;  %v50_v22 = vld [vmem:[%s12236_s0 + $0x50] sm:$0xff] }
 0x144   :  { %2700 = vmatprep.subr.bf16.mxu0 %v8548_v25  ;;  %2987 = vmatprep.subr.bf16.mxu1 %v8551_v26  ;;  %v8638_v23 = vld [vmem:[%s12238_s2 + $0xc04] ss:$16 sps:$4 sm:$0xff]   ;;  %v8636_v25 = vld [vmem:[%s12238_s2 + $0xc00] ss:$16 sps:$4 sm:$0xff]   ;;  %v8639_v26 = vld [vmem:[%s12238_s2 + $0xc08] ss:$16 sps:$4 sm:$0xff]  }
 0x145   :  { %2730 = vmatprep.mubr.bf16.mxu0 %v64_v29  ;;  %3017 = vmatprep.mubr.bf16.mxu1 %v64_v29  ;;  %v8647_v29 = vld [vmem:[%s12238_s2 + $0xc2c] ss:$16 sps:$4 sm:$0xff]  }
 0x147   :  { %2701 = vmatpush1.bf16.msra.mxu0 %v8546_v27  ;;  %2988 = vmatpush1.bf16.msra.mxu1 %v8549_v28  ;;  %v63_v27 = vpack.c.bf16 %v50_v22, %v50_v22  ;;  %v8644_v28 = vld [vmem:[%s12238_s2 + $0xc24] ss:$16 sps:$4 sm:$0xff]  }
 0x148   :  { %2702 = vmatprep.subr.bf16.mxu0 %v8554_v30  ;;  %2989 = vmatprep.subr.bf16.mxu1 %v8557_v31  ;;  %v8642_v30 = vld [vmem:[%s12238_s2 + $0xc20] ss:$16 sps:$4 sm:$0xff]   ;;  %v8645_v31 = vld [vmem:[%s12238_s2 + $0xc28] ss:$16 sps:$4 sm:$0xff]  }
 0x14b   :  { %2703 = vmatpush1.bf16.msra.mxu0 %v8552_v32  ;;  %2990 = vmatpush1.bf16.msra.mxu1 %v8555_v33  ;;  %v8650_v32 = vld [vmem:[%s12238_s2 + $0xc44] ss:$16 sps:$4 sm:$0xff]   ;;  %v8653_v33 = vld [vmem:[%s12238_s2 + $0xc4c] ss:$16 sps:$4 sm:$0xff]  }
 0x14c   :  { %2704 = vmatprep.subr.bf16.mxu0 %v8560_v34  ;;  %2991 = vmatprep.subr.bf16.mxu1 %v8563_v35  ;;  %v8648_v34 = vld [vmem:[%s12238_s2 + $0xc40] ss:$16 sps:$4 sm:$0xff]   ;;  %v8651_v35 = vld [vmem:[%s12238_s2 + $0xc48] ss:$16 sps:$4 sm:$0xff]  }
 0x14f   :  { %2705 = vmatpush1.bf16.msra.mxu0 %v8558_v36  ;;  %2992 = vmatpush1.bf16.msra.mxu1 %v8561_v37  ;;  %v9414_v36 = vmov 0   ;;  %v8656_v37 = vld [vmem:[%s12238_s2 + $0xc64] ss:$16 sps:$4 sm:$0xff]  }
 0x150   :  { %2706 = vmatprep.subr.bf16.mxu0 %v8566_v38  ;;  %2993 = vmatprep.subr.bf16.mxu1 %v8569_v39  ;;  %v8659_v38 = vld [vmem:[%s12238_s2 + $0xc6c] ss:$16 sps:$4 sm:$0xff]   ;;  %v8654_v39 = vld [vmem:[%s12238_s2 + $0xc60] ss:$16 sps:$4 sm:$0xff]  }
 0x153   :  { %2707 = vmatpush1.bf16.msra.mxu0 %v8564_v40  ;;  %2994 = vmatpush1.bf16.msra.mxu1 %v8567_v41  ;;  %v8657_v40 = vld [vmem:[%s12238_s2 + $0xc68] ss:$16 sps:$4 sm:$0xff]   ;;  %v52_v41 = vld [vmem:[%s12236_s0 + $0x60] sm:$0xff] }
 0x154   :  { %2708 = vmatprep.subr.bf16.mxu0 %v8572_v42  ;;  %2995 = vmatprep.subr.bf16.mxu1 %v8575_v43  ;;  %v8660_v42 = vld [vmem:[%s12240_s4 + $0x40] sm:$0xff]  }
 0x155   :  { %v8661_v43 = vld [vmem:[%s12240_s4 + $0xc0] sm:$0xff]  }
 0x157   :  { %2709 = vmatpush1.bf16.msra.mxu0 %v8570_v44  ;;  %2996 = vmatpush1.bf16.msra.mxu1 %v8573_v45  ;;  %v8662_v44 = vld [vmem:[%s12240_s4] sm:$0xff]  }
 0x158   :  { %2710 = vmatprep.subr.bf16.mxu0 %v8578_v46  ;;  %2997 = vmatprep.subr.bf16.mxu1 %v8581_v47  ;;  %v8663_v45 = vld [vmem:[%s12240_s4 + $0x80] sm:$0xff]   ;;  %v65_v46 = vpack.c.bf16 %v52_v41, %v52_v41  ;;  %v8664_v47 = vld [vmem:[%s12240_s4 + $0x48] sm:$0xff]  }
 0x15b   :  { %2711 = vmatpush1.bf16.msra.mxu0 %v8576_v48  ;;  %2998 = vmatpush1.bf16.msra.mxu1 %v8579_v49  ;;  %v8665_v48 = vld [vmem:[%s12240_s4 + $0xc8] sm:$0xff]  }
 0x15c   :  { %2712 = vmatprep.subr.bf16.mxu0 %v8584_v50  ;;  %2999 = vmatprep.subr.bf16.mxu1 %v8587_v51  ;;  %v8666_v49 = vld [vmem:[%s12240_s4 + $0x8] sm:$0xff]   ;;  %v8668_v51 = vld [vmem:[%s12240_s4 + $0x50] sm:$0xff]  }
 0x15d   :  { %v8667_v50 = vld [vmem:[%s12240_s4 + $0x88] sm:$0xff]  }
 0x15f   :  { %2713 = vmatpush1.bf16.msra.mxu0 %v8582_v52  ;;  %3000 = vmatpush1.bf16.msra.mxu1 %v8585_v53  ;;  %v8669_v52 = vld [vmem:[%s12240_s4 + $0xd0] sm:$0xff]  }
 0x160   :  { %2714 = vmatprep.subr.bf16.mxu0 %v8590_v54  ;;  %3001 = vmatprep.subr.bf16.mxu1 %v8593_v55  ;;  %v8670_v53 = vld [vmem:[%s12240_s4 + $0x10] sm:$0xff]   ;;  %v8672_v55 = vld [vmem:[%s12240_s4 + $0x58] sm:$0xff]  }
 0x161   :  { %v8671_v54 = vld [vmem:[%s12240_s4 + $0x90] sm:$0xff]  }
 0x163   :  { %2715 = vmatpush1.bf16.msra.mxu0 %v8588_v56  ;;  %3002 = vmatpush1.bf16.msra.mxu1 %v8591_v57  ;;  %v8673_v56 = vld [vmem:[%s12240_s4 + $0xd8] sm:$0xff]  }
 0x164   :  { %2716 = vmatprep.subr.bf16.mxu0 %v8596_v58  ;;  %3003 = vmatprep.subr.bf16.mxu1 %v8599_v59  ;;  %v8674_v57 = vld [vmem:[%s12240_s4 + $0x18] sm:$0xff]   ;;  %v8676_v59 = vld [vmem:[%s12240_s4 + $0x60] sm:$0xff]  }
 0x165   :  { %v8675_v58 = vld [vmem:[%s12240_s4 + $0x98] sm:$0xff]  }
 0x167   :  { %2717 = vmatpush1.bf16.msra.mxu0 %v8594_v60  ;;  %3004 = vmatpush1.bf16.msra.mxu1 %v8597_v61  ;;  %v8677_v60 = vld [vmem:[%s12240_s4 + $0xe0] sm:$0xff]  }
 0x168   :  { %2718 = vmatprep.subr.bf16.mxu0 %v8602_v62  ;;  %3005 = vmatprep.subr.bf16.mxu1 %v8605_v63  ;;  %v8678_v61 = vld [vmem:[%s12240_s4 + $0x20] sm:$0xff]   ;;  %v8680_v63 = vld [vmem:[%s12240_s4 + $0x68] sm:$0xff]  }
 0x169   :  { %v8679_v62 = vld [vmem:[%s12240_s4 + $0xa0] sm:$0xff]  }
 0x16b   :  { %2719 = vmatpush1.bf16.msra.mxu0 %v8600_v0  ;;  %3006 = vmatpush1.bf16.msra.mxu1 %v8603_v1  ;;  %v8681_v0 = vld [vmem:[%s12240_s4 + $0xe8] sm:$0xff]  }
 0x16c   :  { %2720 = vmatprep.subr.bf16.mxu0 %v8608_v2  ;;  %3007 = vmatprep.subr.bf16.mxu1 %v8611_v3  ;;  %v8682_v1 = vld [vmem:[%s12240_s4 + $0x28] sm:$0xff]  }
 0x16d   :  { %v8683_v2 = vld [vmem:[%s12240_s4 + $0xa8] sm:$0xff]  }
 0x16f   :  { %2721 = vmatpush1.bf16.msra.mxu0 %v8606_v4  ;;  %3008 = vmatpush1.bf16.msra.mxu1 %v8609_v5 }
 0x170   :  { %2722 = vmatprep.subr.bf16.mxu0 %v8614_v6  ;;  %3009 = vmatprep.subr.bf16.mxu1 %v8617_v7 }
 0x173   :  { %2723 = vmatpush1.bf16.msra.mxu0 %v8612_v8  ;;  %3010 = vmatpush1.bf16.msra.mxu1 %v8615_v9 }
 0x174   :  { %2724 = vmatprep.subr.bf16.mxu0 %v8620_v10  ;;  %3011 = vmatprep.subr.bf16.mxu1 %v8623_v11 }
 0x177   :  { %2725 = vmatpush1.bf16.msra.mxu0 %v8618_v12  ;;  %3012 = vmatpush1.bf16.msra.mxu1 %v8621_v13 }
 0x178   :  { %2726 = vmatprep.subr.bf16.mxu0 %v8626_v14  ;;  %3013 = vmatprep.subr.bf16.mxu1 %v8629_v15 }
 0x17b   :  { %2727 = vmatpush1.bf16.msra.mxu0 %v8624_v16  ;;  %3014 = vmatpush1.bf16.msra.mxu1 %v8627_v17 }
 0x17c   :  { %2728 = vmatprep.subr.bf16.mxu0 %v8632_v18  ;;  %3015 = vmatprep.subr.bf16.mxu1 %v8635_v19 }
 0x17f   :  { %2729 = vmatpush1.bf16.msra.mxu0 %v8630_v20  ;;  %3016 = vmatpush1.bf16.msra.mxu1 %v8633_v21 }
 0x180   :  { %2739 = vmatprep.subr.bf16.mxu0 %v8638_v23  ;;  %3026 = vmatprep.subr.bf16.mxu1 %v8641_v24 }
 0x182   :  { %2731 = vmatmul.mubr.bf16.vlgmr.msra.gmra.mrb[0].mxu0 %v63_v27  ;;  %3018 = vmatmul.mubr.bf16.vlgmr.msra.gmra.mrb[0].mxu1 %v63_v27 }
 0x183   :  { %2740 = vmatpush1.bf16.msra.mxu0 %v8636_v25  ;;  %3027 = vmatpush1.bf16.msra.mxu1 %v8639_v26 }
 0x184   :  { %2741 = vmatprep.subr.bf16.mxu0 %v8644_v28  ;;  %3028 = vmatprep.subr.bf16.mxu1 %v8647_v29 }
 0x185   :  { %2771 = vmatprep.mubr.bf16.mxu0 %v9414_v36  ;;  %3058 = vmatprep.mubr.bf16.mxu1 %v9414_v36 }
 0x187   :  { %2742 = vmatpush1.bf16.msra.mxu0 %v8642_v30  ;;  %3029 = vmatpush1.bf16.msra.mxu1 %v8645_v31 }
 0x188   :  { %2743 = vmatprep.subr.bf16.mxu0 %v8650_v32  ;;  %3030 = vmatprep.subr.bf16.mxu1 %v8653_v33 }
 0x18b   :  { %2744 = vmatpush1.bf16.msra.mxu0 %v8648_v34  ;;  %3031 = vmatpush1.bf16.msra.mxu1 %v8651_v35 }
 0x18c   :  { %2745 = vmatprep.subr.bf16.mxu0 %v8656_v37  ;;  %3032 = vmatprep.subr.bf16.mxu1 %v8659_v38 }
 0x18f   :  { %2746 = vmatpush1.bf16.msra.mxu0 %v8654_v39  ;;  %3033 = vmatpush1.bf16.msra.mxu1 %v8657_v40 }
 0x190   :  { %7878 = vmatprep.subr.bf16.mxu0 %v8660_v42  ;;  %7900 = vmatprep.subr.bf16.mxu1 %v8661_v43 }
 0x192   :  { %7389 = vmatmul.mubr.msk.bf16.vlgmr.msra.gmra.mrb[0].mxu0 %vm2489_vm0, %v65_v46  ;;  %7390 = vmatmul.mubr.msk.bf16.vlgmr.msra.gmra.mrb[0].mxu1 %vm2489_vm0, %v65_v46 }
 0x193   :  { %7879 = vmatpush3.bf16.msra.mxu0 %v8662_v44  ;;  %7901 = vmatpush3.bf16.msra.mxu1 %v8663_v45 }
 0x194   :  { %7880 = vmatprep.subr.bf16.mxu0 %v8664_v47  ;;  %7902 = vmatprep.subr.bf16.mxu1 %v8665_v48 }
 0x197   :  { %7881 = vmatpush3.bf16.msra.mxu0 %v8666_v49  ;;  %7903 = vmatpush3.bf16.msra.mxu1 %v8667_v50 }
 0x198   :  { %7882 = vmatprep.subr.bf16.mxu0 %v8668_v51  ;;  %7904 = vmatprep.subr.bf16.mxu1 %v8669_v52 }
 0x19b   :  { %7883 = vmatpush3.bf16.msra.mxu0 %v8670_v53  ;;  %7905 = vmatpush3.bf16.msra.mxu1 %v8671_v54 }
 0x19c   :  { %7884 = vmatprep.subr.bf16.mxu0 %v8672_v55  ;;  %7906 = vmatprep.subr.bf16.mxu1 %v8673_v56 }
 0x19f   :  { %7885 = vmatpush3.bf16.msra.mxu0 %v8674_v57  ;;  %7907 = vmatpush3.bf16.msra.mxu1 %v8675_v58 }
 0x1a0   :  { %7886 = vmatprep.subr.bf16.mxu0 %v8676_v59  ;;  %7908 = vmatprep.subr.bf16.mxu1 %v8677_v60 }
 0x1a3   :  { %7887 = vmatpush3.bf16.msra.mxu0 %v8678_v61  ;;  %7909 = vmatpush3.bf16.msra.mxu1 %v8679_v62 }
 0x1a4   :  { %7888 = vmatprep.subr.bf16.mxu0 %v8680_v63  ;;  %7910 = vmatprep.subr.bf16.mxu1 %v8681_v0 }
 0x1a7   :  { %7889 = vmatpush3.bf16.msra.mxu0 %v8682_v1  ;;  %7911 = vmatpush3.bf16.msra.mxu1 %v8683_v2 }
 0x1a8   :  { %18 = vsyncpa [#allocation5], 0  ;;  %v8684_v3 = vld [vmem:[%s12240_s4 + $0x70] sm:$0xff]   ;;  %v8688_v7 = vld [vmem:[%s12240_s4 + $0x78] sm:$0xff]   ;;  %s9415_s29 = smov 32   ;;  %v469_v12 = vlaneseq  ;;  %s9416_s25 = smov 96  }
 0x1a9   :  { %v8685_v4 = vld [vmem:[%s12240_s4 + $0xf0] sm:$0xff]   ;;  %7890 = vmatprep.subr.bf16.mxu0 %v8684_v3  ;;  %v8689_v8 = vld [vmem:[%s12240_s4 + $0xf8] sm:$0xff]   ;;  %v66_v11 = vld [vmem:[%s12237_s1] sm:$0xff]  ;;  %vm3510_vm1 = vcmask 261120   ;;  %vm6958_vm2 = vcmask 785408  }
 0x1aa   :  { %v8686_v5 = vld [vmem:[%s12240_s4 + $0x30] sm:$0xff]   ;;  %7912 = vmatprep.subr.bf16.mxu1 %v8685_v4  ;;  %v8690_v9 = vld [vmem:[%s12240_s4 + $0x38] sm:$0xff]   ;;  %3421 = vrot.lane.b32.xlu0 %v66_v11, %s9415_s29  ;;  %v10823_v13 = vshrl.u32 %v469_v12, 7  ;;  %v467_v16 = vld [vmem:[%s12239_s3] sm:$0xf] }
 0x1ab   :  { %v8687_v6 = vld [vmem:[%s12240_s4 + $0xb0] sm:$0xff]   ;;  %7891 = vmatpush3.bf16.msra.mxu0 %v8686_v5  ;;  %v8691_v10 = vld [vmem:[%s12240_s4 + $0xb8] sm:$0xff]   ;;  %v7391_v46 = vld [vmem:[%s12241_s5] ss:$0 sm:$0xff]  ;;  %s9417_s4 = smov 64  }
 0x1ac   :  { %7913 = vmatpush3.bf16.msra.mxu1 %v8687_v6  ;;  %7892 = vmatprep.subr.bf16.mxu0 %v8688_v7  ;;  %v10826_v14 = vsub.s32 0, %v10823_v13  ;;  %v10829_v15 = vsub.s32 2, %v10823_v13  ;;  %v10835_v17 = vsub.s32 1, %v10823_v13  ;;  %v10838_v18 = vsub.s32 3, %v10823_v13  ;;  %v8692_v55 = vld [vmem:[%s12242_s6] ss:$16 sps:$4 sm:$0xff]  }
 0x1ad   :  { %7914 = vmatprep.subr.bf16.mxu1 %v8689_v8  ;;  %v8695_v57 = vld [vmem:[%s12242_s6 + $0x8] ss:$16 sps:$4 sm:$0xff]   ;;  %v8697_v58 = vld [vmem:[%s12242_s6 + $0xc] ss:$16 sps:$4 sm:$0xff]   ;;  %v8700_v59 = vld [vmem:[%s12242_s6 + $0x24] ss:$16 sps:$4 sm:$0xff]  }
 0x1ae   :  { %v472_v19 = vrot.slane %v467_v16, %v10826_v14  ;;  %v480_v20 = vrot.slane %v467_v16, %v10829_v15  ;;  %v476_v21 = vrot.slane %v467_v16, %v10835_v17  ;;  %v484_v22 = vrot.slane %v467_v16, %v10838_v18  ;;  %v8698_v61 = vld [vmem:[%s12242_s6 + $0x20] ss:$16 sps:$4 sm:$0xff]   ;;  %v8703_v0 = vld [vmem:[%s12242_s6 + $0x2c] ss:$16 sps:$4 sm:$0xff]   ;;  %v8701_v1 = vld [vmem:[%s12242_s6 + $0x28] ss:$16 sps:$4 sm:$0xff]  }
 0x1af   :  { %7893 = vmatpush3.bf16.msra.mxu0 %v8690_v9  ;;  %v8706_v5 = vld [vmem:[%s12244_s8 + $0x4] ss:$52 sps:$4 sm:$0xff]   ;;  %v8709_v6 = vld [vmem:[%s12244_s8 + $0xc] ss:$52 sps:$4 sm:$0xff]  }
 0x1b0   :  { %7915 = vmatpush3.bf16.msra.mxu1 %v8691_v10 }
 0x1b1   :  { %3555 = vmatprep.subr.bf16.mxu1 %v8697_v58  ;;  %v8758_v58 = vld [vmem:[%s12244_s8 + $0x3a8] ss:$52 sps:$4 sm:$0xff]  }
 0x21c   :  { %v3422_v2 = vpop.permute.xlu0 %3421 }
 0x265   :  { %v2773_v23 = vpop.f32.mrb[0].mxu0  ;;  %v3060_v24 = vpop.f32.mrb[0].mxu1 }
 0x266   :  { %v7966_v25 = vadd.f32 %v2773_v23, %v472_v19  ;;  %v7968_v26 = vadd.f32 %v3060_v24, %v480_v20  ;;  %v2775_v27 = vpop.f32.mrb[1].mxu0  ;;  %v3062_v28 = vpop.f32.mrb[1].mxu1  ;;  %v8704_v20 = vld [vmem:[%s12244_s8] ss:$52 sps:$4 sm:$0xff]  }
 0x267   :  { %v7967_v29 = vadd.f32 %v2775_v27, %v476_v21  ;;  %v7969_v30 = vadd.f32 %v3062_v28, %v484_v22  ;;  %v2777_v31 = vpop.f32.mrb[2].mxu0  ;;  %v3064_v32 = vpop.f32.mrb[2].mxu1  ;;  %v8707_v21 = vld [vmem:[%s12244_s8 + $0x8] ss:$52 sps:$4 sm:$0xff]   ;;  %v8712_v24 = vld [vmem:[%s12244_s8 + $0x6c] ss:$52 sps:$4 sm:$0xff]  }
 0x268   :  { %v3067_v33 = vmax.f32 %v7966_v25, 0.0  ;;  %v3069_v34 = vmax.f32 %v7968_v26, 0.0  ;;  %v2778_v35 = vpop.f32.mrb[3].mxu0  ;;  %v3065_v37 = vpop.f32.mrb[3].mxu1  ;;  %v8715_v25 = vld [vmem:[%s12244_s8 + $0x74] ss:$52 sps:$4 sm:$0xff]  }
 0x269   :  { %v3068_v38 = vmax.f32 %v7967_v29, 0.0  ;;  %v3070_v39 = vmax.f32 %v7969_v30, 0.0  ;;  %v8710_v26 = vld [vmem:[%s12244_s8 + $0x68] ss:$52 sps:$4 sm:$0xff]   ;;  %v8713_v27 = vld [vmem:[%s12244_s8 + $0x70] ss:$52 sps:$4 sm:$0xff]  }
 0x26a   :  { %v3071_v42 = vpack.c.bf16 %v3067_v33, %v3067_v33  ;;  %v3073_v43 = vpack.c.bf16 %v3069_v34, %v3069_v34  ;;  %v8718_v28 = vld [vmem:[%s12244_s8 + $0xd4] ss:$52 sps:$4 sm:$0xff]   ;;  %v8721_v29 = vld [vmem:[%s12244_s8 + $0xdc] ss:$52 sps:$4 sm:$0xff]   ;;  %v8719_v31 = vld [vmem:[%s12244_s8 + $0xd8] ss:$52 sps:$4 sm:$0xff]  }
 0x26b   :  { %v3072_v40 = vpack.c.bf16 %v3068_v38, %v3068_v38  ;;  %v3074_v41 = vpack.c.bf16 %v3070_v39, %v3070_v39  ;;  %v8716_v30 = vld [vmem:[%s12244_s8 + $0xd0] ss:$52 sps:$4 sm:$0xff]   ;;  %v8722_v34 = vld [vmem:[%s12244_s8 + $0x138] ss:$52 sps:$4 sm:$0xff]   ;;  %v8725_v35 = vld [vmem:[%s12244_s8 + $0x140] ss:$52 sps:$4 sm:$0xff]  }
 0x26c   :  { %v8724_v32 = vld [vmem:[%s12244_s8 + $0x13c] ss:$52 sps:$4 sm:$0xff]   ;;  %v8727_v33 = vld [vmem:[%s12244_s8 + $0x144] ss:$52 sps:$4 sm:$0xff]   ;;  %v8733_v38 = vld [vmem:[%s12244_s8 + $0x1ac] ss:$52 sps:$4 sm:$0xff]  }
 0x26d   :  { %3370 = vmatprep.mubr.bf16.mxu0 %v3072_v40  ;;  %3410 = vmatprep.mubr.bf16.mxu1 %v3074_v41  ;;  %v8730_v37 = vld [vmem:[%s12244_s8 + $0x1a4] ss:$52 sps:$4 sm:$0xff]   ;;  %v8728_v39 = vld [vmem:[%s12244_s8 + $0x1a0] ss:$52 sps:$4 sm:$0xff]   ;;  %v8731_v40 = vld [vmem:[%s12244_s8 + $0x1a8] ss:$52 sps:$4 sm:$0xff]  }
 0x26e   :  { %3371 = vmatmul.mubr.bf16.vlgmr.msra.gmra.mrb[4].mxu0 %v3071_v42  ;;  %3411 = vmatmul.mubr.bf16.vlgmr.msra.gmra.mrb[4].mxu1 %v3073_v43  ;;  %v8736_v41 = vld [vmem:[%s12244_s8 + $0x20c] ss:$52 sps:$4 sm:$0xff]   ;;  %v8739_v42 = vld [vmem:[%s12244_s8 + $0x214] ss:$52 sps:$4 sm:$0xff]  }
 0x26f   :  { %3546 = vmatprep.mubr.bf16.mxu0 %v9414_v36  ;;  %3587 = vmatprep.mubr.bf16.mxu1 %v9414_v36  ;;  %v8694_v36 = vld [vmem:[%s12242_s6 + $0x4] ss:$16 sps:$4 sm:$0xff]   ;;  %v8734_v43 = vld [vmem:[%s12244_s8 + $0x208] ss:$52 sps:$4 sm:$0xff]  }
 0x270   :  { %3514 = vmatprep.subr.bf16.mxu0 %v8694_v36  ;;  %3556 = vmatpush1.bf16.msra.mxu1 %v8695_v57  ;;  %v8755_v36 = vld [vmem:[%s12244_s8 + $0x348] ss:$52 sps:$4 sm:$0xff]  }
 0x271   :  { %3515 = vmatpush1.bf16.msra.mxu0 %v8692_v55  ;;  %3557 = vmatprep.subr.bf16.mxu1 %v8703_v0  ;;  %v8752_v55 = vld [vmem:[%s12244_s8 + $0x340] ss:$52 sps:$4 sm:$0xff]   ;;  %v8772_v0 = vld [vmem:[%s12244_s8 + $0x47c] ss:$52 sps:$4 sm:$0xff]  }
 0x272   :  { %3516 = vmatprep.subr.bf16.mxu0 %v8700_v59  ;;  %v8763_v57 = vld [vmem:[%s12244_s8 + $0x3b4] ss:$52 sps:$4 sm:$0xff]   ;;  %v8761_v59 = vld [vmem:[%s12244_s8 + $0x3b0] ss:$52 sps:$4 sm:$0xff]  }
 0x274   :  { %3558 = vmatpush1.bf16.msra.mxu1 %v8701_v1  ;;  %v8775_v1 = vld [vmem:[%s12244_s8 + $0x484] ss:$52 sps:$4 sm:$0xff]  }
 0x275   :  { %3517 = vmatpush1.bf16.msra.mxu0 %v8698_v61  ;;  %6315 = vmatprep.subr.bf16.mxu1 %v8709_v6  ;;  %v8769_v61 = vld [vmem:[%s12244_s8 + $0x41c] ss:$52 sps:$4 sm:$0xff]   ;;  %v8776_v6 = vld [vmem:[%s12244_s8 + $0x4e0] ss:$52 sps:$4 sm:$0xff]  }
 0x276   :  { %6233 = vmatprep.subr.bf16.mxu0 %v8706_v5  ;;  %v8781_v5 = vld [vmem:[%s12244_s8 + $0x4ec] ss:$52 sps:$4 sm:$0xff]  }
 0x341   :  { %v7894_v44 = vpop.f32.mrb[4].mxu0  ;;  %v7916_v45 = vpop.f32.mrb[4].mxu1 }
 0x342   :  { %v7895_v47 = vpop.f32.mrb[5].mxu0  ;;  %v7917_v48 = vpop.f32.mrb[5].mxu1 }
 0x343   :  { %v7896_v49 = vadd.f32 %v7895_v47, %v7894_v44  ;;  %v7918_v50 = vadd.f32 %v7917_v48, %v7916_v45  ;;  %v7897_v51 = vpop.f32.mrb[6].mxu0  ;;  %v7919_v52 = vpop.f32.mrb[6].mxu1  ;;  %v8737_v44 = vld [vmem:[%s12244_s8 + $0x210] ss:$52 sps:$4 sm:$0xff]   ;;  %v8742_v45 = vld [vmem:[%s12244_s8 + $0x274] ss:$52 sps:$4 sm:$0xff]  }
 0x344   :  { %v7898_v53 = vpop.f32.mrb[7].mxu0  ;;  %v7920_v54 = vpop.f32.mrb[7].mxu1  ;;  %v8740_v47 = vld [vmem:[%s12244_s8 + $0x270] ss:$52 sps:$4 sm:$0xff]   ;;  %v8743_v48 = vld [vmem:[%s12244_s8 + $0x278] ss:$52 sps:$4 sm:$0xff]  }
 0x345   :  { %v3373_v56 = vadd.f32 %v7896_v49, %v7391_v46  ;;  %v8745_v46 = vld [vmem:[%s12244_s8 + $0x27c] ss:$52 sps:$4 sm:$0xff]   ;;  %v8746_v51 = vld [vmem:[%s12244_s8 + $0x2d8] ss:$52 sps:$4 sm:$0xff]   ;;  %v8749_v52 = vld [vmem:[%s12244_s8 + $0x2e0] ss:$52 sps:$4 sm:$0xff]  }
 0x346   :  { %v8748_v49 = vld [vmem:[%s12244_s8 + $0x2dc] ss:$52 sps:$4 sm:$0xff]   ;;  %v8754_v53 = vld [vmem:[%s12244_s8 + $0x344] ss:$52 sps:$4 sm:$0xff]   ;;  %v8757_v54 = vld [vmem:[%s12244_s8 + $0x34c] ss:$52 sps:$4 sm:$0xff]  }
 0x347   :  { %v3413_v60 = vadd.f32 %v7918_v50, %v3373_v56  ;;  %v8751_v50 = vld [vmem:[%s12244_s8 + $0x2e4] ss:$52 sps:$4 sm:$0xff]   ;;  %v8760_v56 = vld [vmem:[%s12244_s8 + $0x3ac] ss:$52 sps:$4 sm:$0xff]  }
 0x349   :  { %v3418_v62 = vmul.f32 1.442695, %v3413_v60  ;;  %v3431_v63 = vmul.f32 %v3413_v60, %v3413_v60 }
 0x34b   :  { %9312 = vpow2.f32 %v3418_v62  ;;  %3433 = vrot.lane.b32.xlu1 %v3431_v63, %s9415_s29  ;;  %v8764_v62 = vld [vmem:[%s12244_s8 + $0x410] ss:$52 sps:$4 sm:$0xff]   ;;  %v8767_v63 = vld [vmem:[%s12244_s8 + $0x418] ss:$52 sps:$4 sm:$0xff]  }
 0x34f   :  { %6945 = vrot.lane.b32.xlu1 %v3413_v60, %s9415_s29 }
 0x355   :  { %v9313_v3 = vpop.eup %9312 }
 0x356   :  { %v3424_v4 = vmul.f32 %v9313_v3, %v3422_v2  ;;  %v3430_v7 = vmul.f32 %v9313_v3, %v9313_v3  ;;  %v8770_v2 = vld [vmem:[%s12244_s8 + $0x478] ss:$52 sps:$4 sm:$0xff]  }
 0x358   :  { %3426 = vrot.lane.b32.xlu0 %v3424_v4, %s9416_s25  ;;  %v8778_v4 = vld [vmem:[%s12244_s8 + $0x4e4] ss:$52 sps:$4 sm:$0xff]  }
 0x35c   :  { %6949 = vrot.lane.b32.xlu0 %v9313_v3, %s9415_s29  ;;  %v8773_v3 = vld [vmem:[%s12244_s8 + $0x480] ss:$52 sps:$4 sm:$0xff]  }
 0x3bd   :  { %v3434_v8 = vpop.permute.xlu1 %3433 }
 0x3be   :  { %v3436_v9 = vadd.f32 %v3434_v8, %v3430_v7  ;;  %v8779_v7 = vld [vmem:[%s12244_s8 + $0x4e8] ss:$52 sps:$4 sm:$0xff]   ;;  %v8784_v8 = vld [vmem:[%s12244_s8 + $0x54c] ss:$52 sps:$4 sm:$0xff]  }
 0x3c0   :  { %v3437_v10 = vsub.f32 %v3436_v9, %v3413_v60  ;;  %v8787_v9 = vld [vmem:[%s12244_s8 + $0x554] ss:$52 sps:$4 sm:$0xff]  }
 0x3c1   :  { %v6946_v19 = vpop.permute.xlu1 %6945 }
 0x3c2   :  { %v7424_v11 = vadd.f32 -0.5, %v3437_v10  ;;  %v8782_v10 = vld [vmem:[%s12244_s8 + $0x548] ss:$52 sps:$4 sm:$0xff]  }
 0x3c4   :  { %6953 = vrot.lane.b32.xlu1 %v7424_v11, %s9417_s4  ;;  %v8785_v11 = vld [vmem:[%s12244_s8 + $0x550] ss:$52 sps:$4 sm:$0xff]  }
 0x3ca   :  { %v3427_v12 = vpop.permute.xlu0 %3426 }
 0x3cb   :  { %v3429_v16 = vadd.f32 %v3427_v12, %v3413_v60  ;;  %v8766_v60 = vld [vmem:[%s12244_s8 + $0x414] ss:$52 sps:$4 sm:$0xff]  }
 0x3cc   :  { %v8790_v12 = vld [vmem:[%s12244_s8 + $0x5b4] ss:$52 sps:$4 sm:$0xff]  }
 0x3cd   :  { %v3439_v22 = vpack.c.bf16 %v3429_v16, %v3429_v16  ;;  %v10888_v23 = vsel %vm3510_vm1, %v3429_v16, %v6946_v19  ;;  %v8793_v16 = vld [vmem:[%s12244_s8 + $0x5bc] ss:$52 sps:$4 sm:$0xff]  }
 0x3ce   :  { %v8788_v19 = vld [vmem:[%s12244_s8 + $0x5b0] ss:$52 sps:$4 sm:$0xff]  }
 0x3cf   :  { %7433 = vmatmul.mubr.msk.bf16.vlgmr.msra.gmra.mrb[8].mxu0 %vm3510_vm1, %v3439_v22  ;;  %7434 = vmatmul.mubr.msk.bf16.vlgmr.msra.gmra.mrb[8].mxu1 %vm3510_vm1, %v3439_v22  ;;  %v8799_v22 = vld [vmem:[%s12244_s8 + $0x624] ss:$52 sps:$4 sm:$0xff]  }
 0x3d0   :  { %6234 = vmatpush1.bf16.msra.mxu0 %v8704_v20  ;;  %6316 = vmatpush1.bf16.msra.mxu1 %v8707_v21  ;;  %v8791_v20 = vld [vmem:[%s12244_s8 + $0x5b8] ss:$52 sps:$4 sm:$0xff]   ;;  %v8796_v21 = vld [vmem:[%s12244_s8 + $0x61c] ss:$52 sps:$4 sm:$0xff]  }
 0x3d1   :  { %6235 = vmatprep.subr.bf16.mxu0 %v8712_v24  ;;  %6317 = vmatprep.subr.bf16.mxu1 %v8715_v25  ;;  %v8794_v24 = vld [vmem:[%s12244_s8 + $0x618] ss:$52 sps:$4 sm:$0xff]   ;;  %v8797_v25 = vld [vmem:[%s12244_s8 + $0x620] ss:$52 sps:$4 sm:$0xff]  }
 0x3d4   :  { %6236 = vmatpush1.bf16.msra.mxu0 %v8710_v26  ;;  %6318 = vmatpush1.bf16.msra.mxu1 %v8713_v27  ;;  %v8802_v26 = vld [vmem:[%s12244_s8 + $0x684] ss:$52 sps:$4 sm:$0xff]   ;;  %v8805_v27 = vld [vmem:[%s12244_s8 + $0x68c] ss:$52 sps:$4 sm:$0xff]  }
 0x3d5   :  { %6237 = vmatprep.subr.bf16.mxu0 %v8718_v28  ;;  %6319 = vmatprep.subr.bf16.mxu1 %v8721_v29  ;;  %v6950_v28 = vpop.permute.xlu0 %6949 }
 0x3d6   :  { %v6957_v29 = vsel %vm2489_vm0, %v10888_v23, %v6950_v28  ;;  %v8856_v28 = vld [vmem:[%s12244_s8 + $0xa2c] ss:$52 sps:$4 sm:$0xff]  }
 0x3d8   :  { %6238 = vmatpush1.bf16.msra.mxu0 %v8716_v30  ;;  %6320 = vmatpush1.bf16.msra.mxu1 %v8719_v31 }
 0x3d9   :  { %6239 = vmatprep.subr.bf16.mxu0 %v8724_v32  ;;  %6321 = vmatprep.subr.bf16.mxu1 %v8727_v33  ;;  %v11081_v32 = vld [vmem:[%s12243_s7] sm:$0xf] }
 0x3da   :  { %v3453_v33 = vrot.slane %v11081_v32, %v10826_v14 }
 0x3dc   :  { %6240 = vmatpush1.bf16.msra.mxu0 %v8722_v34  ;;  %6322 = vmatpush1.bf16.msra.mxu1 %v8725_v35  ;;  %v3457_v34 = vrot.slane %v11081_v32, %v10835_v17  ;;  %v3465_v35 = vrot.slane %v11081_v32, %v10838_v18 }
 0x3dd   :  { %6241 = vmatprep.subr.bf16.mxu0 %v8730_v37  ;;  %6323 = vmatprep.subr.bf16.mxu1 %v8733_v38 }
 0x3e0   :  { %6242 = vmatpush1.bf16.msra.mxu0 %v8728_v39  ;;  %6324 = vmatpush1.bf16.msra.mxu1 %v8731_v40 }
 0x3e1   :  { %6243 = vmatprep.subr.bf16.mxu0 %v8736_v41  ;;  %6325 = vmatprep.subr.bf16.mxu1 %v8739_v42 }
 0x3e4   :  { %6244 = vmatpush1.bf16.msra.mxu0 %v8734_v43  ;;  %6326 = vmatpush1.bf16.msra.mxu1 %v8737_v44 }
 0x3e5   :  { %6245 = vmatprep.subr.bf16.mxu0 %v8742_v45  ;;  %6327 = vmatprep.subr.bf16.mxu1 %v8745_v46 }
 0x3e8   :  { %6246 = vmatpush1.bf16.msra.mxu0 %v8740_v47  ;;  %6328 = vmatpush1.bf16.msra.mxu1 %v8743_v48 }
 0x3e9   :  { %6247 = vmatprep.subr.bf16.mxu0 %v8748_v49  ;;  %6329 = vmatprep.subr.bf16.mxu1 %v8751_v50 }
 0x3ec   :  { %6248 = vmatpush1.bf16.msra.mxu0 %v8746_v51  ;;  %6330 = vmatpush1.bf16.msra.mxu1 %v8749_v52  ;;  %v8800_v51 = vld [vmem:[%s12244_s8 + $0x680] ss:$52 sps:$4 sm:$0xff]   ;;  %v8803_v52 = vld [vmem:[%s12244_s8 + $0x688] ss:$52 sps:$4 sm:$0xff]  }
 0x3ed   :  { %6249 = vmatprep.subr.bf16.mxu0 %v8754_v53  ;;  %6331 = vmatprep.subr.bf16.mxu1 %v8757_v54  ;;  %v8808_v54 = vld [vmem:[%s12244_s8 + $0x6ec] ss:$52 sps:$4 sm:$0xff]  }
 0x3f0   :  { %6250 = vmatpush1.bf16.msra.mxu0 %v8752_v55  ;;  %6332 = vmatpush1.bf16.msra.mxu1 %v8755_v36  ;;  %v8811_v55 = vld [vmem:[%s12244_s8 + $0x6f4] ss:$52 sps:$4 sm:$0xff]  }
 0x3f1   :  { %6251 = vmatprep.subr.bf16.mxu0 %v8760_v56  ;;  %6333 = vmatprep.subr.bf16.mxu1 %v8763_v57  ;;  %v8806_v56 = vld [vmem:[%s12244_s8 + $0x6e8] ss:$52 sps:$4 sm:$0xff]   ;;  %v8809_v57 = vld [vmem:[%s12244_s8 + $0x6f0] ss:$52 sps:$4 sm:$0xff]  }
 0x3f4   :  { %6252 = vmatpush1.bf16.msra.mxu0 %v8758_v58  ;;  %6334 = vmatpush1.bf16.msra.mxu1 %v8761_v59  ;;  %v8814_v58 = vld [vmem:[%s12244_s8 + $0x754] ss:$52 sps:$4 sm:$0xff]   ;;  %v8817_v59 = vld [vmem:[%s12244_s8 + $0x75c] ss:$52 sps:$4 sm:$0xff]  }
 0x3f5   :  { %6253 = vmatprep.subr.bf16.mxu0 %v8766_v60  ;;  %6335 = vmatprep.subr.bf16.mxu1 %v8769_v61  ;;  %v8812_v60 = vld [vmem:[%s12244_s8 + $0x750] ss:$52 sps:$4 sm:$0xff]   ;;  %v8815_v61 = vld [vmem:[%s12244_s8 + $0x758] ss:$52 sps:$4 sm:$0xff]  }
 0x3f8   :  { %6254 = vmatpush1.bf16.msra.mxu0 %v8764_v62  ;;  %6336 = vmatpush1.bf16.msra.mxu1 %v8767_v63  ;;  %v8820_v62 = vld [vmem:[%s12244_s8 + $0x7bc] ss:$52 sps:$4 sm:$0xff]   ;;  %v8823_v63 = vld [vmem:[%s12244_s8 + $0x7c4] ss:$52 sps:$4 sm:$0xff]  }
 0x3f9   :  { %6255 = vmatprep.subr.bf16.mxu0 %v8772_v0  ;;  %6337 = vmatprep.subr.bf16.mxu1 %v8775_v1  ;;  %v8818_v0 = vld [vmem:[%s12244_s8 + $0x7b8] ss:$52 sps:$4 sm:$0xff]   ;;  %v8821_v1 = vld [vmem:[%s12244_s8 + $0x7c0] ss:$52 sps:$4 sm:$0xff]  }
 0x3fc   :  { %6256 = vmatpush1.bf16.msra.mxu0 %v8770_v2  ;;  %6338 = vmatpush1.bf16.msra.mxu1 %v8773_v3  ;;  %v8826_v2 = vld [vmem:[%s12244_s8 + $0x824] ss:$52 sps:$4 sm:$0xff]   ;;  %v8829_v3 = vld [vmem:[%s12244_s8 + $0x82c] ss:$52 sps:$4 sm:$0xff]  }
 0x3fd   :  { %6257 = vmatprep.subr.bf16.mxu0 %v8778_v4  ;;  %6339 = vmatprep.subr.bf16.mxu1 %v8781_v5  ;;  %v8824_v4 = vld [vmem:[%s12244_s8 + $0x820] ss:$52 sps:$4 sm:$0xff]   ;;  %v8827_v5 = vld [vmem:[%s12244_s8 + $0x828] ss:$52 sps:$4 sm:$0xff]  }
 0x400   :  { %6258 = vmatpush1.bf16.msra.mxu0 %v8776_v6  ;;  %6340 = vmatpush1.bf16.msra.mxu1 %v8779_v7  ;;  %v8832_v6 = vld [vmem:[%s12244_s8 + $0x88c] ss:$52 sps:$4 sm:$0xff]   ;;  %v8835_v7 = vld [vmem:[%s12244_s8 + $0x894] ss:$52 sps:$4 sm:$0xff]  }
 0x401   :  { %6259 = vmatprep.subr.bf16.mxu0 %v8784_v8  ;;  %6341 = vmatprep.subr.bf16.mxu1 %v8787_v9  ;;  %v8830_v8 = vld [vmem:[%s12244_s8 + $0x888] ss:$52 sps:$4 sm:$0xff]   ;;  %v8833_v9 = vld [vmem:[%s12244_s8 + $0x890] ss:$52 sps:$4 sm:$0xff]  }
 0x404   :  { %6260 = vmatpush1.bf16.msra.mxu0 %v8782_v10  ;;  %6342 = vmatpush1.bf16.msra.mxu1 %v8785_v11  ;;  %v8838_v10 = vld [vmem:[%s12244_s8 + $0x8f4] ss:$52 sps:$4 sm:$0xff]   ;;  %v8841_v11 = vld [vmem:[%s12244_s8 + $0x8fc] ss:$52 sps:$4 sm:$0xff]  }
 0x405   :  { %6261 = vmatprep.subr.bf16.mxu0 %v8790_v12  ;;  %6343 = vmatprep.subr.bf16.mxu1 %v8793_v16  ;;  %v8836_v12 = vld [vmem:[%s12244_s8 + $0x8f0] ss:$52 sps:$4 sm:$0xff]   ;;  %v8839_v16 = vld [vmem:[%s12244_s8 + $0x8f8] ss:$52 sps:$4 sm:$0xff]  }
 0x408   :  { %6262 = vmatpush1.bf16.msra.mxu0 %v8788_v19  ;;  %6344 = vmatpush1.bf16.msra.mxu1 %v8791_v20  ;;  %v8844_v19 = vld [vmem:[%s12244_s8 + $0x95c] ss:$52 sps:$4 sm:$0xff]   ;;  %v8847_v20 = vld [vmem:[%s12244_s8 + $0x964] ss:$52 sps:$4 sm:$0xff]  }
 0x409   :  { %6263 = vmatprep.subr.bf16.mxu0 %v8796_v21  ;;  %6345 = vmatprep.subr.bf16.mxu1 %v8799_v22  ;;  %v8842_v21 = vld [vmem:[%s12244_s8 + $0x958] ss:$52 sps:$4 sm:$0xff]   ;;  %v8845_v22 = vld [vmem:[%s12244_s8 + $0x960] ss:$52 sps:$4 sm:$0xff]  }
 0x40c   :  { %6264 = vmatpush1.bf16.msra.mxu0 %v8794_v24  ;;  %6346 = vmatpush1.bf16.msra.mxu1 %v8797_v25  ;;  %v8850_v24 = vld [vmem:[%s12244_s8 + $0x9c4] ss:$52 sps:$4 sm:$0xff]   ;;  %v8853_v25 = vld [vmem:[%s12244_s8 + $0x9cc] ss:$52 sps:$4 sm:$0xff]  }
 0x40d   :  { %6274 = vmatprep.subr.bf16.mxu0 %v8802_v26  ;;  %6356 = vmatprep.subr.bf16.mxu1 %v8805_v27  ;;  %v8848_v26 = vld [vmem:[%s12244_s8 + $0x9c0] ss:$52 sps:$4 sm:$0xff]   ;;  %v8851_v27 = vld [vmem:[%s12244_s8 + $0x9c8] ss:$52 sps:$4 sm:$0xff]  }
 0x436   :  { %v6954_v30 = vpop.permute.xlu1 %6953 }
 0x437   :  { %v6959_v31 = vsel %vm6958_vm2, %v6957_v29, %v6954_v30  ;;  %v8859_v29 = vld [vmem:[%s12244_s8 + $0xa34] ss:$52 sps:$4 sm:$0xff]  }
 0x438   :  { %6960 = vst [vmem:[#allocation4] sm:$0xff] %v6959_v31  ;;  %v8854_v30 = vld [vmem:[%s12244_s8 + $0xa28] ss:$52 sps:$4 sm:$0xff]   ;;  %v8857_v31 = vld [vmem:[%s12244_s8 + $0xa30] ss:$52 sps:$4 sm:$0xff]  }
 0x4a2   :  { %v3548_v37 = vpop.f32.mrb[8].mxu0  ;;  %v11089_v38 = vpop.f32.mrb[8].mxu1 }
 0x4a3   :  { %v3549_v23 = vadd.f32 %v3548_v37, %v3453_v33  ;;  %v3550_v39 = vpop.f32.mrb[9].mxu0  ;;  %v3591_v40 = vpop.f32.mrb[9].mxu1  ;;  %v8862_v33 = vld [vmem:[%s12244_s8 + $0xa94] ss:$52 sps:$4 sm:$0xff]   ;;  %v8863_v37 = vld [vmem:[%s12244_s8 + $0xa98] ss:$52 sps:$4 sm:$0xff]  }
 0x4a4   :  { %v3551_v41 = vadd.f32 %v3550_v39, %v3457_v34  ;;  %v3592_v42 = vadd.f32 %v3591_v40, %v3465_v35  ;;  %v3552_v43 = vpop.f32.mrb[10].mxu0  ;;  %v3593_v44 = vpop.f32.mrb[10].mxu1  ;;  %v8865_v34 = vld [vmem:[%s12244_s8 + $0xa9c] ss:$52 sps:$4 sm:$0xff]   ;;  %v8871_v39 = vld [vmem:[%s12244_s8 + $0xb04] ss:$52 sps:$4 sm:$0xff]  }
 0x4a5   :  { %v3596_v45 = vmax.f32 %v3549_v23, 0.0  ;;  %v3553_v46 = vpop.f32.mrb[11].mxu0  ;;  %v3594_v47 = vpop.f32.mrb[11].mxu1  ;;  %v8860_v35 = vld [vmem:[%s12244_s8 + $0xa90] ss:$52 sps:$4 sm:$0xff]  }
 0x4a6   :  { %v3597_v48 = vmax.f32 %v3551_v41, 0.0  ;;  %v3599_v49 = vmax.f32 %v3592_v42, 0.0  ;;  %v8868_v23 = vld [vmem:[%s12244_s8 + $0xafc] ss:$52 sps:$4 sm:$0xff]   ;;  %v8866_v40 = vld [vmem:[%s12244_s8 + $0xaf8] ss:$52 sps:$4 sm:$0xff]  }
 0x4a7   :  { %v11099_v53 = vpack.c.bf16 %v3596_v45, %v3596_v45  ;;  %v8869_v41 = vld [vmem:[%s12244_s8 + $0xb00] ss:$52 sps:$4 sm:$0xff]   ;;  %v8874_v42 = vld [vmem:[%s12244_s8 + $0xb64] ss:$52 sps:$4 sm:$0xff]   ;;  %v8875_v45 = vld [vmem:[%s12244_s8 + $0xb68] ss:$52 sps:$4 sm:$0xff]  }
 0x4a8   :  { %v11091_v50 = vpack.c.bf16 %v3597_v48, %v3597_v48  ;;  %v11109_v36 = vpack.c.bf16 %v3599_v49, %v3599_v49  ;;  %v8877_v43 = vld [vmem:[%s12244_s8 + $0xb6c] ss:$52 sps:$4 sm:$0xff]   ;;  %v8883_v47 = vld [vmem:[%s12244_s8 + $0xbd4] ss:$52 sps:$4 sm:$0xff]   ;;  %v8881_v49 = vld [vmem:[%s12244_s8 + $0xbd0] ss:$52 sps:$4 sm:$0xff]  }
 0x4a9   :  { %v8872_v44 = vld [vmem:[%s12244_s8 + $0xb60] ss:$52 sps:$4 sm:$0xff]   ;;  %v8878_v48 = vld [vmem:[%s12244_s8 + $0xbc8] ss:$52 sps:$4 sm:$0xff]  }
 0x4aa   :  { %6265 = vmatprep.mubr.bf16.mxu0 %v11091_v50  ;;  %6347 = vmatprep.mubr.bf16.mxu1 %v11091_v50  ;;  %v8880_v46 = vld [vmem:[%s12244_s8 + $0xbcc] ss:$52 sps:$4 sm:$0xff]  }
 0x4ab   :  { %6266 = vmatmul.mubr.bf16.vlgmr.msra.gmra.mrb[12].mxu0 %v11099_v53  ;;  %6348 = vmatmul.mubr.bf16.vlgmr.msra.gmra.mrb[12].mxu1 %v11099_v53 }
 0x4ac   :  { %6275 = vmatpush1.bf16.msra.mxu0 %v8800_v51  ;;  %6357 = vmatpush1.bf16.msra.mxu1 %v8803_v52  ;;  %v3461_v51 = vrot.slane %v11081_v32, %v10829_v15  ;;  %v8886_v52 = vld [vmem:[%s12244_s8 + $0xc34] ss:$52 sps:$4 sm:$0xff]   ;;  %v8887_v32 = vld [vmem:[%s12244_s8 + $0xc38] ss:$52 sps:$4 sm:$0xff]  }
 0x4ad   :  { %6306 = vmatprep.mubr.bf16.mxu0 %v11109_v36  ;;  %6388 = vmatprep.mubr.bf16.mxu1 %v11109_v36 }
 0x4ae   :  { %6276 = vmatprep.subr.bf16.mxu0 %v8808_v54  ;;  %6358 = vmatprep.subr.bf16.mxu1 %v8811_v55  ;;  %v8889_v54 = vld [vmem:[%s12244_s8 + $0xc3c] ss:$52 sps:$4 sm:$0xff]  }
 0x4af   :  { %v8884_v55 = vld [vmem:[%s12244_s8 + $0xc30] ss:$52 sps:$4 sm:$0xff]  }
 0x4b0   :  { %6277 = vmatpush1.bf16.msra.mxu0 %v8806_v56  ;;  %6359 = vmatpush1.bf16.msra.mxu1 %v8809_v57  ;;  %v3590_v56 = vadd.f32 %v11089_v38, %v3461_v51  ;;  %v8892_v57 = vld [vmem:[%s12244_s8 + $0xc9c] ss:$52 sps:$4 sm:$0xff]   ;;  %v8893_v38 = vld [vmem:[%s12244_s8 + $0xca0] ss:$52 sps:$4 sm:$0xff]  }
 0x4b1   :  { %6278 = vmatprep.subr.bf16.mxu0 %v8814_v58  ;;  %6360 = vmatprep.subr.bf16.mxu1 %v8817_v59  ;;  %v8895_v58 = vld [vmem:[%s12244_s8 + $0xca4] ss:$52 sps:$4 sm:$0xff]   ;;  %v8964_v51 = vld [vmem:[%s12244_s8 + $0x48c] ss:$52 sps:$4 sm:$0xff]  }
 0x4b2   :  { %v8890_v59 = vld [vmem:[%s12244_s8 + $0xc98] ss:$52 sps:$4 sm:$0xff]  }
 0x4b4   :  { %6279 = vmatpush1.bf16.msra.mxu0 %v8812_v60  ;;  %6361 = vmatpush1.bf16.msra.mxu1 %v8815_v61  ;;  %v3598_v60 = vmax.f32 %v3590_v56, 0.0  ;;  %v8898_v61 = vld [vmem:[%s12244_s8 + $0x14] ss:$52 sps:$4 sm:$0xff]   ;;  %v8973_v56 = vld [vmem:[%s12244_s8 + $0x4fc] ss:$52 sps:$4 sm:$0xff]  }
 0x4b5   :  { %6280 = vmatprep.subr.bf16.mxu0 %v8820_v62  ;;  %6362 = vmatprep.subr.bf16.mxu1 %v8823_v63  ;;  %v8901_v62 = vld [vmem:[%s12244_s8 + $0x1c] ss:$52 sps:$4 sm:$0xff]  }
 0x4b6   :  { %v8896_v63 = vld [vmem:[%s12244_s8 + $0x10] ss:$52 sps:$4 sm:$0xff]  }
 0x4b8   :  { %6281 = vmatpush1.bf16.msra.mxu0 %v8818_v0  ;;  %6363 = vmatpush1.bf16.msra.mxu1 %v8821_v1  ;;  %v11301_v0 = vpack.c.bf16 %v3598_v60, %v3598_v60  ;;  %v8899_v1 = vld [vmem:[%s12244_s8 + $0x18] ss:$52 sps:$4 sm:$0xff]  }
 0x4b9   :  { %6282 = vmatprep.subr.bf16.mxu0 %v8826_v2  ;;  %6364 = vmatprep.subr.bf16.mxu1 %v8829_v3  ;;  %v8904_v2 = vld [vmem:[%s12244_s8 + $0x7c] ss:$52 sps:$4 sm:$0xff]   ;;  %v8907_v3 = vld [vmem:[%s12244_s8 + $0x84] ss:$52 sps:$4 sm:$0xff]  }
 0x4ba   :  { %v8974_v60 = vld [vmem:[%s12244_s8 + $0x558] ss:$52 sps:$4 sm:$0xff]  }
 0x4bc   :  { %6283 = vmatpush1.bf16.msra.mxu0 %v8824_v4  ;;  %6365 = vmatpush1.bf16.msra.mxu1 %v8827_v5  ;;  %v8902_v4 = vld [vmem:[%s12244_s8 + $0x78] ss:$52 sps:$4 sm:$0xff]   ;;  %v8905_v5 = vld [vmem:[%s12244_s8 + $0x80] ss:$52 sps:$4 sm:$0xff]  }
 0x4bd   :  { %6284 = vmatprep.subr.bf16.mxu0 %v8832_v6  ;;  %6366 = vmatprep.subr.bf16.mxu1 %v8835_v7  ;;  %v8910_v6 = vld [vmem:[%s12244_s8 + $0xe4] ss:$52 sps:$4 sm:$0xff]   ;;  %v8913_v7 = vld [vmem:[%s12244_s8 + $0xec] ss:$52 sps:$4 sm:$0xff]  }
 0x4c0   :  { %6285 = vmatpush1.bf16.msra.mxu0 %v8830_v8  ;;  %6367 = vmatpush1.bf16.msra.mxu1 %v8833_v9  ;;  %v8908_v8 = vld [vmem:[%s12244_s8 + $0xe0] ss:$52 sps:$4 sm:$0xff]   ;;  %v8911_v9 = vld [vmem:[%s12244_s8 + $0xe8] ss:$52 sps:$4 sm:$0xff]  }
 0x4c1   :  { %6286 = vmatprep.subr.bf16.mxu0 %v8838_v10  ;;  %6368 = vmatprep.subr.bf16.mxu1 %v8841_v11  ;;  %v8916_v10 = vld [vmem:[%s12244_s8 + $0x14c] ss:$52 sps:$4 sm:$0xff]   ;;  %v8919_v11 = vld [vmem:[%s12244_s8 + $0x154] ss:$52 sps:$4 sm:$0xff]  }
 0x4c4   :  { %6287 = vmatpush1.bf16.msra.mxu0 %v8836_v12  ;;  %6369 = vmatpush1.bf16.msra.mxu1 %v8839_v16  ;;  %v8914_v12 = vld [vmem:[%s12244_s8 + $0x148] ss:$52 sps:$4 sm:$0xff]   ;;  %v8917_v16 = vld [vmem:[%s12244_s8 + $0x150] ss:$52 sps:$4 sm:$0xff]  }
 0x4c5   :  { %6288 = vmatprep.subr.bf16.mxu0 %v8844_v19  ;;  %6370 = vmatprep.subr.bf16.mxu1 %v8847_v20  ;;  %v8922_v19 = vld [vmem:[%s12244_s8 + $0x1b4] ss:$52 sps:$4 sm:$0xff]   ;;  %v8925_v20 = vld [vmem:[%s12244_s8 + $0x1bc] ss:$52 sps:$4 sm:$0xff]  }
 0x4c8   :  { %6289 = vmatpush1.bf16.msra.mxu0 %v8842_v21  ;;  %6371 = vmatpush1.bf16.msra.mxu1 %v8845_v22  ;;  %v8920_v21 = vld [vmem:[%s12244_s8 + $0x1b0] ss:$52 sps:$4 sm:$0xff]   ;;  %v8923_v22 = vld [vmem:[%s12244_s8 + $0x1b8] ss:$52 sps:$4 sm:$0xff]  }
 0x4c9   :  { %6290 = vmatprep.subr.bf16.mxu0 %v8850_v24  ;;  %6372 = vmatprep.subr.bf16.mxu1 %v8853_v25  ;;  %v8928_v24 = vld [vmem:[%s12244_s8 + $0x21c] ss:$52 sps:$4 sm:$0xff]   ;;  %v8931_v25 = vld [vmem:[%s12244_s8 + $0x224] ss:$52 sps:$4 sm:$0xff]  }
 0x4cc   :  { %6291 = vmatpush1.bf16.msra.mxu0 %v8848_v26  ;;  %6373 = vmatpush1.bf16.msra.mxu1 %v8851_v27  ;;  %v8926_v26 = vld [vmem:[%s12244_s8 + $0x218] ss:$52 sps:$4 sm:$0xff]   ;;  %v8929_v27 = vld [vmem:[%s12244_s8 + $0x220] ss:$52 sps:$4 sm:$0xff]  }
 0x4cd   :  { %6292 = vmatprep.subr.bf16.mxu0 %v8856_v28  ;;  %6374 = vmatprep.subr.bf16.mxu1 %v8859_v29  ;;  %v8934_v28 = vld [vmem:[%s12244_s8 + $0x284] ss:$52 sps:$4 sm:$0xff]   ;;  %v8937_v29 = vld [vmem:[%s12244_s8 + $0x28c] ss:$52 sps:$4 sm:$0xff]  }
 0x4d0   :  { %6293 = vmatpush1.bf16.msra.mxu0 %v8854_v30  ;;  %6375 = vmatpush1.bf16.msra.mxu1 %v8857_v31  ;;  %v8932_v30 = vld [vmem:[%s12244_s8 + $0x280] ss:$52 sps:$4 sm:$0xff]   ;;  %v8935_v31 = vld [vmem:[%s12244_s8 + $0x288] ss:$52 sps:$4 sm:$0xff]  }
 0x4d1   :  { %6294 = vmatprep.subr.bf16.mxu0 %v8862_v33  ;;  %6376 = vmatprep.subr.bf16.mxu1 %v8865_v34  ;;  %v8940_v33 = vld [vmem:[%s12244_s8 + $0x2ec] ss:$52 sps:$4 sm:$0xff]   ;;  %v8943_v34 = vld [vmem:[%s12244_s8 + $0x2f4] ss:$52 sps:$4 sm:$0xff]  }
 0x4d4   :  { %6295 = vmatpush1.bf16.msra.mxu0 %v8860_v35  ;;  %6377 = vmatpush1.bf16.msra.mxu1 %v8863_v37  ;;  %v8938_v35 = vld [vmem:[%s12244_s8 + $0x2e8] ss:$52 sps:$4 sm:$0xff]   ;;  %v8941_v37 = vld [vmem:[%s12244_s8 + $0x2f0] ss:$52 sps:$4 sm:$0xff]  }
 0x4d5   :  { %6296 = vmatprep.subr.bf16.mxu0 %v8868_v23  ;;  %6378 = vmatprep.subr.bf16.mxu1 %v8871_v39  ;;  %v8946_v23 = vld [vmem:[%s12244_s8 + $0x354] ss:$52 sps:$4 sm:$0xff]   ;;  %v8949_v39 = vld [vmem:[%s12244_s8 + $0x35c] ss:$52 sps:$4 sm:$0xff]  }
 0x4d8   :  { %6297 = vmatpush1.bf16.msra.mxu0 %v8866_v40  ;;  %6379 = vmatpush1.bf16.msra.mxu1 %v8869_v41  ;;  %v8944_v40 = vld [vmem:[%s12244_s8 + $0x350] ss:$52 sps:$4 sm:$0xff]   ;;  %v8947_v41 = vld [vmem:[%s12244_s8 + $0x358] ss:$52 sps:$4 sm:$0xff]  }
 0x4d9   :  { %6298 = vmatprep.subr.bf16.mxu0 %v8874_v42  ;;  %6380 = vmatprep.subr.bf16.mxu1 %v8877_v43  ;;  %v8952_v42 = vld [vmem:[%s12244_s8 + $0x3bc] ss:$52 sps:$4 sm:$0xff]   ;;  %v8955_v43 = vld [vmem:[%s12244_s8 + $0x3c4] ss:$52 sps:$4 sm:$0xff]  }
 0x4dc   :  { %6299 = vmatpush1.bf16.msra.mxu0 %v8872_v44  ;;  %6381 = vmatpush1.bf16.msra.mxu1 %v8875_v45  ;;  %v8950_v44 = vld [vmem:[%s12244_s8 + $0x3b8] ss:$52 sps:$4 sm:$0xff]   ;;  %v8953_v45 = vld [vmem:[%s12244_s8 + $0x3c0] ss:$52 sps:$4 sm:$0xff]  }
 0x4dd   :  { %6300 = vmatprep.subr.bf16.mxu0 %v8880_v46  ;;  %6382 = vmatprep.subr.bf16.mxu1 %v8883_v47  ;;  %v8958_v46 = vld [vmem:[%s12244_s8 + $0x424] ss:$52 sps:$4 sm:$0xff]   ;;  %v8961_v47 = vld [vmem:[%s12244_s8 + $0x42c] ss:$52 sps:$4 sm:$0xff]  }
 0x4e0   :  { %6301 = vmatpush1.bf16.msra.mxu0 %v8878_v48  ;;  %6383 = vmatpush1.bf16.msra.mxu1 %v8881_v49  ;;  %v8956_v48 = vld [vmem:[%s12244_s8 + $0x420] ss:$52 sps:$4 sm:$0xff]   ;;  %v8959_v49 = vld [vmem:[%s12244_s8 + $0x428] ss:$52 sps:$4 sm:$0xff]  }
 0x4e1   :  { %6302 = vmatprep.subr.bf16.mxu0 %v8886_v52  ;;  %6384 = vmatprep.subr.bf16.mxu1 %v8889_v54  ;;  %v8967_v52 = vld [vmem:[%s12244_s8 + $0x494] ss:$52 sps:$4 sm:$0xff]  }
 0x4e2   :  { %v8962_v54 = vld [vmem:[%s12244_s8 + $0x488] ss:$52 sps:$4 sm:$0xff]  }
 0x4e4   :  { %6303 = vmatpush1.bf16.msra.mxu0 %v8884_v55  ;;  %6385 = vmatpush1.bf16.msra.mxu1 %v8887_v32  ;;  %v8965_v55 = vld [vmem:[%s12244_s8 + $0x490] ss:$52 sps:$4 sm:$0xff]   ;;  %v8970_v32 = vld [vmem:[%s12244_s8 + $0x4f4] ss:$52 sps:$4 sm:$0xff]  }
 0x4e5   :  { %6304 = vmatprep.subr.bf16.mxu0 %v8892_v57  ;;  %6386 = vmatprep.subr.bf16.mxu1 %v8895_v58  ;;  %v8968_v57 = vld [vmem:[%s12244_s8 + $0x4f0] ss:$52 sps:$4 sm:$0xff]   ;;  %v8971_v58 = vld [vmem:[%s12244_s8 + $0x4f8] ss:$52 sps:$4 sm:$0xff]  }
 0x4e8   :  { %6305 = vmatpush1.bf16.msra.mxu0 %v8890_v59  ;;  %6387 = vmatpush1.bf16.msra.mxu1 %v8893_v38  ;;  %v8976_v59 = vld [vmem:[%s12244_s8 + $0x55c] ss:$52 sps:$4 sm:$0xff]   ;;  %v8979_v38 = vld [vmem:[%s12244_s8 + $0x564] ss:$52 sps:$4 sm:$0xff]  }
 0x4e9   :  { %6397 = vmatprep.subr.bf16.mxu0 %v8898_v61  ;;  %6479 = vmatprep.subr.bf16.mxu1 %v8901_v62  ;;  %v8977_v61 = vld [vmem:[%s12244_s8 + $0x560] ss:$52 sps:$4 sm:$0xff]   ;;  %v8982_v62 = vld [vmem:[%s12244_s8 + $0x5c4] ss:$52 sps:$4 sm:$0xff]  }
 0x4eb   :  { %6307 = vmatmul.mubr.bf16.vlgmr.msra.gmra.mrb[12].mxu0 %v11301_v0  ;;  %6389 = vmatmul.mubr.bf16.vlgmr.msra.gmra.mrb[12].mxu1 %v11301_v0 }
 0x4ec   :  { %6398 = vmatpush1.bf16.msra.mxu0 %v8896_v63  ;;  %6429 = vmatprep.mubr.bf16.mxu0 %v11091_v50  ;;  %v8985_v63 = vld [vmem:[%s12244_s8 + $0x5cc] ss:$52 sps:$4 sm:$0xff]  }
 0x4ed   :  { %6480 = vmatpush1.bf16.msra.mxu1 %v8899_v1  ;;  %6511 = vmatprep.mubr.bf16.mxu1 %v11091_v50  ;;  %v8980_v1 = vld [vmem:[%s12244_s8 + $0x5c0] ss:$52 sps:$4 sm:$0xff]  }
 0x4ee   :  { %6399 = vmatprep.subr.bf16.mxu0 %v8904_v2  ;;  %6481 = vmatprep.subr.bf16.mxu1 %v8907_v3  ;;  %v8983_v2 = vld [vmem:[%s12244_s8 + $0x5c8] ss:$52 sps:$4 sm:$0xff]   ;;  %v8988_v3 = vld [vmem:[%s12244_s8 + $0x62c] ss:$52 sps:$4 sm:$0xff]  }
 0x4f0   :  { %6400 = vmatpush1.bf16.msra.mxu0 %v8902_v4  ;;  %v8991_v4 = vld [vmem:[%s12244_s8 + $0x634] ss:$52 sps:$4 sm:$0xff]  }
 0x4f1   :  { %6482 = vmatpush1.bf16.msra.mxu1 %v8905_v5  ;;  %6401 = vmatprep.subr.bf16.mxu0 %v8910_v6  ;;  %v8986_v5 = vld [vmem:[%s12244_s8 + $0x628] ss:$52 sps:$4 sm:$0xff]   ;;  %v8989_v6 = vld [vmem:[%s12244_s8 + $0x630] ss:$52 sps:$4 sm:$0xff]  }
 0x4f2   :  { %6483 = vmatprep.subr.bf16.mxu1 %v8913_v7  ;;  %v8994_v7 = vld [vmem:[%s12244_s8 + $0x694] ss:$52 sps:$4 sm:$0xff]  }
 0x4f4   :  { %6402 = vmatpush1.bf16.msra.mxu0 %v8908_v8  ;;  %v8997_v8 = vld [vmem:[%s12244_s8 + $0x69c] ss:$52 sps:$4 sm:$0xff]  }
 0x4f5   :  { %6484 = vmatpush1.bf16.msra.mxu1 %v8911_v9  ;;  %6403 = vmatprep.subr.bf16.mxu0 %v8916_v10  ;;  %v8992_v9 = vld [vmem:[%s12244_s8 + $0x690] ss:$52 sps:$4 sm:$0xff]   ;;  %v8995_v10 = vld [vmem:[%s12244_s8 + $0x698] ss:$52 sps:$4 sm:$0xff]  }
 0x4f6   :  { %6485 = vmatprep.subr.bf16.mxu1 %v8919_v11  ;;  %v9000_v11 = vld [vmem:[%s12244_s8 + $0x6fc] ss:$52 sps:$4 sm:$0xff]  }
 0x4f8   :  { %6404 = vmatpush1.bf16.msra.mxu0 %v8914_v12  ;;  %v9003_v12 = vld [vmem:[%s12244_s8 + $0x704] ss:$52 sps:$4 sm:$0xff]  }
 0x4f9   :  { %6486 = vmatpush1.bf16.msra.mxu1 %v8917_v16  ;;  %6405 = vmatprep.subr.bf16.mxu0 %v8922_v19  ;;  %v8998_v16 = vld [vmem:[%s12244_s8 + $0x6f8] ss:$52 sps:$4 sm:$0xff]   ;;  %v9001_v19 = vld [vmem:[%s12244_s8 + $0x700] ss:$52 sps:$4 sm:$0xff]  }
 0x4fa   :  { %6487 = vmatprep.subr.bf16.mxu1 %v8925_v20  ;;  %v9006_v20 = vld [vmem:[%s12244_s8 + $0x764] ss:$52 sps:$4 sm:$0xff]  }
 0x4fc   :  { %6406 = vmatpush1.bf16.msra.mxu0 %v8920_v21  ;;  %v9009_v21 = vld [vmem:[%s12244_s8 + $0x76c] ss:$52 sps:$4 sm:$0xff]  }
 0x4fd   :  { %6488 = vmatpush1.bf16.msra.mxu1 %v8923_v22  ;;  %6407 = vmatprep.subr.bf16.mxu0 %v8928_v24  ;;  %v9004_v22 = vld [vmem:[%s12244_s8 + $0x760] ss:$52 sps:$4 sm:$0xff]   ;;  %v9007_v24 = vld [vmem:[%s12244_s8 + $0x768] ss:$52 sps:$4 sm:$0xff]  }
 0x4fe   :  { %6489 = vmatprep.subr.bf16.mxu1 %v8931_v25  ;;  %v9012_v25 = vld [vmem:[%s12244_s8 + $0x7cc] ss:$52 sps:$4 sm:$0xff]  }
 0x500   :  { %6408 = vmatpush1.bf16.msra.mxu0 %v8926_v26  ;;  %v9015_v26 = vld [vmem:[%s12244_s8 + $0x7d4] ss:$52 sps:$4 sm:$0xff]  }
 0x501   :  { %6490 = vmatpush1.bf16.msra.mxu1 %v8929_v27  ;;  %6409 = vmatprep.subr.bf16.mxu0 %v8934_v28  ;;  %v9010_v27 = vld [vmem:[%s12244_s8 + $0x7c8] ss:$52 sps:$4 sm:$0xff]   ;;  %v9013_v28 = vld [vmem:[%s12244_s8 + $0x7d0] ss:$52 sps:$4 sm:$0xff]  }
 0x502   :  { %6491 = vmatprep.subr.bf16.mxu1 %v8937_v29  ;;  %v9018_v29 = vld [vmem:[%s12244_s8 + $0x834] ss:$52 sps:$4 sm:$0xff]  }
 0x504   :  { %6410 = vmatpush1.bf16.msra.mxu0 %v8932_v30  ;;  %v9021_v30 = vld [vmem:[%s12244_s8 + $0x83c] ss:$52 sps:$4 sm:$0xff]  }
 0x505   :  { %6492 = vmatpush1.bf16.msra.mxu1 %v8935_v31  ;;  %6411 = vmatprep.subr.bf16.mxu0 %v8940_v33  ;;  %v9016_v31 = vld [vmem:[%s12244_s8 + $0x830] ss:$52 sps:$4 sm:$0xff]   ;;  %v9019_v33 = vld [vmem:[%s12244_s8 + $0x838] ss:$52 sps:$4 sm:$0xff]  }
 0x506   :  { %6493 = vmatprep.subr.bf16.mxu1 %v8943_v34  ;;  %v9024_v34 = vld [vmem:[%s12244_s8 + $0x89c] ss:$52 sps:$4 sm:$0xff]  }
 0x508   :  { %6412 = vmatpush1.bf16.msra.mxu0 %v8938_v35  ;;  %v9027_v35 = vld [vmem:[%s12244_s8 + $0x8a4] ss:$52 sps:$4 sm:$0xff]  }
 0x509   :  { %6494 = vmatpush1.bf16.msra.mxu1 %v8941_v37  ;;  %6413 = vmatprep.subr.bf16.mxu0 %v8946_v23  ;;  %v9022_v37 = vld [vmem:[%s12244_s8 + $0x898] ss:$52 sps:$4 sm:$0xff]   ;;  %v9025_v23 = vld [vmem:[%s12244_s8 + $0x8a0] ss:$52 sps:$4 sm:$0xff]  }
 0x50a   :  { %6495 = vmatprep.subr.bf16.mxu1 %v8949_v39  ;;  %v9030_v39 = vld [vmem:[%s12244_s8 + $0x904] ss:$52 sps:$4 sm:$0xff]  }
 0x50c   :  { %6414 = vmatpush1.bf16.msra.mxu0 %v8944_v40  ;;  %v9033_v40 = vld [vmem:[%s12244_s8 + $0x90c] ss:$52 sps:$4 sm:$0xff]  }
 0x50d   :  { %6496 = vmatpush1.bf16.msra.mxu1 %v8947_v41  ;;  %6415 = vmatprep.subr.bf16.mxu0 %v8952_v42  ;;  %v9028_v41 = vld [vmem:[%s12244_s8 + $0x900] ss:$52 sps:$4 sm:$0xff]   ;;  %v9031_v42 = vld [vmem:[%s12244_s8 + $0x908] ss:$52 sps:$4 sm:$0xff]  }
 0x50e   :  { %6497 = vmatprep.subr.bf16.mxu1 %v8955_v43  ;;  %v9036_v43 = vld [vmem:[%s12244_s8 + $0x96c] ss:$52 sps:$4 sm:$0xff]  }
 0x510   :  { %6416 = vmatpush1.bf16.msra.mxu0 %v8950_v44  ;;  %v9039_v44 = vld [vmem:[%s12244_s8 + $0x974] ss:$52 sps:$4 sm:$0xff]  }
 0x511   :  { %6498 = vmatpush1.bf16.msra.mxu1 %v8953_v45  ;;  %6417 = vmatprep.subr.bf16.mxu0 %v8958_v46  ;;  %v9034_v45 = vld [vmem:[%s12244_s8 + $0x968] ss:$52 sps:$4 sm:$0xff]   ;;  %v9037_v46 = vld [vmem:[%s12244_s8 + $0x970] ss:$52 sps:$4 sm:$0xff]  }
 0x512   :  { %6499 = vmatprep.subr.bf16.mxu1 %v8961_v47  ;;  %v9042_v47 = vld [vmem:[%s12244_s8 + $0x9d4] ss:$52 sps:$4 sm:$0xff]  }
 0x514   :  { %6418 = vmatpush1.bf16.msra.mxu0 %v8956_v48  ;;  %v9045_v48 = vld [vmem:[%s12244_s8 + $0x9dc] ss:$52 sps:$4 sm:$0xff]  }
 0x515   :  { %6500 = vmatpush1.bf16.msra.mxu1 %v8959_v49  ;;  %6419 = vmatprep.subr.bf16.mxu0 %v8964_v51  ;;  %v9040_v49 = vld [vmem:[%s12244_s8 + $0x9d0] ss:$52 sps:$4 sm:$0xff]   ;;  %v9043_v51 = vld [vmem:[%s12244_s8 + $0x9d8] ss:$52 sps:$4 sm:$0xff]  }
 0x516   :  { %6501 = vmatprep.subr.bf16.mxu1 %v8967_v52  ;;  %v9048_v52 = vld [vmem:[%s12244_s8 + $0xa3c] ss:$52 sps:$4 sm:$0xff]  }
 0x518   :  { %6420 = vmatpush1.bf16.msra.mxu0 %v8962_v54  ;;  %v9051_v54 = vld [vmem:[%s12244_s8 + $0xa44] ss:$52 sps:$4 sm:$0xff]  }
 0x519   :  { %6502 = vmatpush1.bf16.msra.mxu1 %v8965_v55  ;;  %6421 = vmatprep.subr.bf16.mxu0 %v8970_v32  ;;  %v9046_v55 = vld [vmem:[%s12244_s8 + $0xa38] ss:$52 sps:$4 sm:$0xff]   ;;  %v9049_v32 = vld [vmem:[%s12244_s8 + $0xa40] ss:$52 sps:$4 sm:$0xff]  }
 0x51a   :  { %6503 = vmatprep.subr.bf16.mxu1 %v8973_v56  ;;  %v9054_v56 = vld [vmem:[%s12244_s8 + $0xaa4] ss:$52 sps:$4 sm:$0xff]  }
 0x51c   :  { %6422 = vmatpush1.bf16.msra.mxu0 %v8968_v57  ;;  %v9057_v57 = vld [vmem:[%s12244_s8 + $0xaac] ss:$52 sps:$4 sm:$0xff]  }
 0x51d   :  { %6504 = vmatpush1.bf16.msra.mxu1 %v8971_v58  ;;  %6423 = vmatprep.subr.bf16.mxu0 %v8976_v59  ;;  %v9052_v58 = vld [vmem:[%s12244_s8 + $0xaa0] ss:$52 sps:$4 sm:$0xff]   ;;  %v9055_v59 = vld [vmem:[%s12244_s8 + $0xaa8] ss:$52 sps:$4 sm:$0xff]  }
 0x51e   :  { %6505 = vmatprep.subr.bf16.mxu1 %v8979_v38  ;;  %v9060_v38 = vld [vmem:[%s12244_s8 + $0xb0c] ss:$52 sps:$4 sm:$0xff]  }
 0x520   :  { %6424 = vmatpush1.bf16.msra.mxu0 %v8974_v60  ;;  %v9063_v60 = vld [vmem:[%s12244_s8 + $0xb14] ss:$52 sps:$4 sm:$0xff]  }
 0x521   :  { %6506 = vmatpush1.bf16.msra.mxu1 %v8977_v61  ;;  %6425 = vmatprep.subr.bf16.mxu0 %v8982_v62  ;;  %v9058_v61 = vld [vmem:[%s12244_s8 + $0xb08] ss:$52 sps:$4 sm:$0xff]   ;;  %v9061_v62 = vld [vmem:[%s12244_s8 + $0xb10] ss:$52 sps:$4 sm:$0xff]  }
 0x522   :  { %6507 = vmatprep.subr.bf16.mxu1 %v8985_v63  ;;  %v9066_v63 = vld [vmem:[%s12244_s8 + $0xb74] ss:$52 sps:$4 sm:$0xff]  }
 0x524   :  { %6426 = vmatpush1.bf16.msra.mxu0 %v8980_v1  ;;  %v9069_v1 = vld [vmem:[%s12244_s8 + $0xb7c] ss:$52 sps:$4 sm:$0xff]  }
 0x525   :  { %6508 = vmatpush1.bf16.msra.mxu1 %v8983_v2  ;;  %6427 = vmatprep.subr.bf16.mxu0 %v8988_v3  ;;  %v9064_v2 = vld [vmem:[%s12244_s8 + $0xb70] ss:$52 sps:$4 sm:$0xff]   ;;  %v9067_v3 = vld [vmem:[%s12244_s8 + $0xb78] ss:$52 sps:$4 sm:$0xff]  }
 0x526   :  { %6509 = vmatprep.subr.bf16.mxu1 %v8991_v4  ;;  %v9072_v4 = vld [vmem:[%s12244_s8 + $0xbdc] ss:$52 sps:$4 sm:$0xff]  }
 0x528   :  { %6428 = vmatpush1.bf16.msra.mxu0 %v8986_v5  ;;  %v9075_v5 = vld [vmem:[%s12244_s8 + $0xbe4] ss:$52 sps:$4 sm:$0xff]  }
 0x529   :  { %6510 = vmatpush1.bf16.msra.mxu1 %v8989_v6  ;;  %6438 = vmatprep.subr.bf16.mxu0 %v8994_v7  ;;  %v9070_v6 = vld [vmem:[%s12244_s8 + $0xbd8] ss:$52 sps:$4 sm:$0xff]   ;;  %v9073_v7 = vld [vmem:[%s12244_s8 + $0xbe0] ss:$52 sps:$4 sm:$0xff]  }
 0x52a   :  { %6520 = vmatprep.subr.bf16.mxu1 %v8997_v8  ;;  %v9078_v8 = vld [vmem:[%s12244_s8 + $0xc44] ss:$52 sps:$4 sm:$0xff]  }
 0x52b   :  { %6430 = vmatmul.mubr.bf16.vlgmr.msra.gmra.mrb[16].mxu0 %v11099_v53 }
 0x52c   :  { %6512 = vmatmul.mubr.bf16.vlgmr.msra.gmra.mrb[16].mxu1 %v11099_v53  ;;  %6439 = vmatpush1.bf16.msra.mxu0 %v8992_v9  ;;  %v9081_v9 = vld [vmem:[%s12244_s8 + $0xc4c] ss:$52 sps:$4 sm:$0xff]  }
 0x52d   :  { %6470 = vmatprep.mubr.bf16.mxu0 %v11109_v36  ;;  %6521 = vmatpush1.bf16.msra.mxu1 %v8995_v10  ;;  %v9076_v10 = vld [vmem:[%s12244_s8 + $0xc40] ss:$52 sps:$4 sm:$0xff]  }
 0x52e   :  { %6552 = vmatprep.mubr.bf16.mxu1 %v11109_v36  ;;  %6440 = vmatprep.subr.bf16.mxu0 %v9000_v11  ;;  %v9079_v11 = vld [vmem:[%s12244_s8 + $0xc48] ss:$52 sps:$4 sm:$0xff]  }
 0x52f   :  { %6522 = vmatprep.subr.bf16.mxu1 %v9003_v12  ;;  %v9084_v12 = vld [vmem:[%s12244_s8 + $0xcac] ss:$52 sps:$4 sm:$0xff]  }
 0x530   :  { %6441 = vmatpush1.bf16.msra.mxu0 %v8998_v16  ;;  %v9087_v16 = vld [vmem:[%s12244_s8 + $0xcb4] ss:$52 sps:$4 sm:$0xff]  }
 0x531   :  { %6523 = vmatpush1.bf16.msra.mxu1 %v9001_v19  ;;  %6442 = vmatprep.subr.bf16.mxu0 %v9006_v20  ;;  %v9082_v19 = vld [vmem:[%s12244_s8 + $0xca8] ss:$52 sps:$4 sm:$0xff]   ;;  %v9085_v20 = vld [vmem:[%s12244_s8 + $0xcb0] ss:$52 sps:$4 sm:$0xff]  }
 0x532   :  { %6524 = vmatprep.subr.bf16.mxu1 %v9009_v21  ;;  %v9090_v21 = vld [vmem:[%s12244_s8 + $0x24] ss:$52 sps:$4 sm:$0xff]  }
 0x534   :  { %6443 = vmatpush1.bf16.msra.mxu0 %v9004_v22  ;;  %v9093_v22 = vld [vmem:[%s12244_s8 + $0x2c] ss:$52 sps:$4 sm:$0xff]  }
 0x535   :  { %6525 = vmatpush1.bf16.msra.mxu1 %v9007_v24  ;;  %6444 = vmatprep.subr.bf16.mxu0 %v9012_v25  ;;  %v9088_v24 = vld [vmem:[%s12244_s8 + $0x20] ss:$52 sps:$4 sm:$0xff]   ;;  %v9091_v25 = vld [vmem:[%s12244_s8 + $0x28] ss:$52 sps:$4 sm:$0xff]  }
 0x536   :  { %6526 = vmatprep.subr.bf16.mxu1 %v9015_v26  ;;  %v9096_v26 = vld [vmem:[%s12244_s8 + $0x8c] ss:$52 sps:$4 sm:$0xff]  }
 0x538   :  { %6445 = vmatpush1.bf16.msra.mxu0 %v9010_v27  ;;  %v9099_v27 = vld [vmem:[%s12244_s8 + $0x94] ss:$52 sps:$4 sm:$0xff]  }
 0x539   :  { %6527 = vmatpush1.bf16.msra.mxu1 %v9013_v28  ;;  %6446 = vmatprep.subr.bf16.mxu0 %v9018_v29  ;;  %v9094_v28 = vld [vmem:[%s12244_s8 + $0x88] ss:$52 sps:$4 sm:$0xff]   ;;  %v9097_v29 = vld [vmem:[%s12244_s8 + $0x90] ss:$52 sps:$4 sm:$0xff]  }
 0x53a   :  { %6528 = vmatprep.subr.bf16.mxu1 %v9021_v30  ;;  %v9102_v30 = vld [vmem:[%s12244_s8 + $0xf4] ss:$52 sps:$4 sm:$0xff]  }
 0x53c   :  { %6447 = vmatpush1.bf16.msra.mxu0 %v9016_v31  ;;  %v9105_v31 = vld [vmem:[%s12244_s8 + $0xfc] ss:$52 sps:$4 sm:$0xff]  }
 0x53d   :  { %6529 = vmatpush1.bf16.msra.mxu1 %v9019_v33  ;;  %6448 = vmatprep.subr.bf16.mxu0 %v9024_v34  ;;  %v9100_v33 = vld [vmem:[%s12244_s8 + $0xf0] ss:$52 sps:$4 sm:$0xff]   ;;  %v9103_v34 = vld [vmem:[%s12244_s8 + $0xf8] ss:$52 sps:$4 sm:$0xff]  }
 0x53e   :  { %6530 = vmatprep.subr.bf16.mxu1 %v9027_v35  ;;  %v9108_v35 = vld [vmem:[%s12244_s8 + $0x15c] ss:$52 sps:$4 sm:$0xff]  }
 0x540   :  { %6449 = vmatpush1.bf16.msra.mxu0 %v9022_v37  ;;  %v9111_v37 = vld [vmem:[%s12244_s8 + $0x164] ss:$52 sps:$4 sm:$0xff]  }
 0x541   :  { %6531 = vmatpush1.bf16.msra.mxu1 %v9025_v23  ;;  %6450 = vmatprep.subr.bf16.mxu0 %v9030_v39  ;;  %v9106_v23 = vld [vmem:[%s12244_s8 + $0x158] ss:$52 sps:$4 sm:$0xff]   ;;  %v9109_v39 = vld [vmem:[%s12244_s8 + $0x160] ss:$52 sps:$4 sm:$0xff]  }
 0x542   :  { %6532 = vmatprep.subr.bf16.mxu1 %v9033_v40  ;;  %v9114_v40 = vld [vmem:[%s12244_s8 + $0x1c4] ss:$52 sps:$4 sm:$0xff]  }
 0x544   :  { %6451 = vmatpush1.bf16.msra.mxu0 %v9028_v41  ;;  %v9117_v41 = vld [vmem:[%s12244_s8 + $0x1cc] ss:$52 sps:$4 sm:$0xff]  }
 0x545   :  { %6533 = vmatpush1.bf16.msra.mxu1 %v9031_v42  ;;  %6452 = vmatprep.subr.bf16.mxu0 %v9036_v43  ;;  %v9112_v42 = vld [vmem:[%s12244_s8 + $0x1c0] ss:$52 sps:$4 sm:$0xff]   ;;  %v9115_v43 = vld [vmem:[%s12244_s8 + $0x1c8] ss:$52 sps:$4 sm:$0xff]  }
 0x546   :  { %6534 = vmatprep.subr.bf16.mxu1 %v9039_v44  ;;  %v9120_v44 = vld [vmem:[%s12244_s8 + $0x22c] ss:$52 sps:$4 sm:$0xff]  }
 0x548   :  { %6453 = vmatpush1.bf16.msra.mxu0 %v9034_v45  ;;  %v9123_v45 = vld [vmem:[%s12244_s8 + $0x234] ss:$52 sps:$4 sm:$0xff]  }
 0x549   :  { %6535 = vmatpush1.bf16.msra.mxu1 %v9037_v46  ;;  %6454 = vmatprep.subr.bf16.mxu0 %v9042_v47  ;;  %v9118_v46 = vld [vmem:[%s12244_s8 + $0x228] ss:$52 sps:$4 sm:$0xff]   ;;  %v9121_v47 = vld [vmem:[%s12244_s8 + $0x230] ss:$52 sps:$4 sm:$0xff]  }
 0x54a   :  { %6536 = vmatprep.subr.bf16.mxu1 %v9045_v48  ;;  %v9126_v48 = vld [vmem:[%s12244_s8 + $0x294] ss:$52 sps:$4 sm:$0xff]  }
 0x54c   :  { %6455 = vmatpush1.bf16.msra.mxu0 %v9040_v49  ;;  %v9129_v49 = vld [vmem:[%s12244_s8 + $0x29c] ss:$52 sps:$4 sm:$0xff]  }
 0x54d   :  { %6537 = vmatpush1.bf16.msra.mxu1 %v9043_v51  ;;  %6456 = vmatprep.subr.bf16.mxu0 %v9048_v52  ;;  %v9124_v51 = vld [vmem:[%s12244_s8 + $0x290] ss:$52 sps:$4 sm:$0xff]   ;;  %v9127_v52 = vld [vmem:[%s12244_s8 + $0x298] ss:$52 sps:$4 sm:$0xff]  }
 0x54e   :  { %6538 = vmatprep.subr.bf16.mxu1 %v9051_v54  ;;  %v9132_v54 = vld [vmem:[%s12244_s8 + $0x2fc] ss:$52 sps:$4 sm:$0xff]  }
 0x550   :  { %6457 = vmatpush1.bf16.msra.mxu0 %v9046_v55  ;;  %v9135_v55 = vld [vmem:[%s12244_s8 + $0x304] ss:$52 sps:$4 sm:$0xff]  }
 0x551   :  { %6539 = vmatpush1.bf16.msra.mxu1 %v9049_v32  ;;  %6458 = vmatprep.subr.bf16.mxu0 %v9054_v56  ;;  %v9130_v32 = vld [vmem:[%s12244_s8 + $0x2f8] ss:$52 sps:$4 sm:$0xff]   ;;  %v9133_v56 = vld [vmem:[%s12244_s8 + $0x300] ss:$52 sps:$4 sm:$0xff]  }
 0x552   :  { %6540 = vmatprep.subr.bf16.mxu1 %v9057_v57  ;;  %v9138_v57 = vld [vmem:[%s12244_s8 + $0x364] ss:$52 sps:$4 sm:$0xff]  }
 0x554   :  { %6459 = vmatpush1.bf16.msra.mxu0 %v9052_v58  ;;  %v9141_v58 = vld [vmem:[%s12244_s8 + $0x36c] ss:$52 sps:$4 sm:$0xff]  }
 0x555   :  { %6541 = vmatpush1.bf16.msra.mxu1 %v9055_v59  ;;  %6460 = vmatprep.subr.bf16.mxu0 %v9060_v38  ;;  %v9136_v59 = vld [vmem:[%s12244_s8 + $0x360] ss:$52 sps:$4 sm:$0xff]   ;;  %v9139_v38 = vld [vmem:[%s12244_s8 + $0x368] ss:$52 sps:$4 sm:$0xff]  }
 0x556   :  { %6542 = vmatprep.subr.bf16.mxu1 %v9063_v60  ;;  %v9144_v60 = vld [vmem:[%s12244_s8 + $0x3cc] ss:$52 sps:$4 sm:$0xff]  }
 0x558   :  { %6461 = vmatpush1.bf16.msra.mxu0 %v9058_v61  ;;  %v9147_v61 = vld [vmem:[%s12244_s8 + $0x3d4] ss:$52 sps:$4 sm:$0xff]  }
 0x559   :  { %6543 = vmatpush1.bf16.msra.mxu1 %v9061_v62  ;;  %6462 = vmatprep.subr.bf16.mxu0 %v9066_v63  ;;  %v9142_v62 = vld [vmem:[%s12244_s8 + $0x3c8] ss:$52 sps:$4 sm:$0xff]   ;;  %v9145_v63 = vld [vmem:[%s12244_s8 + $0x3d0] ss:$52 sps:$4 sm:$0xff]  }
 0x55a   :  { %6544 = vmatprep.subr.bf16.mxu1 %v9069_v1  ;;  %v9150_v1 = vld [vmem:[%s12244_s8 + $0x434] ss:$52 sps:$4 sm:$0xff]  }
 0x55c   :  { %6463 = vmatpush1.bf16.msra.mxu0 %v9064_v2  ;;  %v9153_v2 = vld [vmem:[%s12244_s8 + $0x43c] ss:$52 sps:$4 sm:$0xff]  }
 0x55d   :  { %6545 = vmatpush1.bf16.msra.mxu1 %v9067_v3  ;;  %6464 = vmatprep.subr.bf16.mxu0 %v9072_v4  ;;  %v9148_v3 = vld [vmem:[%s12244_s8 + $0x430] ss:$52 sps:$4 sm:$0xff]   ;;  %v9151_v4 = vld [vmem:[%s12244_s8 + $0x438] ss:$52 sps:$4 sm:$0xff]  }
 0x55e   :  { %6546 = vmatprep.subr.bf16.mxu1 %v9075_v5  ;;  %v9156_v5 = vld [vmem:[%s12244_s8 + $0x49c] ss:$52 sps:$4 sm:$0xff]  }
 0x560   :  { %6465 = vmatpush1.bf16.msra.mxu0 %v9070_v6  ;;  %v9159_v6 = vld [vmem:[%s12244_s8 + $0x4a4] ss:$52 sps:$4 sm:$0xff]  }
 0x561   :  { %6547 = vmatpush1.bf16.msra.mxu1 %v9073_v7  ;;  %6466 = vmatprep.subr.bf16.mxu0 %v9078_v8  ;;  %v9154_v7 = vld [vmem:[%s12244_s8 + $0x498] ss:$52 sps:$4 sm:$0xff]   ;;  %v9157_v8 = vld [vmem:[%s12244_s8 + $0x4a0] ss:$52 sps:$4 sm:$0xff]  }
 0x562   :  { %6548 = vmatprep.subr.bf16.mxu1 %v9081_v9  ;;  %v9162_v9 = vld [vmem:[%s12244_s8 + $0x504] ss:$52 sps:$4 sm:$0xff]  }
 0x564   :  { %6467 = vmatpush1.bf16.msra.mxu0 %v9076_v10  ;;  %v9165_v10 = vld [vmem:[%s12244_s8 + $0x50c] ss:$52 sps:$4 sm:$0xff]  }
 0x565   :  { %6549 = vmatpush1.bf16.msra.mxu1 %v9079_v11  ;;  %6468 = vmatprep.subr.bf16.mxu0 %v9084_v12  ;;  %v9160_v11 = vld [vmem:[%s12244_s8 + $0x500] ss:$52 sps:$4 sm:$0xff]   ;;  %v9163_v12 = vld [vmem:[%s12244_s8 + $0x508] ss:$52 sps:$4 sm:$0xff]  }
 0x566   :  { %6550 = vmatprep.subr.bf16.mxu1 %v9087_v16  ;;  %v9168_v16 = vld [vmem:[%s12244_s8 + $0x56c] ss:$52 sps:$4 sm:$0xff]  }
 0x568   :  { %6469 = vmatpush1.bf16.msra.mxu0 %v9082_v19  ;;  %v9171_v19 = vld [vmem:[%s12244_s8 + $0x574] ss:$52 sps:$4 sm:$0xff]  }
 0x569   :  { %6551 = vmatpush1.bf16.msra.mxu1 %v9085_v20  ;;  %6561 = vmatprep.subr.bf16.mxu0 %v9090_v21  ;;  %v9166_v20 = vld [vmem:[%s12244_s8 + $0x568] ss:$52 sps:$4 sm:$0xff]   ;;  %v9169_v21 = vld [vmem:[%s12244_s8 + $0x570] ss:$52 sps:$4 sm:$0xff]  }
 0x56a   :  { %6643 = vmatprep.subr.bf16.mxu1 %v9093_v22  ;;  %v9174_v22 = vld [vmem:[%s12244_s8 + $0x5d4] ss:$52 sps:$4 sm:$0xff]  }
 0x56b   :  { %6471 = vmatmul.mubr.bf16.vlgmr.msra.gmra.mrb[16].mxu0 %v11301_v0 }
 0x56c   :  { %6553 = vmatmul.mubr.bf16.vlgmr.msra.gmra.mrb[16].mxu1 %v11301_v0  ;;  %6562 = vmatpush1.bf16.msra.mxu0 %v9088_v24  ;;  %v9177_v24 = vld [vmem:[%s12244_s8 + $0x5dc] ss:$52 sps:$4 sm:$0xff]  }
 0x56d   :  { %6593 = vmatprep.mubr.bf16.mxu0 %v11091_v50  ;;  %6644 = vmatpush1.bf16.msra.mxu1 %v9091_v25  ;;  %v9172_v25 = vld [vmem:[%s12244_s8 + $0x5d0] ss:$52 sps:$4 sm:$0xff]  }
 0x56e   :  { %6675 = vmatprep.mubr.bf16.mxu1 %v11091_v50  ;;  %6563 = vmatprep.subr.bf16.mxu0 %v9096_v26  ;;  %v9175_v26 = vld [vmem:[%s12244_s8 + $0x5d8] ss:$52 sps:$4 sm:$0xff]  }
 0x56f   :  { %6645 = vmatprep.subr.bf16.mxu1 %v9099_v27  ;;  %v9180_v27 = vld [vmem:[%s12244_s8 + $0x63c] ss:$52 sps:$4 sm:$0xff]  }
 0x570   :  { %6564 = vmatpush1.bf16.msra.mxu0 %v9094_v28  ;;  %v9183_v28 = vld [vmem:[%s12244_s8 + $0x644] ss:$52 sps:$4 sm:$0xff]  }
 0x571   :  { %6646 = vmatpush1.bf16.msra.mxu1 %v9097_v29  ;;  %6565 = vmatprep.subr.bf16.mxu0 %v9102_v30  ;;  %v9178_v29 = vld [vmem:[%s12244_s8 + $0x638] ss:$52 sps:$4 sm:$0xff]   ;;  %v9181_v30 = vld [vmem:[%s12244_s8 + $0x640] ss:$52 sps:$4 sm:$0xff]  }
 0x572   :  { %6647 = vmatprep.subr.bf16.mxu1 %v9105_v31  ;;  %v9186_v31 = vld [vmem:[%s12244_s8 + $0x6a4] ss:$52 sps:$4 sm:$0xff]  }
 0x574   :  { %6566 = vmatpush1.bf16.msra.mxu0 %v9100_v33  ;;  %v9189_v33 = vld [vmem:[%s12244_s8 + $0x6ac] ss:$52 sps:$4 sm:$0xff]  }
 0x575   :  { %6648 = vmatpush1.bf16.msra.mxu1 %v9103_v34  ;;  %6567 = vmatprep.subr.bf16.mxu0 %v9108_v35  ;;  %v9184_v34 = vld [vmem:[%s12244_s8 + $0x6a0] ss:$52 sps:$4 sm:$0xff]   ;;  %v9187_v35 = vld [vmem:[%s12244_s8 + $0x6a8] ss:$52 sps:$4 sm:$0xff]  }
 0x576   :  { %6649 = vmatprep.subr.bf16.mxu1 %v9111_v37  ;;  %v9192_v37 = vld [vmem:[%s12244_s8 + $0x70c] ss:$52 sps:$4 sm:$0xff]  }
 0x578   :  { %6568 = vmatpush1.bf16.msra.mxu0 %v9106_v23  ;;  %v9195_v23 = vld [vmem:[%s12244_s8 + $0x714] ss:$52 sps:$4 sm:$0xff]  }
 0x579   :  { %6650 = vmatpush1.bf16.msra.mxu1 %v9109_v39  ;;  %6569 = vmatprep.subr.bf16.mxu0 %v9114_v40  ;;  %v9190_v39 = vld [vmem:[%s12244_s8 + $0x708] ss:$52 sps:$4 sm:$0xff]   ;;  %v9193_v40 = vld [vmem:[%s12244_s8 + $0x710] ss:$52 sps:$4 sm:$0xff]  }
 0x57a   :  { %6651 = vmatprep.subr.bf16.mxu1 %v9117_v41  ;;  %v9198_v41 = vld [vmem:[%s12244_s8 + $0x774] ss:$52 sps:$4 sm:$0xff]  }
 0x57c   :  { %6570 = vmatpush1.bf16.msra.mxu0 %v9112_v42  ;;  %v9201_v42 = vld [vmem:[%s12244_s8 + $0x77c] ss:$52 sps:$4 sm:$0xff]  }
 0x57d   :  { %6652 = vmatpush1.bf16.msra.mxu1 %v9115_v43  ;;  %6571 = vmatprep.subr.bf16.mxu0 %v9120_v44  ;;  %v9196_v43 = vld [vmem:[%s12244_s8 + $0x770] ss:$52 sps:$4 sm:$0xff]   ;;  %v9199_v44 = vld [vmem:[%s12244_s8 + $0x778] ss:$52 sps:$4 sm:$0xff]  }
 0x57e   :  { %6653 = vmatprep.subr.bf16.mxu1 %v9123_v45  ;;  %v9204_v45 = vld [vmem:[%s12244_s8 + $0x7dc] ss:$52 sps:$4 sm:$0xff]  }
 0x580   :  { %6572 = vmatpush1.bf16.msra.mxu0 %v9118_v46  ;;  %v9207_v46 = vld [vmem:[%s12244_s8 + $0x7e4] ss:$52 sps:$4 sm:$0xff]  }
 0x581   :  { %6654 = vmatpush1.bf16.msra.mxu1 %v9121_v47  ;;  %6573 = vmatprep.subr.bf16.mxu0 %v9126_v48  ;;  %v9202_v47 = vld [vmem:[%s12244_s8 + $0x7d8] ss:$52 sps:$4 sm:$0xff]   ;;  %v9205_v48 = vld [vmem:[%s12244_s8 + $0x7e0] ss:$52 sps:$4 sm:$0xff]  }
 0x582   :  { %6655 = vmatprep.subr.bf16.mxu1 %v9129_v49  ;;  %v9210_v49 = vld [vmem:[%s12244_s8 + $0x844] ss:$52 sps:$4 sm:$0xff]  }
 0x584   :  { %6574 = vmatpush1.bf16.msra.mxu0 %v9124_v51  ;;  %v9213_v51 = vld [vmem:[%s12244_s8 + $0x84c] ss:$52 sps:$4 sm:$0xff]  }
 0x585   :  { %6656 = vmatpush1.bf16.msra.mxu1 %v9127_v52  ;;  %6575 = vmatprep.subr.bf16.mxu0 %v9132_v54  ;;  %v9208_v52 = vld [vmem:[%s12244_s8 + $0x840] ss:$52 sps:$4 sm:$0xff]  }
 0x586   :  { %6657 = vmatprep.subr.bf16.mxu1 %v9135_v55  ;;  %v11946_v54 = vld [vmem:[%s12245_s9] sm:$0xff]  ;;  %v9211_v55 = vld [vmem:[%s12244_s8 + $0x848] ss:$52 sps:$4 sm:$0xff]  }
 0x588   :  { %6576 = vmatpush1.bf16.msra.mxu0 %v9130_v32  ;;  %v9216_v32 = vld [vmem:[%s12244_s8 + $0x8ac] ss:$52 sps:$4 sm:$0xff]  }
 0x589   :  { %6658 = vmatpush1.bf16.msra.mxu1 %v9133_v56  ;;  %6577 = vmatprep.subr.bf16.mxu0 %v9138_v57  ;;  %v9219_v56 = vld [vmem:[%s12244_s8 + $0x8b4] ss:$52 sps:$4 sm:$0xff]   ;;  %v4059_v57 = vrot.slane %v11946_v54, %v10826_v14 }
 0x58a   :  { %6659 = vmatprep.subr.bf16.mxu1 %v9141_v58  ;;  %v4067_v58 = vrot.slane %v11946_v54, %v10829_v15 }
 0x58c   :  { %6578 = vmatpush1.bf16.msra.mxu0 %v9136_v59  ;;  %v4063_v59 = vrot.slane %v11946_v54, %v10835_v17 }
 0x58d   :  { %6660 = vmatpush1.bf16.msra.mxu1 %v9139_v38  ;;  %6579 = vmatprep.subr.bf16.mxu0 %v9144_v60  ;;  %v4071_v38 = vrot.slane %v11946_v54, %v10838_v18  ;;  %v9214_v60 = vld [vmem:[%s12244_s8 + $0x8a8] ss:$52 sps:$4 sm:$0xff]  }
 0x58e   :  { %6661 = vmatprep.subr.bf16.mxu1 %v9147_v61  ;;  %v9217_v61 = vld [vmem:[%s12244_s8 + $0x8b0] ss:$52 sps:$4 sm:$0xff]  }
 0x590   :  { %6580 = vmatpush1.bf16.msra.mxu0 %v9142_v62  ;;  %v9222_v62 = vld [vmem:[%s12244_s8 + $0x914] ss:$52 sps:$4 sm:$0xff]  }
 0x591   :  { %6662 = vmatpush1.bf16.msra.mxu1 %v9145_v63  ;;  %6581 = vmatprep.subr.bf16.mxu0 %v9150_v1 }
 0x592   :  { %6663 = vmatprep.subr.bf16.mxu1 %v9153_v2  ;;  %v9225_v2 = vld [vmem:[%s12244_s8 + $0x91c] ss:$52 sps:$4 sm:$0xff]  }
 0x594   :  { %6582 = vmatpush1.bf16.msra.mxu0 %v9148_v3 }
 0x595   :  { %6664 = vmatpush1.bf16.msra.mxu1 %v9151_v4  ;;  %6583 = vmatprep.subr.bf16.mxu0 %v9156_v5 }
 0x596   :  { %6665 = vmatprep.subr.bf16.mxu1 %v9159_v6 }
 0x598   :  { %6584 = vmatpush1.bf16.msra.mxu0 %v9154_v7  ;;  %v9220_v7 = vld [vmem:[%s12244_s8 + $0x910] ss:$52 sps:$4 sm:$0xff]  }
 0x599   :  { %6666 = vmatpush1.bf16.msra.mxu1 %v9157_v8  ;;  %6585 = vmatprep.subr.bf16.mxu0 %v9162_v9 }
 0x59a   :  { %6667 = vmatprep.subr.bf16.mxu1 %v9165_v10 }
 0x59c   :  { %6586 = vmatpush1.bf16.msra.mxu0 %v9160_v11 }
 0x59d   :  { %6668 = vmatpush1.bf16.msra.mxu1 %v9163_v12  ;;  %6587 = vmatprep.subr.bf16.mxu0 %v9168_v16  ;;  %v9223_v12 = vld [vmem:[%s12244_s8 + $0x918] ss:$52 sps:$4 sm:$0xff]   ;;  %v9228_v16 = vld [vmem:[%s12244_s8 + $0x97c] ss:$52 sps:$4 sm:$0xff]  }
 0x59e   :  { %6669 = vmatprep.subr.bf16.mxu1 %v9171_v19 }
 0x5a0   :  { %6588 = vmatpush1.bf16.msra.mxu0 %v9166_v20 }
 0x5a1   :  { %6670 = vmatpush1.bf16.msra.mxu1 %v9169_v21  ;;  %6589 = vmatprep.subr.bf16.mxu0 %v9174_v22 }
 0x5a2   :  { %6671 = vmatprep.subr.bf16.mxu1 %v9177_v24 }
 0x5a4   :  { %6590 = vmatpush1.bf16.msra.mxu0 %v9172_v25 }
 0x5a5   :  { %6672 = vmatpush1.bf16.msra.mxu1 %v9175_v26  ;;  %6591 = vmatprep.subr.bf16.mxu0 %v9180_v27  ;;  %v9231_v26 = vld [vmem:[%s12244_s8 + $0x984] ss:$52 sps:$4 sm:$0xff]  }
 0x5a6   :  { %6673 = vmatprep.subr.bf16.mxu1 %v9183_v28  ;;  %v9226_v27 = vld [vmem:[%s12244_s8 + $0x978] ss:$52 sps:$4 sm:$0xff]   ;;  %v9229_v28 = vld [vmem:[%s12244_s8 + $0x980] ss:$52 sps:$4 sm:$0xff]  }
 0x5a8   :  { %6592 = vmatpush1.bf16.msra.mxu0 %v9178_v29  ;;  %v9234_v29 = vld [vmem:[%s12244_s8 + $0x9e4] ss:$52 sps:$4 sm:$0xff]  }
 0x5a9   :  { %6674 = vmatpush1.bf16.msra.mxu1 %v9181_v30  ;;  %6602 = vmatprep.subr.bf16.mxu0 %v9186_v31  ;;  %v9237_v30 = vld [vmem:[%s12244_s8 + $0x9ec] ss:$52 sps:$4 sm:$0xff]  }
 0x5aa   :  { %6684 = vmatprep.subr.bf16.mxu1 %v9189_v33  ;;  %v9232_v31 = vld [vmem:[%s12244_s8 + $0x9e0] ss:$52 sps:$4 sm:$0xff]   ;;  %v9235_v33 = vld [vmem:[%s12244_s8 + $0x9e8] ss:$52 sps:$4 sm:$0xff]  }
 0x5ab   :  { %6594 = vmatmul.mubr.bf16.vlgmr.msra.gmra.mrb[20].mxu0 %v11099_v53 }
 0x5ac   :  { %6676 = vmatmul.mubr.bf16.vlgmr.msra.gmra.mrb[20].mxu1 %v11099_v53  ;;  %6603 = vmatpush1.bf16.msra.mxu0 %v9184_v34  ;;  %v9240_v34 = vld [vmem:[%s12244_s8 + $0xa4c] ss:$52 sps:$4 sm:$0xff]  }
 0x5ad   :  { %6634 = vmatprep.mubr.bf16.mxu0 %v11109_v36  ;;  %6685 = vmatpush1.bf16.msra.mxu1 %v9187_v35  ;;  %v9243_v35 = vld [vmem:[%s12244_s8 + $0xa54] ss:$52 sps:$4 sm:$0xff]  }
 0x5ae   :  { %6716 = vmatprep.mubr.bf16.mxu1 %v11109_v36  ;;  %6604 = vmatprep.subr.bf16.mxu0 %v9192_v37  ;;  %v9238_v37 = vld [vmem:[%s12244_s8 + $0xa48] ss:$52 sps:$4 sm:$0xff]  }
 0x5af   :  { %6686 = vmatprep.subr.bf16.mxu1 %v9195_v23 }
 0x5b0   :  { %6605 = vmatpush1.bf16.msra.mxu0 %v9190_v39  ;;  %v9241_v39 = vld [vmem:[%s12244_s8 + $0xa50] ss:$52 sps:$4 sm:$0xff]  }
 0x5b1   :  { %6687 = vmatpush1.bf16.msra.mxu1 %v9193_v40  ;;  %6606 = vmatprep.subr.bf16.mxu0 %v9198_v41  ;;  %v9246_v40 = vld [vmem:[%s12244_s8 + $0xab4] ss:$52 sps:$4 sm:$0xff]  }
 0x5b2   :  { %6688 = vmatprep.subr.bf16.mxu1 %v9201_v42 }
 0x5b4   :  { %6607 = vmatpush1.bf16.msra.mxu0 %v9196_v43  ;;  %v9249_v43 = vld [vmem:[%s12244_s8 + $0xabc] ss:$52 sps:$4 sm:$0xff]  }
 0x5b5   :  { %6689 = vmatpush1.bf16.msra.mxu1 %v9199_v44  ;;  %6608 = vmatprep.subr.bf16.mxu0 %v9204_v45 }
 0x5b6   :  { %6690 = vmatprep.subr.bf16.mxu1 %v9207_v46 }
 0x5b8   :  { %6609 = vmatpush1.bf16.msra.mxu0 %v9202_v47 }
 0x5b9   :  { %6691 = vmatpush1.bf16.msra.mxu1 %v9205_v48  ;;  %6610 = vmatprep.subr.bf16.mxu0 %v9210_v49  ;;  %v9244_v48 = vld [vmem:[%s12244_s8 + $0xab0] ss:$52 sps:$4 sm:$0xff]  }
 0x5ba   :  { %6692 = vmatprep.subr.bf16.mxu1 %v9213_v51  ;;  %v9247_v51 = vld [vmem:[%s12244_s8 + $0xab8] ss:$52 sps:$4 sm:$0xff]  }
 0x5bc   :  { %6611 = vmatpush1.bf16.msra.mxu0 %v9208_v52  ;;  %v9252_v52 = vld [vmem:[%s12244_s8 + $0xb1c] ss:$52 sps:$4 sm:$0xff]  }
 0x5bd   :  { %6693 = vmatpush1.bf16.msra.mxu1 %v9211_v55  ;;  %6612 = vmatprep.subr.bf16.mxu0 %v9216_v32  ;;  %v9255_v55 = vld [vmem:[%s12244_s8 + $0xb24] ss:$52 sps:$4 sm:$0xff]  }
 0x5be   :  { %v6308_v63 = vpop.f32.mrb[12].mxu0  ;;  %v6390_v1 = vpop.f32.mrb[12].mxu1  ;;  %6694 = vmatprep.subr.bf16.mxu1 %v9219_v56  ;;  %v9250_v32 = vld [vmem:[%s12244_s8 + $0xb18] ss:$52 sps:$4 sm:$0xff]   ;;  %v9253_v56 = vld [vmem:[%s12244_s8 + $0xb20] ss:$52 sps:$4 sm:$0xff]  }
 0x5bf   :  { %v7970_v3 = vadd.f32 %v6308_v63, %v4059_v57  ;;  %v7972_v4 = vadd.f32 %v6390_v1, %v4067_v58  ;;  %v6310_v5 = vpop.f32.mrb[13].mxu0  ;;  %v6392_v6 = vpop.f32.mrb[13].mxu1  ;;  %v9258_v57 = vld [vmem:[%s12244_s8 + $0xb84] ss:$52 sps:$4 sm:$0xff]   ;;  %v9261_v58 = vld [vmem:[%s12244_s8 + $0xb8c] ss:$52 sps:$4 sm:$0xff]  }
 0x5c0   :  { %v7971_v8 = vadd.f32 %v6310_v5, %v4063_v59  ;;  %v7973_v9 = vadd.f32 %v6392_v6, %v4071_v38  ;;  %v6312_v10 = vpop.f32.mrb[14].mxu0  ;;  %v6394_v11 = vpop.f32.mrb[14].mxu1  ;;  %6613 = vmatpush1.bf16.msra.mxu0 %v9214_v60  ;;  %v9256_v59 = vld [vmem:[%s12244_s8 + $0xb80] ss:$52 sps:$4 sm:$0xff]   ;;  %v9259_v38 = vld [vmem:[%s12244_s8 + $0xb88] ss:$52 sps:$4 sm:$0xff]  }
 0x5c1   :  { %v7851_v19 = vmul.f32 -1.442695, %v7970_v3  ;;  %v7853_v20 = vmul.f32 -1.442695, %v7972_v4  ;;  %6695 = vmatpush1.bf16.msra.mxu1 %v9217_v61  ;;  %v6313_v21 = vpop.f32.mrb[15].mxu0  ;;  %v6395_v22 = vpop.f32.mrb[15].mxu1  ;;  %6614 = vmatprep.subr.bf16.mxu0 %v9222_v62 }
 0x5c2   :  { %v7852_v24 = vmul.f32 -1.442695, %v7971_v8  ;;  %v7854_v25 = vmul.f32 -1.442695, %v7973_v9  ;;  %6696 = vmatprep.subr.bf16.mxu1 %v9225_v2  ;;  %v9264_v60 = vld [vmem:[%s12244_s8 + $0xbec] ss:$52 sps:$4 sm:$0xff]  }
 0x5c3   :  { %9314 = vpow2.f32 %v7851_v19  ;;  %v9267_v62 = vld [vmem:[%s12244_s8 + $0xbf4] ss:$52 sps:$4 sm:$0xff]   ;;  %v9265_v5 = vld [vmem:[%s12244_s8 + $0xbf0] ss:$52 sps:$4 sm:$0xff]   ;;  %v9271_v10 = vld [vmem:[%s12244_s8 + $0xc58] ss:$52 sps:$4 sm:$0xff]  }
 0x5c4   :  { %9316 = vpow2.f32 %v7853_v20  ;;  %6615 = vmatpush1.bf16.msra.mxu0 %v9220_v7  ;;  %v9262_v2 = vld [vmem:[%s12244_s8 + $0xbe8] ss:$52 sps:$4 sm:$0xff]   ;;  %v9268_v9 = vld [vmem:[%s12244_s8 + $0xc50] ss:$52 sps:$4 sm:$0xff]   ;;  %v9277_v19 = vld [vmem:[%s12244_s8 + $0xcc0] ss:$52 sps:$4 sm:$0xff]  }
 0x5c5   :  { %9318 = vpow2.f32 %v7852_v24  ;;  %6697 = vmatpush1.bf16.msra.mxu1 %v9223_v12  ;;  %6616 = vmatprep.subr.bf16.mxu0 %v9228_v16  ;;  %v9270_v6 = vld [vmem:[%s12244_s8 + $0xc54] ss:$52 sps:$4 sm:$0xff]   ;;  %v9273_v8 = vld [vmem:[%s12244_s8 + $0xc5c] ss:$52 sps:$4 sm:$0xff]   ;;  %v9279_v12 = vld [vmem:[%s12244_s8 + $0xcc4] ss:$52 sps:$4 sm:$0xff]  }
 0x5c6   :  { %9320 = vpow2.f32 %v7854_v25  ;;  %6698 = vmatprep.subr.bf16.mxu1 %v9231_v26  ;;  %v9276_v11 = vld [vmem:[%s12244_s8 + $0xcbc] ss:$52 sps:$4 sm:$0xff]   ;;  %v9274_v16 = vld [vmem:[%s12244_s8 + $0xcb8] ss:$52 sps:$4 sm:$0xff]  }
 0x5c7   :  { %v9280_v20 = vld [vmem:[%s12244_s8 + $0x370] ss:$52 sps:$4 sm:$0xff]   ;;  %v9284_v25 = vld [vmem:[%s12244_s8 + $0x3d8] ss:$52 sps:$4 sm:$0xff]  }
 0x5c8   :  { %6617 = vmatpush1.bf16.msra.mxu0 %v9226_v27  ;;  %v9281_v21 = vld [vmem:[%s12244_s8 + $0x9f0] ss:$52 sps:$4 sm:$0xff]   ;;  %v9285_v26 = vld [vmem:[%s12244_s8 + $0xa58] ss:$52 sps:$4 sm:$0xff]  }
 0x5c9   :  { %6699 = vmatpush1.bf16.msra.mxu1 %v9229_v28  ;;  %6618 = vmatprep.subr.bf16.mxu0 %v9234_v29  ;;  %v9282_v22 = vld [vmem:[%s12244_s8 + $0x30] ss:$52 sps:$4 sm:$0xff]   ;;  %v9286_v27 = vld [vmem:[%s12244_s8 + $0x98] ss:$52 sps:$4 sm:$0xff]   ;;  %v9288_v29 = vld [vmem:[%s12244_s8 + $0x440] ss:$52 sps:$4 sm:$0xff]  }
 0x5ca   :  { %6700 = vmatprep.subr.bf16.mxu1 %v9237_v30  ;;  %v9283_v24 = vld [vmem:[%s12244_s8 + $0x6b0] ss:$52 sps:$4 sm:$0xff]   ;;  %v9287_v28 = vld [vmem:[%s12244_s8 + $0x718] ss:$52 sps:$4 sm:$0xff]   ;;  %v9289_v30 = vld [vmem:[%s12244_s8 + $0xac0] ss:$52 sps:$4 sm:$0xff]  }
 0x5cc   :  { %6619 = vmatpush1.bf16.msra.mxu0 %v9232_v31  ;;  %v9291_v31 = vld [vmem:[%s12244_s8 + $0x780] ss:$52 sps:$4 sm:$0xff]  }
 0x5cd   :  { %v9315_v23 = vpop.eup %9314  ;;  %6701 = vmatpush1.bf16.msra.mxu1 %v9235_v33  ;;  %6620 = vmatprep.subr.bf16.mxu0 %v9240_v34  ;;  %v9293_v33 = vld [vmem:[%s12244_s8 + $0xb28] ss:$52 sps:$4 sm:$0xff]  }
 0x5ce   :  { %v9317_v41 = vpop.eup %9316  ;;  %v6844_v42 = vadd.f32 1.0, %v9315_v23  ;;  %6702 = vmatprep.subr.bf16.mxu1 %v9243_v35  ;;  %v9294_v34 = vld [vmem:[%s12244_s8 + $0x168] ss:$52 sps:$4 sm:$0xff]   ;;  %v9297_v23 = vld [vmem:[%s12244_s8 + $0xb90] ss:$52 sps:$4 sm:$0xff]  }
 0x5cf   :  { %v9319_v44 = vpop.eup %9318  ;;  %v6846_v45 = vadd.f32 1.0, %v9317_v41  ;;  %v9295_v35 = vld [vmem:[%s12244_s8 + $0x7e8] ss:$52 sps:$4 sm:$0xff]   ;;  %v9300_v41 = vld [vmem:[%s12244_s8 + $0x578] ss:$52 sps:$4 sm:$0xff]  }
 0x5d0   :  { %v9321_v46 = vpop.eup %9320  ;;  %9322 = vrcp.f32 %v6844_v42  ;;  %v6845_v47 = vadd.f32 1.0, %v9319_v44  ;;  %6621 = vmatpush1.bf16.msra.mxu0 %v9238_v37  ;;  %v9296_v37 = vld [vmem:[%s12244_s8 + $0x510] ss:$52 sps:$4 sm:$0xff]   ;;  %v9301_v42 = vld [vmem:[%s12244_s8 + $0xbf8] ss:$52 sps:$4 sm:$0xff]  }
 0x5d1   :  { %9324 = vrcp.f32 %v6846_v45  ;;  %v6847_v49 = vadd.f32 1.0, %v9321_v46  ;;  %6703 = vmatpush1.bf16.msra.mxu1 %v9241_v39  ;;  %6622 = vmatprep.subr.bf16.mxu0 %v9246_v40  ;;  %v9298_v39 = vld [vmem:[%s12244_s8 + $0x1d0] ss:$52 sps:$4 sm:$0xff]   ;;  %v9303_v44 = vld [vmem:[%s12244_s8 + $0x8b8] ss:$52 sps:$4 sm:$0xff]  }
 0x5d2   :  { %9326 = vrcp.f32 %v6845_v47  ;;  %6704 = vmatprep.subr.bf16.mxu1 %v9249_v43  ;;  %v9299_v40 = vld [vmem:[%s12244_s8 + $0x850] ss:$52 sps:$4 sm:$0xff]   ;;  %v9302_v43 = vld [vmem:[%s12244_s8 + $0x238] ss:$52 sps:$4 sm:$0xff]   ;;  %v9304_v45 = vld [vmem:[%s12244_s8 + $0x5e0] ss:$52 sps:$4 sm:$0xff]  }
 0x5d3   :  { %9328 = vrcp.f32 %v6847_v49  ;;  %v9305_v46 = vld [vmem:[%s12244_s8 + $0xc60] ss:$52 sps:$4 sm:$0xff]   ;;  %v9308_v49 = vld [vmem:[%s12244_s8 + $0x648] ss:$52 sps:$4 sm:$0xff]  }
 0x5d4   :  { %6623 = vmatpush1.bf16.msra.mxu0 %v9244_v48  ;;  %v9306_v47 = vld [vmem:[%s12244_s8 + $0x2a0] ss:$52 sps:$4 sm:$0xff]  }
 0x5d5   :  { %6705 = vmatpush1.bf16.msra.mxu1 %v9247_v51  ;;  %6624 = vmatprep.subr.bf16.mxu0 %v9252_v52  ;;  %v9307_v48 = vld [vmem:[%s12244_s8 + $0x920] ss:$52 sps:$4 sm:$0xff]   ;;  %v9309_v51 = vld [vmem:[%s12244_s8 + $0xcc8] ss:$52 sps:$4 sm:$0xff]  }
 0x5d6   :  { %6706 = vmatprep.subr.bf16.mxu1 %v9255_v55  ;;  %v9310_v52 = vld [vmem:[%s12244_s8 + $0x308] ss:$52 sps:$4 sm:$0xff]  }
 0x5d7   :  { %v9311_v55 = vld [vmem:[%s12244_s8 + $0x988] ss:$52 sps:$4 sm:$0xff]  }
 0x5d8   :  { %6625 = vmatpush1.bf16.msra.mxu0 %v9250_v32  ;;  %v4074_v32 = vsub.s32 4, %v10823_v13 }
 0x5d9   :  { %6707 = vmatpush1.bf16.msra.mxu1 %v9253_v56  ;;  %6626 = vmatprep.subr.bf16.mxu0 %v9258_v57  ;;  %v4082_v56 = vsub.s32 6, %v10823_v13  ;;  %v4078_v57 = vsub.s32 5, %v10823_v13 }
 0x5da   :  { %v9323_v61 = vpop.eup %9322  ;;  %6708 = vmatprep.subr.bf16.mxu1 %v9261_v58  ;;  %v4086_v58 = vsub.s32 7, %v10823_v13 }
 0x5db   :  { %v9325_v63 = vpop.eup %9324 }
 0x5dc   :  { %v9327_v1 = vpop.eup %9326  ;;  %6627 = vmatpush1.bf16.msra.mxu0 %v9256_v59  ;;  %v4075_v59 = vrot.slane %v11946_v54, %v4074_v32 }
 0x5dd   :  { %v9329_v3 = vpop.eup %9328  ;;  %v7871_v4 = vpack.c.bf16 %v9327_v1, %v9323_v61  ;;  %6709 = vmatpush1.bf16.msra.mxu1 %v9259_v38  ;;  %6628 = vmatprep.subr.bf16.mxu0 %v9264_v60  ;;  %v4083_v38 = vrot.slane %v11946_v54, %v4082_v56  ;;  %v4079_v60 = vrot.slane %v11946_v54, %v4078_v57 }
 0x5de   :  { %v7872_v7 = vpack.c.bf16 %v9329_v3, %v9325_v63  ;;  %6710 = vmatprep.subr.bf16.mxu1 %v9267_v62 }
 0x5df   :  { %6936 = vst [vmem:[#allocation2] sm:$0xff] %v7871_v4 }
 0x5e0   :  { %6937 = vst [vmem:[#allocation2 + $0x8] sm:$0xff] %v7872_v7  ;;  %6629 = vmatpush1.bf16.msra.mxu0 %v9262_v2 }
 0x5e1   :  { %6711 = vmatpush1.bf16.msra.mxu1 %v9265_v5  ;;  %6630 = vmatprep.subr.bf16.mxu0 %v9270_v6 }
 0x5e2   :  { %6712 = vmatprep.subr.bf16.mxu1 %v9273_v8 }
 0x5e4   :  { %6631 = vmatpush1.bf16.msra.mxu0 %v9268_v9 }
 0x5e5   :  { %6713 = vmatpush1.bf16.msra.mxu1 %v9271_v10  ;;  %6632 = vmatprep.subr.bf16.mxu0 %v9276_v11 }
 0x5e6   :  { %6714 = vmatprep.subr.bf16.mxu1 %v9279_v12 }
 0x5e8   :  { %6633 = vmatpush1.bf16.msra.mxu0 %v9274_v16 }
 0x5e9   :  { %6715 = vmatpush1.bf16.msra.mxu1 %v9277_v19  ;;  %7922 = vmatprep.subr.bf16.mxu0 %v9280_v20 }
 0x5ea   :  { %7944 = vmatprep.subr.bf16.mxu1 %v9281_v21 }
 0x5eb   :  { %6635 = vmatmul.mubr.bf16.vlgmr.msra.gmra.mrb[20].mxu0 %v11301_v0 }
 0x5ec   :  { %6717 = vmatmul.mubr.bf16.vlgmr.msra.gmra.mrb[20].mxu1 %v11301_v0  ;;  %7923 = vmatpush3.bf16.msra.mxu0 %v9282_v22 }
 0x5ed   :  { %6757 = vmatprep.mubr.bf16.mxu0 %v11091_v50  ;;  %7945 = vmatpush3.bf16.msra.mxu1 %v9283_v24  ;;  %v9290_v50 = vld [vmem:[%s12244_s8 + $0x100] ss:$52 sps:$4 sm:$0xff]  }
 0x5ee   :  { %6797 = vmatprep.mubr.bf16.mxu1 %v11109_v36  ;;  %7924 = vmatprep.subr.bf16.mxu0 %v9284_v25  ;;  %v9292_v36 = vld [vmem:[%s12244_s8 + $0x4a8] ss:$52 sps:$4 sm:$0xff]   ;;  %s9418_s8 = smov [#allocation4]  }
 0x5ef   :  { %7946 = vmatprep.subr.bf16.mxu1 %v9285_v26  ;;  %s6977_s7 = sshll.u32 %s9418_s8, 4  ;;  %s6978_s7 = int_to_ptr.vmem [resolvable:$true] %s6977_s7 }
 0x5f0   :  { %7925 = vmatpush3.bf16.msra.mxu0 %v9286_v27  ;;  %s9366_s29 = scalar_lea.vmem %s6978_s7, 128  ;;  %p9371_p1 = scmp.lt.s32.totalorder %s6978_s7, %s6978_s7 }
 0x5f1   :  { %7947 = vmatpush3.bf16.msra.mxu1 %v9287_v28  ;;  %7926 = vmatprep.subr.bf16.mxu0 %v9288_v29  ;;  %p9367_p0 = scmp.ne.s32.totalorder %s6978_s7, %s9366_s29  ;;  %p9372_p2 = scmp.lt.s32.totalorder %s9366_s29, %s9366_s29 }
 0x5f2   :  { %7948 = vmatprep.subr.bf16.mxu1 %v9289_v30 }
 0x5f3   :  { %p9373_p3 = por %p9372_p2, %p9371_p1 }
 0x5f4   :  { %7927 = vmatpush3.bf16.msra.mxu0 %v9290_v50 }
 0x5f5   :  { %7949 = vmatpush3.bf16.msra.mxu1 %v9291_v31  ;;  %7928 = vmatprep.subr.bf16.mxu0 %v9292_v36  ;;  %p9374_p4 = pnand %p9373_p3, %p9367_p0 }
 0x5f6   :  { %7950 = vmatprep.subr.bf16.mxu1 %v9293_v33 }
 0x5f8   :  { %7929 = vmatpush3.bf16.msra.mxu0 %v9294_v34 }
 0x5f9   :  { %7951 = vmatpush3.bf16.msra.mxu1 %v9295_v35  ;;  %7930 = vmatprep.subr.bf16.mxu0 %v9296_v37 }
 0x5fa   :  { %7952 = vmatprep.subr.bf16.mxu1 %v9297_v23 }
 0x5fc   :  { %7931 = vmatpush3.bf16.msra.mxu0 %v9298_v39 }
 0x5fd   :  { %7953 = vmatpush3.bf16.msra.mxu1 %v9299_v40  ;;  %7932 = vmatprep.subr.bf16.mxu0 %v9300_v41 }
 0x5fe   :  { %7954 = vmatprep.subr.bf16.mxu1 %v9301_v42 }
 0x600   :  { %7933 = vmatpush3.bf16.msra.mxu0 %v9302_v43 }
 0x601   :  { %7955 = vmatpush3.bf16.msra.mxu1 %v9303_v44  ;;  %7934 = vmatprep.subr.bf16.mxu0 %v9304_v45 }
 0x602   :  { %7956 = vmatprep.subr.bf16.mxu1 %v9305_v46 }
 0x604   :  { %7935 = vmatpush3.bf16.msra.mxu0 %v9306_v47 }
 0x605   :  { %7957 = vmatpush3.bf16.msra.mxu1 %v9307_v48  ;;  %7936 = vmatprep.subr.bf16.mxu0 %v9308_v49 }
 0x606   :  { %7958 = vmatprep.subr.bf16.mxu1 %v9309_v51 }
 0x608   :  { %7937 = vmatpush3.bf16.msra.mxu0 %v9310_v52 }
 0x609   :  { %7959 = vmatpush3.bf16.msra.mxu1 %v9311_v55 }
 0x60b   :  { %6758 = vmatmul.mubr.bf16.vlgmr.msra.gmra.mrb[24].mxu0 %v11099_v53  ;;  %v4087_v53 = vrot.slane %v11946_v54, %v4086_v58 }
 0x60c   :  { %6798 = vmatmul.mubr.bf16.vlgmr.msra.gmra.mrb[24].mxu1 %v11301_v0 }
 0x63e   :  { %v6472_v61 = vpop.f32.mrb[16].mxu0 }
 0x63f   :  { %v7974_v0 = vadd.f32 %v6472_v61, %v4075_v59  ;;  %v6554_v62 = vpop.f32.mrb[16].mxu1  ;;  %v6474_v63 = vpop.f32.mrb[17].mxu0 }
 0x640   :  { %v7976_v1 = vadd.f32 %v6554_v62, %v4083_v38  ;;  %v7975_v2 = vadd.f32 %v6474_v63, %v4079_v60  ;;  %v6556_v3 = vpop.f32.mrb[17].mxu1  ;;  %v6476_v4 = vpop.f32.mrb[18].mxu0 }
 0x641   :  { %v7855_v5 = vmul.f32 -1.442695, %v7974_v0  ;;  %v7977_v6 = vadd.f32 %v6556_v3, %v4087_v53  ;;  %v6558_v7 = vpop.f32.mrb[18].mxu1  ;;  %v6477_v8 = vpop.f32.mrb[19].mxu0 }
 0x642   :  { %v7857_v9 = vmul.f32 -1.442695, %v7976_v1  ;;  %v7856_v10 = vmul.f32 -1.442695, %v7975_v2  ;;  %v6559_v11 = vpop.f32.mrb[19].mxu1 }
 0x643   :  { %9330 = vpow2.f32 %v7855_v5  ;;  %v7858_v12 = vmul.f32 -1.442695, %v7977_v6 }
 0x644   :  { %9332 = vpow2.f32 %v7857_v9 }
 0x645   :  { %9334 = vpow2.f32 %v7856_v10 }
 0x646   :  { %9336 = vpow2.f32 %v7858_v12 }
 0x64d   :  { %v9331_v54 = vpop.eup %9330 }
 0x64e   :  { %v9333_v16 = vpop.eup %9332  ;;  %v6848_v19 = vadd.f32 1.0, %v9331_v54 }
 0x64f   :  { %v9335_v20 = vpop.eup %9334  ;;  %v6850_v21 = vadd.f32 1.0, %v9333_v16 }
 0x650   :  { %v9337_v22 = vpop.eup %9336  ;;  %9338 = vrcp.f32 %v6848_v19  ;;  %v6849_v24 = vadd.f32 1.0, %v9335_v20 }
 0x651   :  { %9340 = vrcp.f32 %v6850_v21  ;;  %v6851_v25 = vadd.f32 1.0, %v9337_v22 }
 0x652   :  { %9342 = vrcp.f32 %v6849_v24 }
 0x653   :  { %9344 = vrcp.f32 %v6851_v25 }
 0x65a   :  { %v9339_v26 = vpop.eup %9338 }
 0x65b   :  { %v9341_v27 = vpop.eup %9340 }
 0x65c   :  { %v9343_v28 = vpop.eup %9342 }
 0x65d   :  { %v9345_v29 = vpop.eup %9344  ;;  %v7873_v30 = vpack.c.bf16 %v9343_v28, %v9339_v26 }
 0x65e   :  { %v7874_v50 = vpack.c.bf16 %v9345_v29, %v9341_v27 }
 0x65f   :  { %6938 = vst [vmem:[#allocation2 + $0x10] sm:$0xff] %v7873_v30 }
 0x660   :  { %6939 = vst [vmem:[#allocation2 + $0x18] sm:$0xff] %v7874_v50 }
 0x661   :  { %9377 = shalt.err (!%p9374_p4)
}
 0x662   :  { %s9378_s3 = scalar_lea.hbm %s12247_s11, 128 }
 0x663   :  { %p9379_p5 = scmp.ne.s32.totalorder %s12247_s11, %s9378_s3  ;;  %p9382_p6 = scmp.lt.u32.totalorder %s9378_s3, %s12247_s11 }
 0x665   :  { %p9384_p7 = pnand %p9382_p6, %p9379_p5 }
 0x667   :  { %9387 = shalt.err (!%p9384_p7)
}
 0x668   :  { %6980 = dma.vmem_to_hbm [thread:$0]  %s6978_s7, 128, %s12247_s11, [#allocation5]   ;;  %v4053_v31 = vld [vmem:[%s12245_s9 + $0x8] sm:$0x1f]  ;;  %vm6942_vm3 = vcmask 519168  }
 0x669   :  { %v4091_v36 = vrot.slane %v4053_v31, %v10826_v14  ;;  %v4099_v33 = vrot.slane %v4053_v31, %v10829_v15  ;;  %v4095_v34 = vrot.slane %v4053_v31, %v10835_v17  ;;  %v4103_v35 = vrot.slane %v4053_v31, %v10838_v18  ;;  %s9419_s9 = smov [#allocation2]  }
 0x66a   :  { %v4107_v1 = vrot.slane %v4053_v31, %v4074_v32  ;;  %s6967_s11 = sshll.u32 %s9419_s9, 4  ;;  %s6968_s11 = int_to_ptr.vmem [resolvable:$true] %s6967_s11 }
 0x66b   :  { %s9388_s17 = scalar_lea.vmem %s6968_s11, 832  ;;  %p9393_p9 = scmp.lt.s32.totalorder %s6968_s11, %s6968_s11 }
 0x66c   :  { %p9389_p8 = scmp.ne.s32.totalorder %s6968_s11, %s9388_s17  ;;  %p9394_p10 = scmp.lt.s32.totalorder %s9388_s17, %s9388_s17 }
 0x66e   :  { %p9395_p11 = por %p9394_p10, %p9393_p9 }
 0x670   :  { %p9396_p12 = pnand %p9395_p11, %p9389_p8 }
 0x6be   :  { %v6636_v37 = vpop.f32.mrb[20].mxu0 }
 0x6bf   :  { %v7978_v23 = vadd.f32 %v6636_v37, %v4091_v36  ;;  %v6718_v39 = vpop.f32.mrb[20].mxu1  ;;  %v6638_v40 = vpop.f32.mrb[21].mxu0 }
 0x6c0   :  { %v7980_v41 = vadd.f32 %v6718_v39, %v4099_v33  ;;  %v7979_v42 = vadd.f32 %v6638_v40, %v4095_v34  ;;  %v6720_v43 = vpop.f32.mrb[21].mxu1  ;;  %v6640_v44 = vpop.f32.mrb[22].mxu0 }
 0x6c1   :  { %v7859_v45 = vmul.f32 -1.442695, %v7978_v23  ;;  %v7981_v46 = vadd.f32 %v6720_v43, %v4103_v35  ;;  %v6722_v47 = vpop.f32.mrb[22].mxu1  ;;  %v6641_v48 = vpop.f32.mrb[23].mxu0 }
 0x6c2   :  { %v7861_v49 = vmul.f32 -1.442695, %v7980_v41  ;;  %v7860_v14 = vmul.f32 -1.442695, %v7979_v42  ;;  %v6723_v51 = vpop.f32.mrb[23].mxu1 }
 0x6c3   :  { %9346 = vpow2.f32 %v7859_v45  ;;  %v7862_v15 = vmul.f32 -1.442695, %v7981_v46 }
 0x6c4   :  { %9348 = vpow2.f32 %v7861_v49 }
 0x6c5   :  { %9350 = vpow2.f32 %v7860_v14 }
 0x6c6   :  { %9352 = vpow2.f32 %v7862_v15 }
 0x6cd   :  { %v9347_v17 = vpop.eup %9346 }
 0x6ce   :  { %v9349_v18 = vpop.eup %9348  ;;  %v6852_v52 = vadd.f32 1.0, %v9347_v17 }
 0x6cf   :  { %v9351_v55 = vpop.eup %9350  ;;  %v6854_v56 = vadd.f32 1.0, %v9349_v18 }
 0x6d0   :  { %v9353_v57 = vpop.eup %9352  ;;  %9354 = vrcp.f32 %v6852_v52  ;;  %v6853_v58 = vadd.f32 1.0, %v9351_v55 }
 0x6d1   :  { %9356 = vrcp.f32 %v6854_v56  ;;  %v6855_v59 = vadd.f32 1.0, %v9353_v57 }
 0x6d2   :  { %9358 = vrcp.f32 %v6853_v58 }
 0x6d3   :  { %9360 = vrcp.f32 %v6855_v59 }
 0x6da   :  { %v9355_v38 = vpop.eup %9354 }
 0x6db   :  { %v9357_v60 = vpop.eup %9356 }
 0x6dc   :  { %v9359_v53 = vpop.eup %9358 }
 0x6dd   :  { %v9361_v61 = vpop.eup %9360  ;;  %v7875_v0 = vpack.c.bf16 %v9359_v53, %v9355_v38 }
 0x6de   :  { %v7876_v62 = vpack.c.bf16 %v9361_v61, %v9357_v60  ;;  %v7938_v63 = vpop.f32.mrb[24].mxu0 }
 0x6df   :  { %6940 = vst [vmem:[#allocation2 + $0x20] sm:$0xff] %v7875_v0  ;;  %v7960_v2 = vpop.f32.mrb[24].mxu1  ;;  %v7939_v3 = vpop.f32.mrb[25].mxu0 }
 0x6e0   :  { %6941 = vst [vmem:[#allocation2 + $0x28] sm:$0xff] %v7876_v62  ;;  %v7940_v4 = vadd.f32 %v7939_v3, %v7938_v63  ;;  %v7961_v5 = vpop.f32.mrb[25].mxu1  ;;  %v7941_v6 = vpop.f32.mrb[26].mxu0 }
 0x6e1   :  { %v7962_v7 = vadd.f32 %v7961_v5, %v7960_v2  ;;  %v7963_v8 = vpop.f32.mrb[26].mxu1  ;;  %v7942_v9 = vpop.f32.mrb[27].mxu0 }
 0x6e2   :  { %v6760_v10 = vadd.f32 %v7940_v4, %v4107_v1  ;;  %v7964_v11 = vpop.f32.mrb[27].mxu1 }
 0x6e4   :  { %v6800_v12 = vadd.f32 %v7962_v7, %v6760_v10 }
 0x6e6   :  { %v7863_v54 = vmul.f32 -1.442695, %v6800_v12 }
 0x6e8   :  { %9362 = vpow2.f32 %v7863_v54 }
 0x6f2   :  { %v9363_v16 = vpop.eup %9362 }
 0x6f3   :  { %v6856_v19 = vadd.f32 1.0, %v9363_v16 }
 0x6f5   :  { %9364 = vrcp.f32 %v6856_v19 }
 0x6ff   :  { %v9365_v13 = vpop.eup %9364 }
 0x700   :  { %v7877_v32 = vpack.c.bf16 %v9365_v13, %v9365_v13 }
 0x702   :  { %6943 = vst.msk [vmem:[#allocation2 + $0x30] sm:$0xf] %vm6942_vm3, %v7877_v32 }
 0x703   :  { %9399 = shalt.err (!%p9396_p12)
}
 0x704   :  { %s9400_s20 = scalar_lea.hbm %s12246_s10, 832 }
 0x705   :  { %p9401_p13 = scmp.ne.s32.totalorder %s12246_s10, %s9400_s20  ;;  %p9404_p0 = scmp.lt.u32.totalorder %s9400_s20, %s12246_s10 }
 0x707   :  { %p9406_p1 = pnand %p9404_p0, %p9401_p13 }
 0x709   :  { %9409 = shalt.err (!%p9406_p1)
}
 0x70a   :  { %6970 = dma.vmem_to_hbm [thread:$0]  %s6968_s11, 832, %s12246_s10, [#allocation3]  }
 0x70b   :  { %9410 = dma.done.wait [#allocation3], 832  }
 0x70c   :  { %9411 = vsyncadd [#allocation3], 4294966464 }
 0x70d   :  { %9412 = dma.done.wait [#allocation5], 128  }
 0x70e   :  { %9413 = vsyncadd [#allocation5], 4294967168 }
 0x70f   :  { %6987 = vsyncpa [#allocation3], 1 }
 0x710   :  { %6988 = vsyncpa [#allocation5], 1 }

</bundles_post_ra>
